<compile_context>
chip_gen: v7x
topology: tpu7x:2x2x1
jax: 0.10.0
libtpu: 0.0.40
codegen_flags: <defaults>
</compile_context>

<pallas_src>
import functools

import jax
import jax.numpy as jnp
import numpy as np
from jax.experimental import pallas as pl
from jax.experimental.pallas import tpu as pltpu

STATE_SIZE = 1080 + 6 + 1          # 1087
ACTION_SIZE = 2
H1, H2, H3 = 1024, 512, 256

PAD_OUT = 128                                   # lane-dense N for fc4
BIAS_TOTAL = H1 + H2 + H3 + PAD_OUT             # 1920
SB_TOTAL = BIAS_TOTAL + H1 + H2                 # 3456 = biases + scale1 + scale2


def _round_up(x, m):
    return ((x + m - 1) // m) * m


def actor_kernel(x_ref, w1_ref, w2_ref, w3_ref, w4_ref, sb_ref, mean_ref):
    # x_ref: (tb, 1087) f32; w1/w2 int8; w3/w4 bf16; sb_ref: (1, 3456) f32.
    x = x_ref[...].astype(jnp.bfloat16)

    b1 = sb_ref[:, 0:H1]
    b2 = sb_ref[:, H1:H1 + H2]
    b3 = sb_ref[:, H1 + H2:H1 + H2 + H3]
    b4 = sb_ref[:, H1 + H2 + H3:BIAS_TOTAL]
    s1 = sb_ref[:, BIAS_TOTAL:BIAS_TOTAL + H1]
    s2 = sb_ref[:, BIAS_TOTAL + H1:SB_TOTAL]

    # fc1: int8 weights dequantized on the VPU (cast to bf16); the per-output-
    # channel scale is folded into the f32 result (tb x H1 muls, not K x H1).
    h = jnp.dot(x, w1_ref[...].astype(jnp.bfloat16),
                preferred_element_type=jnp.float32) * s1 + b1
    h = jnp.maximum(h, 0.0)                                     # relu(fc1)

    h = jnp.dot(h.astype(jnp.bfloat16), w2_ref[...].astype(jnp.bfloat16),
                preferred_element_type=jnp.float32) * s2 + b2
    h = jnp.maximum(h, 0.0)                                     # relu(fc2)

    h = jnp.dot(h.astype(jnp.bfloat16), w3_ref[...],
                preferred_element_type=jnp.float32) + b3
    h = jnp.maximum(h, 0.0)                                     # relu(fc3)

    mean = jnp.dot(h.astype(jnp.bfloat16), w4_ref[...],
                   preferred_element_type=jnp.float32) + b4     # fc4 (padded N)
    # TODO(synk): at very large B, write bf16 here (halves output bytes) and
    # upcast after the wrapper slice.
    mean_ref[...] = mean.astype(mean_ref.dtype)


@functools.partial(jax.jit, static_argnames=("tb",))
def actor_forward(x, params, tb=None):
    """x: (B, STATE_SIZE) f32. Returns (mean, std), each (B, ACTION_SIZE) f32."""
    B = x.shape[0]
    if tb is None:
        # Small B (common RL-actor case): a single grid step, minimal padding.
        # Large B: 256-row tiles amortize per-step overhead and fill MXU M.
        tb = _round_up(B, 16) if B <= 256 else 256
    num_tiles = (B + tb - 1) // tb

    # Megacore sharding only pays with >= ~4 tiles per TensorCore; for tiny
    # grids "parallel" on v7x would DMA the resident weights into both cores.
    dim_sem = ("parallel",) if num_tiles >= 8 else ("arbitrary",)

    mean_padded = pl.pallas_call(
        actor_kernel,
        out_shape=jax.ShapeDtypeStruct((B, PAD_OUT), jnp.float32),
        grid_spec=pltpu.PrefetchScalarGridSpec(
            num_scalar_prefetch=0,
            grid=(num_tiles,),
            in_specs=[
                pl.BlockSpec((tb, STATE_SIZE), lambda i: (i, 0)),   # x tile (f32, unpadded K)
                pl.BlockSpec((STATE_SIZE, H1), lambda i: (0, 0)),   # w1 int8 (VMEM-resident)
                pl.BlockSpec((H1, H2), lambda i: (0, 0)),           # w2 int8
                pl.BlockSpec((H2, H3), lambda i: (0, 0)),           # w3 bf16
                pl.BlockSpec((H3, PAD_OUT), lambda i: (0, 0)),      # w4 bf16 (padded N)
                pl.BlockSpec((1, SB_TOTAL), lambda i: (0, 0)),      # biases + scales
            ],
            out_specs=pl.BlockSpec((tb, PAD_OUT), lambda i: (i, 0)),
        ),
        compiler_params=pltpu.CompilerParams(
            dimension_semantics=dim_sem,
            vmem_limit_bytes=32 << 20,      # v5e default scoped VMEM is 16 MiB
        ),
    )(x, params["w1q"], params["w2q"], params["w3"], params["w4"],
      params["scale_bias"])

    mean = mean_padded[:, :ACTION_SIZE]
    # std = exp(log_std).expand_as(mean); independent of x -> computed here.
    std = jnp.broadcast_to(jnp.exp(params["log_std"]), mean.shape)
    return mean, std


def _quantize_per_channel_int8(w):
    """Symmetric int8 weight-only quantization, per output channel."""
    amax = jnp.max(jnp.abs(w), axis=0)
    scale = jnp.maximum(amax, 1e-12) / 127.0
    q = jnp.clip(jnp.rint(w / scale), -127.0, 127.0).astype(jnp.int8)
    return q, scale.astype(jnp.float32)


def init_params(key):
    """nn.Linear-style U(-1/sqrt(fan_in), 1/sqrt(fan_in)) init, packed for the kernel."""
    def linear(k, fan_in, fan_out):
        kw, kb = jax.random.split(k)
        bound = 1.0 / np.sqrt(fan_in)
        w = jax.random.uniform(kw, (fan_in, fan_out), jnp.float32, -bound, bound)
        b = jax.random.uniform(kb, (fan_out,), jnp.float32, -bound, bound)
        return w, b

    k1, k2, k3, k4 = jax.random.split(key, 4)
    w1, b1 = linear(k1, STATE_SIZE, H1)
    w2, b2 = linear(k2, H1, H2)
    w3, b3 = linear(k3, H2, H3)
    w4, b4 = linear(k4, H3, ACTION_SIZE)
    log_std = jnp.zeros((ACTION_SIZE,), jnp.float32)   # nn.Parameter(zeros)

    # int8 weight-only quantization for the two largest layers (weight DMA is
    # the kernel's bottleneck).
    w1q, s1 = _quantize_per_channel_int8(w1)           # (1087, 1024) int8
    w2q, s2 = _quantize_per_channel_int8(w2)           # (1024, 512)  int8

    # fc4: pad N 2 -> 128 for lane-dense MXU edges / unmasked stores.
    w4p = jnp.zeros((H3, PAD_OUT), jnp.float32).at[:, :ACTION_SIZE].set(w4)
    b4p = jnp.zeros((PAD_OUT,), jnp.float32).at[:ACTION_SIZE].set(b4)

    # One packed f32 row: [b1 | b2 | b3 | b4p | s1 | s2]  -> one small DMA.
    scale_bias = jnp.concatenate([b1, b2, b3, b4p, s1, s2]).reshape(1, SB_TOTAL)

    # TODO(synk): v7x-only fp8 storage for w1/w2 (native MXU fp8, no VPU dequant).
    return {
        "w1q": w1q,
        "w2q": w2q,
        "w3": w3.astype(jnp.bfloat16),
        "w4": w4p.astype(jnp.bfloat16),
        "scale_bias": scale_bias,
        "log_std": log_std,
    }


def actor_reference(x, params):
    """Pure-JAX reference using the same quantized params / f32 accumulation."""
    sb = params["scale_bias"]
    b1 = sb[:, 0:H1]
    b2 = sb[:, H1:H1 + H2]
    b3 = sb[:, H1 + H2:H1 + H2 + H3]
    b4 = sb[:, H1 + H2 + H3:BIAS_TOTAL]
    s1 = sb[:, BIAS_TOTAL:BIAS_TOTAL + H1]
    s2 = sb[:, BIAS_TOTAL + H1:SB_TOTAL]

    xb = x.astype(jnp.bfloat16)
    h = jnp.maximum(jnp.dot(xb, params["w1q"].astype(jnp.bfloat16),
                            preferred_element_type=jnp.float32) * s1 + b1, 0.0)
    h = jnp.maximum(jnp.dot(h.astype(jnp.bfloat16),
                            params["w2q"].astype(jnp.bfloat16),
                            preferred_element_type=jnp.float32) * s2 + b2, 0.0)
    h = jnp.maximum(jnp.dot(h.astype(jnp.bfloat16), params["w3"],
                            preferred_element_type=jnp.float32) + b3, 0.0)
    mean = jnp.dot(h.astype(jnp.bfloat16), params["w4"],
                   preferred_element_type=jnp.float32) + b4
    mean = mean[:, :ACTION_SIZE]
    std = jnp.broadcast_to(jnp.exp(params["log_std"]), mean.shape)
    return mean, std


if __name__ == "__main__":
    key = jax.random.PRNGKey(0)
    kx, kp, kx2 = jax.random.split(key, 3)

    params = init_params(kp)

    # Small-batch path (the common case): single grid step, tb = 16.
    B = 2
    x = jax.random.normal(kx, (B, STATE_SIZE), jnp.float32)
    mean, std = actor_forward(x, params)
    jax.block_until_ready((mean, std))

    mean_ref, std_ref = actor_reference(x, params)
    np.testing.assert_allclose(np.asarray(mean), np.asarray(mean_ref),
                               rtol=2e-3, atol=2e-3)
    np.testing.assert_allclose(np.asarray(std), np.asarray(std_ref),
                               rtol=1e-6, atol=1e-6)

    # Multi-tile path with a ragged last tile (resident weights across steps).
    B2 = 40
    x2 = jax.random.normal(kx2, (B2, STATE_SIZE), jnp.float32)
    mean2, std2 = actor_forward(x2, params, tb=16)      # grid = (3,), last tile ragged
    jax.block_until_ready((mean2, std2))
    mean2_ref, std2_ref = actor_reference(x2, params)
    np.testing.assert_allclose(np.asarray(mean2), np.asarray(mean2_ref),
                               rtol=2e-3, atol=2e-3)
    np.testing.assert_allclose(np.asarray(std2), np.asarray(std2_ref),
                               rtol=1e-6, atol=1e-6)

    print("KERNEL_OK")
</pallas_src>

<mosaic_0001>
module attributes {stable_mosaic.version = 11 : i64} {
  func.func @actor_kernel(%arg0: i32, %arg1: memref<16x1087xf32, #tpu.memory_space<vmem>>, %arg2: memref<1087x1024xi8, #tpu.memory_space<vmem>>, %arg3: memref<1024x512xi8, #tpu.memory_space<vmem>>, %arg4: memref<512x256xbf16, #tpu.memory_space<vmem>>, %arg5: memref<256x128xbf16, #tpu.memory_space<vmem>>, %arg6: memref<1x3456xf32, #tpu.memory_space<vmem>>, %arg7: memref<16x128xf32, #tpu.memory_space<vmem>>) attributes {dimension_semantics = [#tpu.dimension_semantics<arbitrary>], iteration_bounds = array<i64: 1>, scalar_prefetch = 0 : i64, scratch_operands = 0 : i64, tpu.core_type = #tpu.core_type<tc>, window_params = [{transform_indices = @transform_0, window_bounds = array<i64: 16, 1087>}, {pipeline_mode = #tpu.pipeline_mode<synchronous>, transform_indices = @transform_1, window_bounds = array<i64: 1087, 1024>}, {pipeline_mode = #tpu.pipeline_mode<synchronous>, transform_indices = @transform_2, window_bounds = array<i64: 1024, 512>}, {pipeline_mode = #tpu.pipeline_mode<synchronous>, transform_indices = @transform_3, window_bounds = array<i64: 512, 256>}, {pipeline_mode = #tpu.pipeline_mode<synchronous>, transform_indices = @transform_4, window_bounds = array<i64: 256, 128>}, {pipeline_mode = #tpu.pipeline_mode<synchronous>, transform_indices = @transform_5, window_bounds = array<i64: 1, 3456>}, {transform_indices = @transform_6, window_bounds = array<i64: 16, 128>}]} {
    %c0 = arith.constant 0 : index
    %c0_0 = arith.constant 0 : index
    %0 = vector.load %arg1[%c0, %c0_0] : memref<16x1087xf32, #tpu.memory_space<vmem>>, vector<16x1087xf32>
    %1 = arith.truncf %0 : vector<16x1087xf32> to vector<16x1087xbf16>
    %c0_1 = arith.constant 0 : index
    %c0_2 = arith.constant 0 : index
    %2 = vector.load %arg6[%c0_1, %c0_2] : memref<1x3456xf32, #tpu.memory_space<vmem>>, vector<1x1024xf32>
    %c0_3 = arith.constant 0 : index
    %c1024 = arith.constant 1024 : index
    %3 = vector.load %arg6[%c0_3, %c1024] : memref<1x3456xf32, #tpu.memory_space<vmem>>, vector<1x512xf32>
    %c0_4 = arith.constant 0 : index
    %c1536 = arith.constant 1536 : index
    %4 = vector.load %arg6[%c0_4, %c1536] : memref<1x3456xf32, #tpu.memory_space<vmem>>, vector<1x256xf32>
    %c0_5 = arith.constant 0 : index
    %c1792 = arith.constant 1792 : index
    %5 = vector.load %arg6[%c0_5, %c1792] : memref<1x3456xf32, #tpu.memory_space<vmem>>, vector<1x128xf32>
    %c0_6 = arith.constant 0 : index
    %c1920 = arith.constant 1920 : index
    %6 = vector.load %arg6[%c0_6, %c1920] : memref<1x3456xf32, #tpu.memory_space<vmem>>, vector<1x1024xf32>
    %c0_7 = arith.constant 0 : index
    %c2944 = arith.constant 2944 : index
    %7 = vector.load %arg6[%c0_7, %c2944] : memref<1x3456xf32, #tpu.memory_space<vmem>>, vector<1x512xf32>
    %c0_8 = arith.constant 0 : index
    %c0_9 = arith.constant 0 : index
    %8 = vector.load %arg2[%c0_8, %c0_9] : memref<1087x1024xi8, #tpu.memory_space<vmem>>, vector<1087x1024xi8>
    %9 = arith.sitofp %8 : vector<1087x1024xi8> to vector<1087x1024xbf16>
    %cst = arith.constant dense<0.000000e+00> : vector<16x1024xf32>
    %10 = tpu.matmul %1, %9, %cst {dimension_numbers = #tpu.dot_dimension_numbers<[1], [0], [0], [1], [0, 0, 1, 1], [], []>} : vector<16x1087xbf16>, vector<1087x1024xbf16>, vector<16x1024xf32> -> vector<16x1024xf32>
    %11 = vector.broadcast %6 : vector<1x1024xf32> to vector<16x1024xf32>
    %12 = arith.mulf %10, %11 : vector<16x1024xf32>
    %13 = vector.broadcast %2 : vector<1x1024xf32> to vector<16x1024xf32>
    %14 = arith.addf %12, %13 : vector<16x1024xf32>
    %cst_10 = arith.constant 0.000000e+00 : f32
    %15 = vector.broadcast %cst_10 : f32 to vector<16x1024xf32>
    %16 = arith.maximumf %14, %15 : vector<16x1024xf32>
    %17 = arith.truncf %16 : vector<16x1024xf32> to vector<16x1024xbf16>
    %c0_11 = arith.constant 0 : index
    %c0_12 = arith.constant 0 : index
    %18 = vector.load %arg3[%c0_11, %c0_12] : memref<1024x512xi8, #tpu.memory_space<vmem>>, vector<1024x512xi8>
    %19 = arith.sitofp %18 : vector<1024x512xi8> to vector<1024x512xbf16>
    %cst_13 = arith.constant dense<0.000000e+00> : vector<16x512xf32>
    %20 = tpu.matmul %17, %19, %cst_13 {dimension_numbers = #tpu.dot_dimension_numbers<[1], [0], [0], [1], [0, 0, 1, 1], [], []>} : vector<16x1024xbf16>, vector<1024x512xbf16>, vector<16x512xf32> -> vector<16x512xf32>
    %21 = vector.broadcast %7 : vector<1x512xf32> to vector<16x512xf32>
    %22 = arith.mulf %20, %21 : vector<16x512xf32>
    %23 = vector.broadcast %3 : vector<1x512xf32> to vector<16x512xf32>
    %24 = arith.addf %22, %23 : vector<16x512xf32>
    %cst_14 = arith.constant 0.000000e+00 : f32
    %25 = vector.broadcast %cst_14 : f32 to vector<16x512xf32>
    %26 = arith.maximumf %24, %25 : vector<16x512xf32>
    %27 = arith.truncf %26 : vector<16x512xf32> to vector<16x512xbf16>
    %c0_15 = arith.constant 0 : index
    %c0_16 = arith.constant 0 : index
    %28 = vector.load %arg4[%c0_15, %c0_16] : memref<512x256xbf16, #tpu.memory_space<vmem>>, vector<512x256xbf16>
    %cst_17 = arith.constant dense<0.000000e+00> : vector<16x256xf32>
    %29 = tpu.matmul %27, %28, %cst_17 {dimension_numbers = #tpu.dot_dimension_numbers<[1], [0], [0], [1], [0, 0, 1, 1], [], []>} : vector<16x512xbf16>, vector<512x256xbf16>, vector<16x256xf32> -> vector<16x256xf32>
    %30 = vector.broadcast %4 : vector<1x256xf32> to vector<16x256xf32>
    %31 = arith.addf %29, %30 : vector<16x256xf32>
    %cst_18 = arith.constant 0.000000e+00 : f32
    %32 = vector.broadcast %cst_18 : f32 to vector<16x256xf32>
    %33 = arith.maximumf %31, %32 : vector<16x256xf32>
    %34 = arith.truncf %33 : vector<16x256xf32> to vector<16x256xbf16>
    %c0_19 = arith.constant 0 : index
    %c0_20 = arith.constant 0 : index
    %35 = vector.load %arg5[%c0_19, %c0_20] : memref<256x128xbf16, #tpu.memory_space<vmem>>, vector<256x128xbf16>
    %cst_21 = arith.constant dense<0.000000e+00> : vector<16x128xf32>
    %36 = tpu.matmul %34, %35, %cst_21 {dimension_numbers = #tpu.dot_dimension_numbers<[1], [0], [0], [1], [0, 0, 1, 1], [], []>} : vector<16x256xbf16>, vector<256x128xbf16>, vector<16x128xf32> -> vector<16x128xf32>
    %37 = vector.broadcast %5 : vector<1x128xf32> to vector<16x128xf32>
    %38 = arith.addf %36, %37 : vector<16x128xf32>
    %c0_22 = arith.constant 0 : index
    %c0_23 = arith.constant 0 : index
    %39 = vector.load %arg7[%c0_22, %c0_23] : memref<16x128xf32, #tpu.memory_space<vmem>>, vector<16x128xf32>
    tpu.vector_store %arg7[%c0_22, %c0_23], %38 {strides = array<i32>} : memref<16x128xf32, #tpu.memory_space<vmem>>, vector<16x128xf32>,
    return
  }
  func.func @transform_0(%arg0: i32) -> (i32, i32) {
    %c0_i32 = arith.constant 0 : i32
    %c0_i32_0 = arith.constant 0 : i32
    return %arg0, %c0_i32 : i32, i32
  }
  func.func @transform_1(%arg0: i32) -> (i32, i32) {
    %c0_i32 = arith.constant 0 : i32
    %c0_i32_0 = arith.constant 0 : i32
    %c0_i32_1 = arith.constant 0 : i32
    return %c0_i32, %c0_i32_0 : i32, i32
  }
  func.func @transform_2(%arg0: i32) -> (i32, i32) {
    %c0_i32 = arith.constant 0 : i32
    %c0_i32_0 = arith.constant 0 : i32
    %c0_i32_1 = arith.constant 0 : i32
    return %c0_i32, %c0_i32_0 : i32, i32
  }
  func.func @transform_3(%arg0: i32) -> (i32, i32) {
    %c0_i32 = arith.constant 0 : i32
    %c0_i32_0 = arith.constant 0 : i32
    %c0_i32_1 = arith.constant 0 : i32
    return %c0_i32, %c0_i32_0 : i32, i32
  }
  func.func @transform_4(%arg0: i32) -> (i32, i32) {
    %c0_i32 = arith.constant 0 : i32
    %c0_i32_0 = arith.constant 0 : i32
    %c0_i32_1 = arith.constant 0 : i32
    return %c0_i32, %c0_i32_0 : i32, i32
  }
  func.func @transform_5(%arg0: i32) -> (i32, i32) {
    %c0_i32 = arith.constant 0 : i32
    %c0_i32_0 = arith.constant 0 : i32
    %c0_i32_1 = arith.constant 0 : i32
    return %c0_i32, %c0_i32_0 : i32, i32
  }
  func.func @transform_6(%arg0: i32) -> (i32, i32) {
    %c0_i32 = arith.constant 0 : i32
    %c0_i32_0 = arith.constant 0 : i32
    return %arg0, %c0_i32 : i32, i32
  }
}

</mosaic_0001>

<bundles_post_ra>
// kernel: actor_forward.1
= control target key start
LH: loop header
LB: loop body
LE: loop exit
PB: predicated region body
PF: predicated region fallthrough
CT: control target
= control target key end

     0   :  { %11 = vsyncpa [#allocation3], 0  ;;  %s8997_s0 = inlined_call_operand.hbm [shape: f32[2,1087], index: 0, kind: input, shape index: {}]   ;;  %s8998_s1 = inlined_call_operand.hbm [shape: s8[1087,1024], index: 1, kind: input, shape index: {}]   ;;  %s8999_s2 = inlined_call_operand.hbm [shape: s8[1024,512], index: 2, kind: input, shape index: {}]   ;;  %s9000_s3 = inlined_call_operand.hbm [shape: bf16[512,256], index: 3, kind: input, shape index: {}]   ;;  %s9001_s4 = inlined_call_operand.hbm [shape: bf16[256,128], index: 4, kind: input, shape index: {}]   ;;  %s9002_s5 = inlined_call_operand.hbm [shape: f32[1,3456], index: 5, kind: input, shape index: {}]   ;;  %s9003_s6 = inlined_call_operand.hbm [shape: f32[2,128], index: 6, kind: output, shape index: {}]  }
   0x1   :  { %12 = vsyncpa [#allocation6], 0 }
   0x2   :  { %13 = vsyncpa [#allocation9], 0 }
   0x3   :  { %14 = vsyncpa [#allocation12], 0 }
   0x4   :  { %15 = vsyncpa [#allocation4], 0 }
   0x5   :  { %20 = vsyncadd [#allocation3], 2016  ;;  %s7515_s21 = smov [#allocation5]   ;;  %s7351_s25 = scalar_lea.hbm %s8998_s1, 34816 }
   0x6   :  { %s33_s22 = sshll.u32 %s7515_s21, 4  ;;  %p7352_p0 = scmp.ne.s32.totalorder %s8998_s1, %s7351_s25  ;;  %s34_s22 = int_to_ptr.vmem [resolvable:$true] %s33_s22 }
   0x7   :  { %p7355_p1 = scmp.lt.u32.totalorder %s7351_s25, %s8998_s1 }
   0x9   :  { %p7357_p2 = pnand %p7355_p1, %p7352_p0 }
   0xb   :  { %7360 = shalt.err (!%p7357_p2)
}
   0xc   :  { %s7361_s30 = scalar_lea.vmem %s34_s22, 34816  ;;  %p7366_p4 = scmp.lt.s32.totalorder %s34_s22, %s34_s22 }
   0xd   :  { %p7362_p3 = scmp.ne.s32.totalorder %s34_s22, %s7361_s30  ;;  %p7367_p5 = scmp.lt.s32.totalorder %s7361_s30, %s7361_s30 }
   0xf   :  { %p7368_p6 = por %p7367_p5, %p7366_p4 }
  0x11   :  { %p7369_p7 = pnand %p7368_p6, %p7362_p3 }
  0x13   :  { %7372 = shalt.err (!%p7369_p7)
}
  0x14   :  { %s7516_s7 = smov 256   ;;  %s7517_s8 = smov 16  }
  0x15   :  { %39 = dma.hbm_to_vmem [thread:$0]  %s8998_s1, 34816, %s34_s22, [#allocation6], %s7516_s7, %s7516_s7, %s7517_s8  }
  0x16   :  { %s7518_s11 = smov [#allocation8]   ;;  %s7373_s15 = scalar_lea.hbm %s9000_s3, 8192 }
  0x17   :  { %s57_s12 = sshll.u32 %s7518_s11, 4  ;;  %p7374_p8 = scmp.ne.s32.totalorder %s9000_s3, %s7373_s15  ;;  %s58_s12 = int_to_ptr.vmem [resolvable:$true] %s57_s12 }
  0x18   :  { %p7377_p9 = scmp.lt.u32.totalorder %s7373_s15, %s9000_s3 }
  0x1a   :  { %p7379_p10 = pnand %p7377_p9, %p7374_p8 }
  0x1c   :  { %7382 = shalt.err (!%p7379_p10)
}
  0x1d   :  { %s7383_s20 = scalar_lea.vmem %s58_s12, 8192  ;;  %p7388_p12 = scmp.lt.s32.totalorder %s58_s12, %s58_s12 }
  0x1e   :  { %p7384_p11 = scmp.ne.s32.totalorder %s58_s12, %s7383_s20  ;;  %p7389_p13 = scmp.lt.s32.totalorder %s7383_s20, %s7383_s20 }
  0x20   :  { %p7390_p0 = por %p7389_p13, %p7388_p12 }
  0x22   :  { %p7391_p1 = pnand %p7390_p0, %p7384_p11 }
  0x24   :  { %7394 = shalt.err (!%p7391_p1)
}
  0x25   :  { %s7519_s1 = smov 128   ;;  %s7520_s21 = smov 8  }
  0x26   :  { %63 = dma.hbm_to_vmem [thread:$0]  %s9000_s3, 8192, %s58_s12, [#allocation9], %s7519_s1, %s7519_s1, %s7520_s21  }
  0x27   :  { %s7521_s24 = smov [#allocation2]   ;;  %s7395_s28 = scalar_lea.hbm %s8997_s0, 288 }
  0x28   :  { %s21_s25 = sshll.u32 %s7521_s24, 4  ;;  %p7396_p2 = scmp.ne.s32.totalorder %s8997_s0, %s7395_s28  ;;  %s22_s25 = int_to_ptr.vmem [resolvable:$true] %s21_s25 }
  0x29   :  { %p7399_p3 = scmp.lt.u32.totalorder %s7395_s28, %s8997_s0 }
  0x2b   :  { %p7401_p4 = pnand %p7399_p3, %p7396_p2 }
  0x2d   :  { %7404 = shalt.err (!%p7401_p4)
}
  0x2e   :  { %s7405_s9 = scalar_lea.vmem %s22_s25, 288  ;;  %s7409_s3 = scalar_lea.vmem %s22_s25, 2304 }
  0x2f   :  { %p7406_p5 = scmp.ne.s32.totalorder %s22_s25, %s7405_s9  ;;  %p7410_p6 = scmp.lt.s32.totalorder %s22_s25, %s22_s25 }
  0x30   :  { %p7411_p7 = scmp.lt.s32.totalorder %s7409_s3, %s7405_s9 }
  0x32   :  { %p7412_p8 = por %p7411_p7, %p7410_p6 }
  0x34   :  { %p7413_p9 = pnand %p7412_p8, %p7406_p5 }
  0x36   :  { %7416 = shalt.err (!%p7413_p9)
}
  0x37   :  { %s7522_s10 = smov 288   ;;  %s7523_s11 = smov 18  }
  0x38   :  { %27 = dma.hbm_to_vmem [thread:$0]  %s8997_s0, 288, %s22_s25, [#allocation3], %s7522_s10, %s7522_s10, %s7523_s11  }
  0x39   :  { %s7524_s14 = smov [#allocation7]   ;;  %s7417_s18 = scalar_lea.hbm %s8999_s2, 16384 }
  0x3a   :  { %s45_s15 = sshll.u32 %s7524_s14, 4  ;;  %p7418_p10 = scmp.ne.s32.totalorder %s8999_s2, %s7417_s18  ;;  %s46_s15 = int_to_ptr.vmem [resolvable:$true] %s45_s15 }
  0x3b   :  { %p7421_p11 = scmp.lt.u32.totalorder %s7417_s18, %s8999_s2 }
  0x3d   :  { %p7423_p12 = pnand %p7421_p11, %p7418_p10 }
  0x3f   :  { %7426 = shalt.err (!%p7423_p12)
}
  0x40   :  { %s7427_s22 = scalar_lea.vmem %s46_s15, 16384  ;;  %p7432_p0 = scmp.lt.s32.totalorder %s46_s15, %s46_s15 }
  0x41   :  { %p7428_p13 = scmp.ne.s32.totalorder %s46_s15, %s7427_s22  ;;  %p7433_p1 = scmp.lt.s32.totalorder %s7427_s22, %s7427_s22 }
  0x43   :  { %p7434_p2 = por %p7433_p1, %p7432_p0 }
  0x45   :  { %p7435_p3 = pnand %p7434_p2, %p7428_p13 }
  0x47   :  { %7438 = shalt.err (!%p7435_p3)
}
  0x48   :  { %s7525_s0 = smov 512   ;;  %s7526_s23 = smov 32  }
  0x49   :  { %51 = dma.hbm_to_vmem [thread:$0]  %s8999_s2, 16384, %s46_s15, [#allocation6], %s7525_s0, %s7525_s0, %s7526_s23  }
  0x4a   :  { %s7527_s26 = smov [#allocation10]   ;;  %s7439_s30 = scalar_lea.hbm %s9001_s4, 2048 }
  0x4b   :  { %s69_s27 = sshll.u32 %s7527_s26, 4  ;;  %p7440_p4 = scmp.ne.s32.totalorder %s9001_s4, %s7439_s30  ;;  %s70_s27 = int_to_ptr.vmem [resolvable:$true] %s69_s27 }
  0x4c   :  { %p7443_p5 = scmp.lt.u32.totalorder %s7439_s30, %s9001_s4 }
  0x4e   :  { %p7445_p6 = pnand %p7443_p5, %p7440_p4 }
  0x50   :  { %7448 = shalt.err (!%p7445_p6)
}
  0x51   :  { %s7449_s10 = scalar_lea.vmem %s70_s27, 2048  ;;  %p7454_p8 = scmp.lt.s32.totalorder %s70_s27, %s70_s27 }
  0x52   :  { %p7450_p7 = scmp.ne.s32.totalorder %s70_s27, %s7449_s10  ;;  %p7455_p9 = scmp.lt.s32.totalorder %s7449_s10, %s7449_s10 }
  0x54   :  { %p7456_p10 = por %p7455_p9, %p7454_p8 }
  0x56   :  { %p7457_p11 = pnand %p7456_p10, %p7450_p7 }
  0x58   :  { %7460 = shalt.err (!%p7457_p11)
}
  0x59   :  { %s7528_s2 = smov 64   ;;  %s7529_s11 = smov 4  }
  0x5a   :  { %75 = dma.hbm_to_vmem [thread:$0]  %s9001_s4, 2048, %s70_s27, [#allocation9], %s7528_s2, %s7528_s2, %s7529_s11  }
  0x5b   :  { %s7530_s14 = smov [#allocation11]   ;;  %s7461_s18 = scalar_lea.hbm %s9002_s5, 432 }
  0x5c   :  { %s82_s15 = sshll.u32 %s7530_s14, 4  ;;  %p7462_p12 = scmp.ne.s32.totalorder %s9002_s5, %s7461_s18  ;;  %s83_s15 = int_to_ptr.vmem [resolvable:$true] %s82_s15 }
  0x5d   :  { %p7465_p13 = scmp.lt.u32.totalorder %s7461_s18, %s9002_s5 }
  0x5f   :  { %p7467_p0 = pnand %p7465_p13, %p7462_p12 }
  0x61   :  { %7470 = shalt.err (!%p7467_p0)
}
  0x62   :  { %s7471_s22 = scalar_lea.vmem %s83_s15, 432  ;;  %s7475_s4 = scalar_lea.vmem %s83_s15, 448 }
  0x63   :  { %p7472_p1 = scmp.ne.s32.totalorder %s83_s15, %s7471_s22  ;;  %p7476_p2 = scmp.lt.s32.totalorder %s83_s15, %s83_s15 }
  0x64   :  { %p7477_p3 = scmp.lt.s32.totalorder %s7475_s4, %s7471_s22 }
  0x66   :  { %p7478_p4 = por %p7477_p3, %p7476_p2 }
  0x68   :  { %p7479_p5 = pnand %p7478_p4, %p7472_p1 }
  0x6a   :  { %7482 = shalt.err (!%p7479_p5)
}
  0x6b   :  { %85 = dma.hbm_to_vmem [thread:$0]  %s9002_s5, 432, %s83_s15, [#allocation12]  }
  0x6c   :  { %7505 = dma.done.wait [#allocation3], 2304  }
  0x6d   :  { %7506 = vsyncadd [#allocation3], 4294964992 }
  0x6e   :  { %7507 = dma.done.wait [#allocation6], 51200  }
  0x6f   :  { %7508 = vsyncadd [#allocation6], 4294916096 }
  0x70   :  { %7509 = dma.done.wait [#allocation9], 10240  }
  0x71   :  { %7510 = vsyncadd [#allocation9], 4294957056 }
  0x72   :  { %7511 = dma.done.wait [#allocation12], 432  }
  0x73   :  { %7512 = vsyncadd [#allocation12], 4294966864  ;;  %v7644_v0 = vld [vmem:[#allocation5] sm:$0xff]  ;;  %v7646_v1 = vld [vmem:[#allocation5 + $0x10] sm:$0xff]  ;;  %vm3896_vm0 = vcmask 1046528   ;;  %vm3897_vm1 = vcmask 1047552  }
  0x74   :  { %v7648_v2 = vld [vmem:[#allocation5 + $0x200] sm:$0xff]  ;;  %v636_v3 = vunpack.c.l.s8.bf16 %v7644_v0  ;;  %v640_v4 = vunpack.c.l.s8.bf16 %v7646_v1  ;;  %v7652_v5 = vld [vmem:[#allocation5 + $0x210] sm:$0xff]  ;;  %vm3892_vm2 = vcmask 515072  }
  0x75   :  { %9110 = vst [vmem:[#allocation19_spill] sm:$0xff] %v7648_v2  ;;  %9111 = vst [vmem:[#allocation20_spill] sm:$0xff] %v7652_v5  ;;  %v7654_v6 = vld [vmem:[#allocation5 + $0x20] sm:$0xff]  ;;  %v7656_v7 = vld [vmem:[#allocation5 + $0x30] sm:$0xff]  ;;  %v764_v8 = vunpack.c.l.s8.bf16 %v7648_v2  ;;  %v9004_v9 = vunpack.c.h.s8.bf16 %v7648_v2  ;;  %v768_v10 = vunpack.c.l.s8.bf16 %v7652_v5  ;;  %v9005_v11 = vunpack.c.h.s8.bf16 %v7652_v5 }
  0x76   :  { %v432_v12 = vld [vmem:[#allocation5 + $0x220] sm:$0xff]  ;;  %v434_v13 = vld [vmem:[#allocation5 + $0x230] sm:$0xff]  ;;  %v6405_v15 = vcombine.high %v636_v3, %v640_v4  ;;  %v6404_v16 = vcombine.low %v636_v3, %v640_v4  ;;  %v644_v17 = vunpack.c.l.s8.bf16 %v7654_v6  ;;  %v648_v24 = vunpack.c.l.s8.bf16 %v7656_v7 }
  0x77   :  { %v7662_v14 = vld [vmem:[#allocation5 + $0x40] sm:$0xff]  ;;  %v7665_v18 = vld [vmem:[#allocation5 + $0x50] sm:$0xff]  ;;  %v6533_v21 = vcombine.high %v764_v8, %v768_v10  ;;  %v7671_v22 = vcombine.low %v9004_v9, %v9005_v11  ;;  %v6532_v23 = vcombine.low %v764_v8, %v768_v10  ;;  %v772_v25 = vunpack.c.l.s8.bf16 %v432_v12 }
  0x78   :  { %v436_v19 = vld [vmem:[#allocation5 + $0x240] sm:$0xff]  ;;  %v438_v20 = vld [vmem:[#allocation5 + $0x250] sm:$0xff]  ;;  %3924 = vmatprep.subr.bf16.mxu1 %v6405_v15  ;;  %v776_v26 = vunpack.c.l.s8.bf16 %v434_v13  ;;  %v652_v27 = vunpack.c.l.s8.bf16 %v7662_v14  ;;  %v656_v28 = vunpack.c.l.s8.bf16 %v7665_v18  ;;  %v6413_v31 = vcombine.high %v644_v17, %v648_v24 }
  0x79   :  { %9112 = vst [vmem:[#allocation21_spill] sm:$0xff] %v7671_v22  ;;  %v7676_v29 = vld [vmem:[#allocation5 + $0x60] sm:$0xff]  ;;  %v7678_v30 = vld [vmem:[#allocation5 + $0x70] sm:$0xff]  ;;  %3967 = vmatprep.subr.bf16.mxu0 %v6533_v21  ;;  %3925 = vmatpush1.bf16.msra.mxu1 %v6404_v16  ;;  %v6412_v32 = vcombine.low %v644_v17, %v648_v24  ;;  %v780_v33 = vunpack.c.l.s8.bf16 %v436_v19  ;;  %v784_v34 = vunpack.c.l.s8.bf16 %v438_v20  ;;  %v653_v2 = vunpack.c.h.s8.bf16 %v7662_v14 }
  0x7a   :  { %v440_v35 = vld [vmem:[#allocation5 + $0x260] sm:$0xff]  ;;  %v442_v36 = vld [vmem:[#allocation5 + $0x270] sm:$0xff]  ;;  %3968 = vmatpush1.bf16.msra.mxu0 %v6532_v23  ;;  %v6541_v37 = vcombine.high %v772_v25, %v776_v26  ;;  %v6540_v38 = vcombine.low %v772_v25, %v776_v26  ;;  %v6421_v39 = vcombine.high %v652_v27, %v656_v28  ;;  %3926 = vmatprep.subr.bf16.mxu1 %v6413_v31  ;;  %v660_v41 = vunpack.c.l.s8.bf16 %v7676_v29 }
  0x7b   :  { %v6549_v40 = vcombine.high %v780_v33, %v784_v34  ;;  %v664_v42 = vunpack.c.l.s8.bf16 %v7678_v30  ;;  %v7682_v43 = vld [vmem:[#allocation5 + $0x80] sm:$0xff]  ;;  %v7684_v44 = vld [vmem:[#allocation5 + $0x90] sm:$0xff]  ;;  %v788_v45 = vunpack.c.l.s8.bf16 %v440_v35  ;;  %v792_v46 = vunpack.c.l.s8.bf16 %v442_v36 }
  0x7c   :  { %3969 = vmatprep.subr.bf16.mxu0 %v6541_v37  ;;  %v444_v47 = vld [vmem:[#allocation5 + $0x280] sm:$0xff]  ;;  %v446_v48 = vld [vmem:[#allocation5 + $0x290] sm:$0xff]  ;;  %v6420_v49 = vcombine.low %v652_v27, %v656_v28  ;;  %v6548_v50 = vcombine.low %v780_v33, %v784_v34  ;;  %v668_v52 = vunpack.c.l.s8.bf16 %v7682_v43  ;;  %v672_v53 = vunpack.c.l.s8.bf16 %v7684_v44 }
  0x7d   :  { %3927 = vmatpush1.bf16.msra.mxu1 %v6412_v32  ;;  %v6429_v51 = vcombine.high %v660_v41, %v664_v42  ;;  %v6557_v54 = vcombine.high %v788_v45, %v792_v46  ;;  %v796_v55 = vunpack.c.l.s8.bf16 %v444_v47  ;;  %v800_v56 = vunpack.c.l.s8.bf16 %v446_v48  ;;  %v7688_v57 = vld [vmem:[#allocation5 + $0xa0] sm:$0xff]  ;;  %v7690_v58 = vld [vmem:[#allocation5 + $0xb0] sm:$0xff] }
  0x7e   :  { %3970 = vmatpush1.bf16.msra.mxu0 %v6540_v38  ;;  %3928 = vmatprep.subr.bf16.mxu1 %v6421_v39  ;;  %v448_v59 = vld [vmem:[#allocation5 + $0x2a0] sm:$0xff]  ;;  %v450_v60 = vld [vmem:[#allocation5 + $0x2b0] sm:$0xff]  ;;  %v6428_v61 = vcombine.low %v660_v41, %v664_v42  ;;  %v6556_v62 = vcombine.low %v788_v45, %v792_v46  ;;  %v6437_v63 = vcombine.high %v668_v52, %v672_v53  ;;  %v676_v3 = vunpack.c.l.s8.bf16 %v7688_v57 }
  0x7f   :  { %3971 = vmatprep.subr.bf16.mxu0 %v6549_v40  ;;  %v680_v4 = vunpack.c.l.s8.bf16 %v7690_v58  ;;  %v6565_v8 = vcombine.high %v796_v55, %v800_v56  ;;  %v804_v10 = vunpack.c.l.s8.bf16 %v448_v59  ;;  %v808_v12 = vunpack.c.l.s8.bf16 %v450_v60  ;;  %v7694_v13 = vld [vmem:[#allocation5 + $0xc0] sm:$0xff]  ;;  %v7696_v15 = vld [vmem:[#allocation5 + $0xd0] sm:$0xff] }
  0x80   :  { %v452_v16 = vld [vmem:[#allocation5 + $0x2c0] sm:$0xff]  ;;  %v454_v17 = vld [vmem:[#allocation5 + $0x2d0] sm:$0xff]  ;;  %v6436_v19 = vcombine.low %v668_v52, %v672_v53  ;;  %v6564_v20 = vcombine.low %v796_v55, %v800_v56  ;;  %v684_v23 = vunpack.c.l.s8.bf16 %v7694_v13  ;;  %v688_v24 = vunpack.c.l.s8.bf16 %v7696_v15 }
  0x81   :  { %3929 = vmatpush1.bf16.msra.mxu1 %v6420_v49  ;;  %v6445_v21 = vcombine.high %v676_v3, %v680_v4  ;;  %v6573_v25 = vcombine.high %v804_v10, %v808_v12  ;;  %v812_v26 = vunpack.c.l.s8.bf16 %v452_v16  ;;  %v816_v27 = vunpack.c.l.s8.bf16 %v454_v17  ;;  %v7700_v28 = vld [vmem:[#allocation5 + $0xe0] sm:$0xff]  ;;  %v7702_v31 = vld [vmem:[#allocation5 + $0xf0] sm:$0xff] }
  0x82   :  { %3972 = vmatpush1.bf16.msra.mxu0 %v6548_v50  ;;  %3930 = vmatprep.subr.bf16.mxu1 %v6429_v51  ;;  %v456_v32 = vld [vmem:[#allocation5 + $0x2e0] sm:$0xff]  ;;  %v458_v33 = vld [vmem:[#allocation5 + $0x2f0] sm:$0xff]  ;;  %v7531_v34 = vmov 1983009808   ;;  %v160_v36 = vlaneseq  ;;  %v6444_v37 = vcombine.low %v676_v3, %v680_v4  ;;  %v6572_v38 = vcombine.low %v804_v10, %v808_v12 }
  0x83   :  { %3973 = vmatprep.subr.bf16.mxu0 %v6557_v54  ;;  %v158_v35 = vunpack.c.l.s4 %v7531_v34  ;;  %v6453_v39 = vcombine.high %v684_v23, %v688_v24  ;;  %v692_v40 = vunpack.c.l.s8.bf16 %v7700_v28  ;;  %v696_v41 = vunpack.c.l.s8.bf16 %v7702_v31  ;;  %v7706_v47 = vld [vmem:[#allocation5 + $0x100] sm:$0xff]  ;;  %v7708_v48 = vld [vmem:[#allocation5 + $0x110] sm:$0xff] }
  0x84   :  { %v6581_v42 = vcombine.high %v812_v26, %v816_v27  ;;  %v820_v45 = vunpack.c.l.s8.bf16 %v456_v32  ;;  %v824_v46 = vunpack.c.l.s8.bf16 %v458_v33  ;;  %v460_v49 = vld [vmem:[#allocation5 + $0x300] sm:$0xff]  ;;  %v462_v50 = vld [vmem:[#allocation5 + $0x310] sm:$0xff]  ;;  %v7710_v52 = vshrl.u32 %v160_v36, 7 }
  0x85   :  { %3931 = vmatpush1.bf16.msra.mxu1 %v6428_v61  ;;  %v159_v51 = vunpack.c.0.s8 %v158_v35  ;;  %v6452_v53 = vcombine.low %v684_v23, %v688_v24  ;;  %v6580_v54 = vcombine.low %v812_v26, %v816_v27  ;;  %v6461_v55 = vcombine.high %v692_v40, %v696_v41  ;;  %v7716_v3 = vld [vmem:[#allocation5 + $0x130] sm:$0xff]  ;;  %v464_v4 = vld [vmem:[#allocation5 + $0x320] sm:$0xff] }
  0x86   :  { %3974 = vmatpush1.bf16.msra.mxu0 %v6556_v62  ;;  %3932 = vmatprep.subr.bf16.mxu1 %v6437_v63  ;;  %9113 = vst [vmem:[#allocation22_spill] sm:$0xff] %v7710_v52  ;;  %v700_v56 = vunpack.c.l.s8.bf16 %v7706_v47  ;;  %v704_v59 = vunpack.c.l.s8.bf16 %v7708_v48  ;;  %v6589_v60 = vcombine.high %v820_v45, %v824_v46  ;;  %v828_v61 = vunpack.c.l.s8.bf16 %v460_v49  ;;  %v7714_v63 = vld [vmem:[#allocation5 + $0x120] sm:$0xff]  ;;  %v7725_v27 = vld [vmem:[#allocation5 + $0x150] sm:$0xff] }
  0x87   :  { %3975 = vmatprep.subr.bf16.mxu0 %v6565_v8  ;;  %v832_v62 = vunpack.c.l.s8.bf16 %v462_v50  ;;  %v466_v8 = vld [vmem:[#allocation5 + $0x330] sm:$0xff]  ;;  %v7719_v16 = vsub.s32 %v159_v51, %v7710_v52  ;;  %v6460_v17 = vcombine.low %v692_v40, %v696_v41  ;;  %v708_v24 = vunpack.c.l.s8.bf16 %v7714_v63  ;;  %v7723_v26 = vld [vmem:[#allocation5 + $0x140] sm:$0xff] }
  0x88   :  { %v7172_v10 = vld [vmem:[#allocation2] ss:$18 sps:$4 sm:$0xff]   ;;  %v7174_v12 = vld [vmem:[#allocation2 + $0x24] ss:$18 sps:$4 sm:$0xff]   ;;  %v6469_v23 = vcombine.high %v700_v56, %v704_v59  ;;  %v836_v34 = vunpack.c.l.s8.bf16 %v464_v4  ;;  %v840_v35 = vunpack.c.l.s8.bf16 %v466_v8  ;;  %v716_v50 = vunpack.c.l.s8.bf16 %v7723_v26 }
  0x89   :  { %3933 = vmatpush1.bf16.msra.mxu1 %v6436_v19  ;;  %9114 = vst [vmem:[#allocation23_spill] sm:$0xff] %v7719_v16  ;;  %v7176_v19 = vld [vmem:[#allocation2 + $0x48] ss:$18 sps:$4 sm:$0xff]   ;;  %v6597_v33 = vcombine.high %v828_v61, %v832_v62  ;;  %v7728_v36 = vld [vmem:[#allocation5 + $0x340] sm:$0xff]  ;;  %v6596_v40 = vcombine.low %v828_v61, %v832_v62  ;;  %v7733_v41 = vrot.slane %v7172_v10, %v7719_v16  ;;  %v720_v51 = vunpack.c.l.s8.bf16 %v7725_v27  ;;  %v7750_v61 = vld [vmem:[#allocation5 + $0x170] sm:$0xff] }
  0x8a   :  { %3976 = vmatpush1.bf16.msra.mxu0 %v6564_v20  ;;  %3934 = vmatprep.subr.bf16.mxu1 %v6445_v21  ;;  %v7178_v20 = vld [vmem:[#allocation2 + $0x6c] ss:$18 sps:$4 sm:$0xff]   ;;  %v6588_v21 = vcombine.low %v820_v45, %v824_v46  ;;  %v7181_v45 = vld [vmem:[#allocation2 + $0x28] ss:$18 sps:$4 sm:$0xff]   ;;  %v7183_v49 = vld [vmem:[#allocation2 + $0x70] ss:$18 sps:$4 sm:$0xff]   ;;  %v6605_v10 = vcombine.high %v836_v34, %v840_v35  ;;  %v6604_v32 = vcombine.low %v836_v34, %v840_v35 }
  0x8b   :  { %3977 = vmatprep.subr.bf16.mxu0 %v6573_v25  ;;  %v712_v25 = vunpack.c.l.s8.bf16 %v7716_v3  ;;  %v7182_v46 = vld [vmem:[#allocation2 + $0x4c] ss:$18 sps:$4 sm:$0xff]   ;;  %v472_v62 = vld [vmem:[#allocation5 + $0x360] sm:$0xff]  ;;  %v7769_v9 = vrot.slane %v7181_v45, %v7719_v16  ;;  %v7775_v11 = vrot.slane %v7183_v49, %v7719_v16  ;;  %v6485_v8 = vcombine.high %v716_v50, %v720_v51 }
  0x8c   :  { %v852_v49 = vunpack.c.l.s8.bf16 %v472_v62  ;;  %v6484_v22 = vcombine.low %v716_v50, %v720_v51 }
  0x8d   :  { %3935 = vmatpush1.bf16.msra.mxu1 %v6444_v37  ;;  %v7730_v37 = vld [vmem:[#allocation5 + $0x350] sm:$0xff] }
  0x8e   :  { %3978 = vmatpush1.bf16.msra.mxu0 %v6572_v38  ;;  %3936 = vmatprep.subr.bf16.mxu1 %v6453_v39  ;;  %v7180_v38 = vld [vmem:[#allocation2 + $0x4] ss:$18 sps:$4 sm:$0xff]   ;;  %v6468_v39 = vcombine.low %v700_v56, %v704_v59  ;;  %v844_v56 = vunpack.c.l.s8.bf16 %v7728_v36  ;;  %v848_v59 = vunpack.c.l.s8.bf16 %v7730_v37 }
  0x8f   :  { %3979 = vmatprep.subr.bf16.mxu0 %v6581_v42  ;;  %v7736_v42 = vrot.slane %v7174_v12, %v7719_v16  ;;  %v474_v12 = vld [vmem:[#allocation5 + $0x370] sm:$0xff]  ;;  %v7764_v36 = vld [vmem:[#allocation5 + $0x380] sm:$0xff] }
  0x90   :  { %v7766_v37 = vld [vmem:[#allocation5 + $0x390] sm:$0xff]  ;;  %v6612_v5 = vcombine.low %v844_v56, %v848_v59 }
  0x91   :  { %3937 = vmatpush1.bf16.msra.mxu1 %v6452_v53  ;;  %v7741_v53 = vrot.slane %v7176_v19, %v7719_v16  ;;  %v186_v4 = vcombine.high %v7733_v41, %v7736_v42  ;;  %v7757_v19 = vld [vmem:[#allocation5 + $0x190] sm:$0xff]  ;;  %v864_v62 = vunpack.c.l.s8.bf16 %v7766_v37  ;;  %v661_v37 = vunpack.c.h.s8.bf16 %v7676_v29 }
  0x92   :  { %3980 = vmatpush1.bf16.msra.mxu0 %v6580_v54  ;;  %3938 = vmatprep.subr.bf16.mxu1 %v6461_v55  ;;  %v7744_v54 = vrot.slane %v7178_v20, %v7719_v16  ;;  %v6477_v55 = vcombine.high %v708_v24, %v712_v25  ;;  %9115 = vst [vmem:[#allocation24_spill] sm:$0xff] %v7757_v19  ;;  %v736_v35 = vunpack.c.l.s8.bf16 %v7757_v19  ;;  %v7801_v19 = vld [vmem:[#allocation5 + $0x1b0] sm:$0xff]  ;;  %v669_v29 = vunpack.c.h.s8.bf16 %v7682_v43 }
  0x93   :  { %3981 = vmatprep.subr.bf16.mxu0 %v6589_v60  ;;  %v7748_v60 = vld [vmem:[#allocation5 + $0x160] sm:$0xff] }
  0x94   :  { %v275_v20 = vcombine.high %v7741_v53, %v7744_v54 }
  0x95   :  { %3939 = vmatpush1.bf16.msra.mxu1 %v6460_v17  ;;  %v7755_v17 = vld [vmem:[#allocation5 + $0x180] sm:$0xff] }
  0x96   :  { %3982 = vmatpush1.bf16.msra.mxu0 %v6588_v21  ;;  %3940 = vmatprep.subr.bf16.mxu1 %v6469_v23  ;;  %v7762_v21 = vrot.slane %v7180_v38, %v7719_v16  ;;  %v6476_v23 = vcombine.low %v708_v24, %v712_v25  ;;  %v724_v38 = vunpack.c.l.s8.bf16 %v7748_v60  ;;  %v7778_v52 = vpack.c.bf16 %v275_v20, %v186_v4 }
  0x97   :  { %3983 = vmatprep.subr.bf16.mxu0 %v6597_v33  ;;  %v7772_v33 = vrot.slane %v7182_v46, %v7719_v16  ;;  %v6613_v24 = vcombine.high %v844_v56, %v848_v59  ;;  %v728_v25 = vunpack.c.l.s8.bf16 %v7750_v61  ;;  %v732_v34 = vunpack.c.l.s8.bf16 %v7755_v17  ;;  %v7809_v56 = vld [vmem:[#allocation5 + $0x1d0] sm:$0xff] }
  0x98   :  { %9116 = vst [vmem:[#allocation25_spill] sm:$0xff] %v7778_v52  ;;  %v188_v45 = vcombine.high %v7762_v21, %v7769_v9  ;;  %3956 = vmatprep.mubr.bf16.mxu1 %v7778_v52 }
  0x99   :  { %3941 = vmatpush1.bf16.msra.mxu1 %v6468_v39  ;;  %v277_v46 = vcombine.high %v7772_v33, %v7775_v11  ;;  %v856_v39 = vunpack.c.l.s8.bf16 %v474_v12  ;;  %v7798_v12 = vld [vmem:[#allocation5 + $0x1a0] sm:$0xff]  ;;  %v6493_v52 = vcombine.high %v724_v38, %v728_v25  ;;  %v6492_v16 = vcombine.low %v724_v38, %v728_v25 }
  0x9a   :  { %3984 = vmatpush1.bf16.msra.mxu0 %v6596_v40  ;;  %3942 = vmatprep.subr.bf16.mxu1 %v6477_v55  ;;  %v9117_v40 = vunpack.c.h.s8.bf16 %v7646_v1  ;;  %v9118_v55 = vunpack.c.h.s8.bf16 %v7644_v0  ;;  %v6501_v51 = vcombine.high %v732_v34, %v736_v35  ;;  %v740_v14 = vunpack.c.l.s8.bf16 %v7798_v12 }
  0x9b   :  { %3985 = vmatprep.subr.bf16.mxu0 %v6605_v10  ;;  %v7794_v20 = vpack.c.bf16 %v277_v46, %v188_v45  ;;  %v860_v10 = vunpack.c.l.s8.bf16 %v7764_v36  ;;  %v657_v45 = vunpack.c.h.s8.bf16 %v7665_v18  ;;  %v6620_v50 = vcombine.low %v852_v49, %v856_v39  ;;  %v480_v36 = vld [vmem:[#allocation5 + $0x3a0] sm:$0xff] }
  0x9c   :  { %v7792_v4 = vcombine.low %v9118_v55, %v9117_v40  ;;  %v665_v18 = vunpack.c.h.s8.bf16 %v7678_v30  ;;  %v6500_v25 = vcombine.low %v732_v34, %v736_v35  ;;  %v744_v46 = vunpack.c.l.s8.bf16 %v7801_v19  ;;  %v486_v34 = vld [vmem:[#allocation5 + $0x3d0] sm:$0xff]  ;;  %v7825_v35 = vld [vmem:[#allocation5 + $0x1e0] sm:$0xff] }
  0x9d   :  { %9119 = vst [vmem:[#allocation26_spill] sm:$0xff] %v7794_v20  ;;  %3943 = vmatpush1.bf16.msra.mxu1 %v6476_v23  ;;  %v6621_v23 = vcombine.high %v852_v49, %v856_v39  ;;  %3999 = vmatprep.mubr.bf16.mxu0 %v7794_v20  ;;  %v7811_v59 = vcombine.high %v653_v2, %v657_v45  ;;  %v868_v49 = vunpack.c.l.s8.bf16 %v480_v36  ;;  %v484_v39 = vld [vmem:[#allocation5 + $0x3c0] sm:$0xff]  ;;  %v752_v30 = vunpack.c.l.s8.bf16 %v7809_v56  ;;  %v490_v20 = vld [vmem:[#allocation5 + $0x3f0] sm:$0xff] }
  0x9e   :  { %3986 = vmatpush1.bf16.msra.mxu0 %v6604_v32  ;;  %3944 = vmatprep.subr.bf16.mxu1 %v6485_v8  ;;  %v482_v32 = vld [vmem:[#allocation5 + $0x3b0] sm:$0xff]  ;;  %v7807_v8 = vld [vmem:[#allocation5 + $0x1c0] sm:$0xff]  ;;  %v7813_v38 = vcombine.low %v653_v2, %v657_v45  ;;  %v7818_v40 = vcombine.high %v661_v37, %v665_v18  ;;  %v7820_v55 = vcombine.low %v661_v37, %v665_v18  ;;  %v673_v2 = vunpack.c.h.s8.bf16 %v7684_v44 }
  0x9f   :  { %3987 = vmatprep.subr.bf16.mxu0 %v6613_v24  ;;  %v6629_v24 = vcombine.high %v860_v10, %v864_v62  ;;  %v872_v45 = vunpack.c.l.s8.bf16 %v482_v32  ;;  %v6628_v43 = vcombine.low %v860_v10, %v864_v62  ;;  %v488_v36 = vld [vmem:[#allocation5 + $0x3e0] sm:$0xff]  ;;  %v681_v44 = vunpack.c.h.s8.bf16 %v7690_v58 }
  0xa0   :  { %9120 = vst [vmem:[#allocation27_spill] sm:$0xff] %v7813_v38  ;;  %9121 = vst [vmem:[#allocation28_spill] sm:$0xff] %v7818_v40  ;;  %v7830_v37 = vcombine.high %v669_v29, %v673_v2  ;;  %v7832_v18 = vcombine.low %v669_v29, %v673_v2  ;;  %v6508_v32 = vcombine.low %v740_v14, %v744_v46  ;;  %v685_v40 = vunpack.c.h.s8.bf16 %v7694_v13 }
  0xa1   :  { %3945 = vmatpush1.bf16.msra.mxu1 %v6484_v22  ;;  %9122 = vst [vmem:[#allocation29_spill] sm:$0xff] %v7820_v55  ;;  %v748_v22 = vunpack.c.l.s8.bf16 %v7807_v8  ;;  %v876_v55 = vunpack.c.l.s8.bf16 %v484_v39  ;;  %v689_v38 = vunpack.c.h.s8.bf16 %v7696_v15  ;;  %v6637_v29 = vcombine.high %v868_v49, %v872_v45 }
  0xa2   :  { %3988 = vmatpush1.bf16.msra.mxu0 %v6612_v5  ;;  %3946 = vmatprep.subr.bf16.mxu1 %v6493_v52  ;;  %v677_v5 = vunpack.c.h.s8.bf16 %v7688_v57  ;;  %v7828_v52 = vld [vmem:[#allocation5 + $0x1f0] sm:$0xff]  ;;  %9123 = vst [vmem:[#allocation30_spill] sm:$0xff] %v7832_v18  ;;  %v880_v57 = vunpack.c.l.s8.bf16 %v486_v34  ;;  %v6636_v2 = vcombine.low %v868_v49, %v872_v45  ;;  %v693_v58 = vunpack.c.h.s8.bf16 %v7700_v28 }
  0xa3   :  { %3989 = vmatprep.subr.bf16.mxu0 %v6621_v23  ;;  %v6509_v23 = vcombine.high %v740_v14, %v744_v46  ;;  %v6517_v18 = vcombine.high %v748_v22, %v752_v30  ;;  %v7843_v14 = vcombine.high %v685_v40, %v689_v38  ;;  %v7845_v13 = vcombine.low %v685_v40, %v689_v38  ;;  %v492_v40 = vld [vmem:[#allocation5 + $0x400] sm:$0xff]  ;;  %v494_v34 = vld [vmem:[#allocation5 + $0x410] sm:$0xff] }
  0xa4   :  { %v7836_v10 = vcombine.high %v677_v5, %v681_v44  ;;  %v7838_v62 = vcombine.low %v677_v5, %v681_v44  ;;  %v884_v46 = vunpack.c.l.s8.bf16 %v488_v36  ;;  %v888_v39 = vunpack.c.l.s8.bf16 %v490_v20 }
  0xa5   :  { %3947 = vmatpush1.bf16.msra.mxu1 %v6492_v16  ;;  %v756_v16 = vunpack.c.l.s8.bf16 %v7825_v35  ;;  %v701_v15 = vunpack.c.h.s8.bf16 %v7706_v47  ;;  %v705_v45 = vunpack.c.h.s8.bf16 %v7708_v48  ;;  %v6516_v38 = vcombine.low %v748_v22, %v752_v30 }
  0xa6   :  { %3990 = vmatpush1.bf16.msra.mxu0 %v6620_v50  ;;  %3948 = vmatprep.subr.bf16.mxu1 %v6501_v51  ;;  %v697_v50 = vunpack.c.h.s8.bf16 %v7702_v31  ;;  %v760_v51 = vunpack.c.l.s8.bf16 %v7828_v52  ;;  %v185_v31 = vcombine.low %v7733_v41, %v7736_v42  ;;  %v709_v20 = vunpack.c.h.s8.bf16 %v7714_v63 }
  0xa7   :  { %3991 = vmatprep.subr.bf16.mxu0 %v6629_v24  ;;  %v6645_v24 = vcombine.high %v876_v55, %v880_v57  ;;  %v6644_v47 = vcombine.low %v876_v55, %v880_v57  ;;  %v7860_v5 = vcombine.high %v701_v15, %v705_v45  ;;  %v713_v36 = vunpack.c.h.s8.bf16 %v7716_v3 }
  0xa8   :  { %v7850_v49 = vcombine.high %v693_v58, %v697_v50  ;;  %v7852_v28 = vcombine.low %v693_v58, %v697_v50  ;;  %v6525_v48 = vcombine.high %v756_v16, %v760_v51  ;;  %v6653_v22 = vcombine.high %v884_v46, %v888_v39  ;;  %v7888_v50 = vld [vmem:[#allocation5 + $0x440] sm:$0xff] }
  0xa9   :  { %3949 = vmatpush1.bf16.msra.mxu1 %v6500_v25  ;;  %v274_v25 = vcombine.low %v7741_v53, %v7744_v54  ;;  %v6524_v30 = vcombine.low %v756_v16, %v760_v51  ;;  %v717_v41 = vunpack.c.h.s8.bf16 %v7723_v26  ;;  %v6652_v42 = vcombine.low %v884_v46, %v888_v39 }
  0xaa   :  { %3992 = vmatpush1.bf16.msra.mxu0 %v6628_v43  ;;  %3950 = vmatprep.subr.bf16.mxu1 %v6509_v23  ;;  %v7862_v43 = vcombine.low %v701_v15, %v705_v45  ;;  %v7866_v53 = vcombine.high %v709_v20, %v713_v36  ;;  %v7868_v63 = vcombine.low %v709_v20, %v713_v36  ;;  %v721_v54 = vunpack.c.h.s8.bf16 %v7725_v27  ;;  %v7184_v15 = vld [vmem:[#allocation2 + $0x8] ss:$18 sps:$4 sm:$0xff]  }
  0xab   :  { %3993 = vmatprep.subr.bf16.mxu0 %v6637_v29  ;;  %v7871_v55 = vpack.c.bf16 %v274_v25, %v185_v31  ;;  %v892_v44 = vunpack.c.l.s8.bf16 %v492_v40  ;;  %v896_v3 = vunpack.c.l.s8.bf16 %v494_v34  ;;  %v725_v23 = vunpack.c.h.s8.bf16 %v7748_v60  ;;  %v498_v29 = vld [vmem:[#allocation5 + $0x430] sm:$0xff]  ;;  %v504_v34 = vld [vmem:[#allocation5 + $0x460] sm:$0xff] }
  0xac   :  { %v9126_v26 = vunpack.c.h.s8.bf16 %v7644_v0  ;;  %v7880_v58 = vcombine.low %v717_v41, %v721_v54  ;;  %v729_v27 = vunpack.c.h.s8.bf16 %v7750_v61  ;;  %v187_v16 = vcombine.low %v7762_v21, %v7769_v9  ;;  %v7890_v0 = vld [vmem:[#allocation5 + $0x450] sm:$0xff] }
  0xad   :  { %3951 = vmatpush1.bf16.msra.mxu1 %v6508_v32  ;;  %9124 = vst [vmem:[#allocation31_spill] sm:$0xff] %v7871_v55  ;;  %v9125_v32 = vunpack.c.h.s8.bf16 %v7646_v1  ;;  %v276_v60 = vcombine.low %v7772_v33, %v7775_v11  ;;  %v645_v1 = vunpack.c.h.s8.bf16 %v7654_v6  ;;  %v733_v51 = vunpack.c.h.s8.bf16 %v7755_v17  ;;  %v9127_v9 = vld [vmem:[#allocation24_spill] sm:$0xff]  ;;  %v7186_v31 = vld [vmem:[#allocation2 + $0x2c] ss:$18 sps:$4 sm:$0xff]  }
  0xae   :  { %3994 = vmatpush1.bf16.msra.mxu0 %v6636_v2  ;;  %3952 = vmatprep.subr.bf16.mxu1 %v6517_v18  ;;  %v496_v18 = vld [vmem:[#allocation5 + $0x420] sm:$0xff]  ;;  %v7878_v2 = vcombine.high %v717_v41, %v721_v54  ;;  %v649_v46 = vunpack.c.h.s8.bf16 %v7656_v7  ;;  %v7894_v61 = vcombine.high %v725_v23, %v729_v27  ;;  %v7896_v39 = vcombine.low %v725_v23, %v729_v27 }
  0xaf   :  { %3995 = vmatprep.subr.bf16.mxu0 %v6645_v24  ;;  %v6407_v57 = vcombine.high %v9126_v26, %v9125_v32  ;;  %v737_v21 = vunpack.c.h.s8.bf16 %v9127_v9  ;;  %v6661_v11 = vcombine.high %v892_v44, %v896_v3  ;;  %v900_v6 = vunpack.c.l.s8.bf16 %v496_v18  ;;  %v7188_v25 = vld [vmem:[#allocation2 + $0x50] ss:$18 sps:$4 sm:$0xff]  }
  0xb0   :  { %v904_v33 = vunpack.c.l.s8.bf16 %v498_v29  ;;  %v741_v24 = vunpack.c.h.s8.bf16 %v7798_v12  ;;  %v6660_v45 = vcombine.low %v892_v44, %v896_v3  ;;  %v745_v7 = vunpack.c.h.s8.bf16 %v7801_v19  ;;  %v7190_v12 = vld [vmem:[#allocation2 + $0x74] ss:$18 sps:$4 sm:$0xff]   ;;  %v9129_v32 = vld [vmem:[#allocation23_spill] sm:$0xff] }
  0xb1   :  { %3953 = vmatpush1.bf16.msra.mxu1 %v6516_v38  ;;  %v7900_v38 = vcombine.high %v733_v51, %v737_v21  ;;  %v7902_v17 = vcombine.low %v733_v51, %v737_v21  ;;  %v7905_v20 = vpack.c.bf16 %v276_v60, %v187_v16  ;;  %v912_v40 = vunpack.c.l.s8.bf16 %v7890_v0  ;;  %v7917_v3 = vld [vmem:[#allocation5 + $0x470] sm:$0xff]  ;;  %v7952_v21 = vld [vmem:[#allocation5 + $0x480] sm:$0xff] }
  0xb2   :  { %3996 = vmatpush1.bf16.msra.mxu0 %v6644_v47  ;;  %3954 = vmatprep.subr.bf16.mxu1 %v6525_v48  ;;  %v908_v47 = vunpack.c.l.s8.bf16 %v7888_v50  ;;  %v749_v36 = vunpack.c.h.s8.bf16 %v7807_v8  ;;  %v6415_v48 = vcombine.high %v645_v1, %v649_v46  ;;  %v7912_v41 = vcombine.low %v741_v24, %v745_v7  ;;  %v9131_v50 = vld [vmem:[#allocation20_spill] sm:$0xff]  ;;  %v9133_v51 = vld [vmem:[#allocation19_spill] sm:$0xff] }
  0xb3   :  { %3997 = vmatprep.subr.bf16.mxu0 %v6653_v22  ;;  %9128 = vst [vmem:[#allocation24_spill] sm:$0xff] %v7905_v20  ;;  %v7910_v22 = vcombine.high %v741_v24, %v745_v7  ;;  %v753_v19 = vunpack.c.h.s8.bf16 %v7809_v56  ;;  %v6668_v54 = vcombine.low %v900_v6, %v904_v33  ;;  %v757_v44 = vunpack.c.h.s8.bf16 %v7825_v35  ;;  %v7961_v24 = vld [vmem:[#allocation5 + $0x4b0] sm:$0xff] }
  0xb4   :  { %v761_v23 = vunpack.c.h.s8.bf16 %v7828_v52  ;;  %v7925_v26 = vrot.slane %v7184_v15, %v9129_v32  ;;  %v6414_v56 = vcombine.low %v645_v1, %v649_v46  ;;  %v7930_v35 = vrot.slane %v7186_v31, %v9129_v32  ;;  %v9130_v1 = vld [vmem:[#allocation25_spill] sm:$0xff]  ;;  %v7954_v15 = vld [vmem:[#allocation5 + $0x490] sm:$0xff] }
  0xb5   :  { %3955 = vmatpush1.bf16.msra.mxu1 %v6524_v30  ;;  %v6669_v30 = vcombine.high %v900_v6, %v904_v33  ;;  %v7919_v8 = vcombine.high %v749_v36, %v753_v19  ;;  %v916_v18 = vunpack.c.l.s8.bf16 %v504_v34  ;;  %v7937_v52 = vrot.slane %v7188_v25, %v9129_v32  ;;  %v7959_v33 = vld [vmem:[#allocation5 + $0x4a0] sm:$0xff]  ;;  %v9135_v34 = vld [vmem:[#allocation27_spill] sm:$0xff] }
  0xb6   :  { %3998 = vmatpush1.bf16.msra.mxu0 %v6652_v42  ;;  %4139 = vmatprep.subr.bf16.mxu1 %v6407_v57  ;;  %v7921_v42 = vcombine.low %v749_v36, %v753_v19  ;;  %v6677_v57 = vcombine.high %v908_v47, %v912_v40  ;;  %v7932_v29 = vcombine.high %v757_v44, %v761_v23  ;;  %v920_v16 = vunpack.c.l.s8.bf16 %v7917_v3  ;;  %v9136_v36 = vld [vmem:[#allocation28_spill] sm:$0xff] }
  0xb7   :  { %4010 = vmatprep.subr.bf16.mxu0 %v6661_v11  ;;  %v7934_v27 = vcombine.low %v757_v44, %v761_v23  ;;  %v7943_v60 = vrot.slane %v7190_v12, %v9129_v32  ;;  %v9132_v0 = vunpack.c.h.s8.bf16 %v9131_v50  ;;  %v9134_v46 = vunpack.c.h.s8.bf16 %v9133_v51  ;;  %v7978_v44 = vld [vmem:[#allocation5 + $0x4e0] sm:$0xff]  ;;  %v7980_v23 = vld [vmem:[#allocation5 + $0x4f0] sm:$0xff] }
  0xb8   :  { %3957 = vmatmul.mubr.bf16.vlgmr.msra.gmra.mrb[0].mxu1 %v7871_v55  ;;  %v6676_v6 = vcombine.low %v908_v47, %v912_v40  ;;  %v924_v7 = vunpack.c.l.s8.bf16 %v7952_v21  ;;  %v928_v31 = vunpack.c.l.s8.bf16 %v7954_v15  ;;  %v7970_v47 = vld [vmem:[#allocation5 + $0x4c0] sm:$0xff]  ;;  %v7972_v40 = vld [vmem:[#allocation5 + $0x4d0] sm:$0xff]  ;;  %v936_v19 = vunpack.c.l.s8.bf16 %v7961_v24 }
  0xb9   :  { %4000 = vmatmul.mubr.bf16.vlgmr.msra.gmra.mrb[0].mxu0 %v7905_v20  ;;  %4140 = vmatpush1.bf16.msra.mxu1 %v7792_v4  ;;  %v222_v4 = vcombine.high %v7925_v26, %v7930_v35  ;;  %v7950_v9 = vcombine.high %v9134_v46, %v9132_v0  ;;  %v311_v11 = vcombine.high %v7937_v52, %v7943_v60  ;;  %v7986_v50 = vld [vmem:[#allocation5 + $0x500] sm:$0xff]  ;;  %v948_v51 = vunpack.c.l.s8.bf16 %v7978_v44 }
  0xba   :  { %4011 = vmatpush1.bf16.msra.mxu0 %v6660_v45  ;;  %4141 = vmatprep.subr.bf16.mxu1 %v6415_v48  ;;  %v6685_v45 = vcombine.high %v916_v18, %v920_v16  ;;  %v6693_v12 = vcombine.high %v924_v7, %v928_v31  ;;  %v932_v48 = vunpack.c.l.s8.bf16 %v7959_v33  ;;  %v952_v46 = vunpack.c.l.s8.bf16 %v7980_v23 }
  0xbb   :  { %4012 = vmatprep.subr.bf16.mxu0 %v6669_v30  ;;  %4171 = vmatprep.mubr.bf16.mxu1 %v9130_v1  ;;  %v7965_v25 = vpack.c.bf16 %v311_v11, %v222_v4  ;;  %v9137_v30 = vld [vmem:[#allocation29_spill] sm:$0xff] }
  0xbc   :  { %v6700_v4 = vcombine.low %v932_v48, %v936_v19 }
  0xbd   :  { %4142 = vmatpush1.bf16.msra.mxu1 %v6414_v56  ;;  %4042 = vmatprep.mubr.bf16.mxu0 %v7965_v25  ;;  %v6701_v56 = vcombine.high %v932_v48, %v936_v19 }
  0xbe   :  { %4013 = vmatpush1.bf16.msra.mxu0 %v6668_v54  ;;  %4143 = vmatprep.subr.bf16.mxu1 %v7811_v59  ;;  %v6684_v59 = vcombine.low %v916_v18, %v920_v16  ;;  %v6692_v54 = vcombine.low %v924_v7, %v928_v31  ;;  %v944_v18 = vunpack.c.l.s8.bf16 %v7972_v40  ;;  %v9138_v16 = vld [vmem:[#allocation30_spill] sm:$0xff]  ;;  %v7998_v31 = vld [vmem:[#allocation5 + $0x530] sm:$0xff] }
  0xbf   :  { %4014 = vmatprep.subr.bf16.mxu0 %v6677_v57  ;;  %v940_v57 = vunpack.c.l.s8.bf16 %v7970_v47  ;;  %v7996_v7 = vld [vmem:[#allocation5 + $0x520] sm:$0xff] }
  0xc1   :  { %4144 = vmatpush1.bf16.msra.mxu1 %v9135_v34  ;;  %v6709_v0 = vcombine.high %v940_v57, %v944_v18  ;;  %v6708_v11 = vcombine.low %v940_v57, %v944_v18  ;;  %v8020_v18 = vld [vmem:[#allocation5 + $0x580] sm:$0xff] }
  0xc2   :  { %4015 = vmatpush1.bf16.msra.mxu0 %v6676_v6  ;;  %4145 = vmatprep.subr.bf16.mxu1 %v9136_v36  ;;  %v6717_v6 = vcombine.high %v948_v51, %v952_v46  ;;  %v968_v36 = vunpack.c.l.s8.bf16 %v7998_v31 }
  0xc3   :  { %4016 = vmatprep.subr.bf16.mxu0 %v6685_v45 }
  0xc5   :  { %4146 = vmatpush1.bf16.msra.mxu1 %v9137_v30  ;;  %v8012_v30 = vld [vmem:[#allocation5 + $0x560] sm:$0xff] }
  0xc6   :  { %4017 = vmatpush1.bf16.msra.mxu0 %v6684_v59  ;;  %4147 = vmatprep.subr.bf16.mxu1 %v7830_v37  ;;  %v7988_v37 = vld [vmem:[#allocation5 + $0x510] sm:$0xff]  ;;  %v8004_v59 = vld [vmem:[#allocation5 + $0x540] sm:$0xff] }
  0xc7   :  { %4018 = vmatprep.subr.bf16.mxu0 %v6693_v12  ;;  %v960_v45 = vunpack.c.l.s8.bf16 %v7988_v37  ;;  %v8006_v12 = vld [vmem:[#allocation5 + $0x550] sm:$0xff] }
  0xc8   :  { %v976_v19 = vunpack.c.l.s8.bf16 %v8006_v12 }
  0xc9   :  { %4148 = vmatpush1.bf16.msra.mxu1 %v9138_v16  ;;  %v8022_v16 = vld [vmem:[#allocation5 + $0x590] sm:$0xff] }
  0xca   :  { %4019 = vmatpush1.bf16.msra.mxu0 %v6692_v54  ;;  %4149 = vmatprep.subr.bf16.mxu1 %v7836_v10  ;;  %v956_v10 = vunpack.c.l.s8.bf16 %v7986_v50  ;;  %v8014_v54 = vld [vmem:[#allocation5 + $0x570] sm:$0xff] }
  0xcb   :  { %4020 = vmatprep.subr.bf16.mxu0 %v6701_v56  ;;  %v984_v57 = vunpack.c.l.s8.bf16 %v8014_v54 }
  0xcc   :  { %v6725_v34 = vcombine.high %v956_v10, %v960_v45 }
  0xcd   :  { %4150 = vmatpush1.bf16.msra.mxu1 %v7838_v62  ;;  %v6716_v62 = vcombine.low %v948_v51, %v952_v46  ;;  %v8028_v51 = vld [vmem:[#allocation5 + $0x5a0] sm:$0xff]  ;;  %v8030_v46 = vld [vmem:[#allocation5 + $0x5b0] sm:$0xff] }
  0xce   :  { %4021 = vmatpush1.bf16.msra.mxu0 %v6700_v4  ;;  %4151 = vmatprep.subr.bf16.mxu1 %v7843_v14  ;;  %v964_v14 = vunpack.c.l.s8.bf16 %v7996_v7 }
  0xcf   :  { %4022 = vmatprep.subr.bf16.mxu0 %v6709_v0  ;;  %v992_v0 = vunpack.c.l.s8.bf16 %v8022_v16 }
  0xd0   :  { %v6733_v48 = vcombine.high %v964_v14, %v968_v36 }
  0xd1   :  { %4152 = vmatpush1.bf16.msra.mxu1 %v7845_v13  ;;  %v6724_v13 = vcombine.low %v956_v10, %v960_v45  ;;  %v8036_v10 = vld [vmem:[#allocation5 + $0x5c0] sm:$0xff]  ;;  %v8038_v45 = vld [vmem:[#allocation5 + $0x5d0] sm:$0xff] }
  0xd2   :  { %4023 = vmatpush1.bf16.msra.mxu0 %v6708_v11  ;;  %4153 = vmatprep.subr.bf16.mxu1 %v7850_v49  ;;  %v972_v49 = vunpack.c.l.s8.bf16 %v8004_v59 }
  0xd3   :  { %4024 = vmatprep.subr.bf16.mxu0 %v6717_v6  ;;  %v1000_v6 = vunpack.c.l.s8.bf16 %v8030_v46 }
  0xd4   :  { %v6741_v56 = vcombine.high %v972_v49, %v976_v19 }
  0xd5   :  { %4154 = vmatpush1.bf16.msra.mxu1 %v7852_v28  ;;  %v6732_v28 = vcombine.low %v964_v14, %v968_v36  ;;  %v8044_v14 = vld [vmem:[#allocation5 + $0x5e0] sm:$0xff]  ;;  %v8046_v36 = vld [vmem:[#allocation5 + $0x5f0] sm:$0xff] }
  0xd6   :  { %4025 = vmatpush1.bf16.msra.mxu0 %v6716_v62  ;;  %4155 = vmatprep.subr.bf16.mxu1 %v7860_v5  ;;  %v980_v5 = vunpack.c.l.s8.bf16 %v8012_v30  ;;  %9139 = vst [vmem:[#allocation23_spill] sm:$0xff] %v8044_v14  ;;  %9140 = vst [vmem:[#allocation25_spill] sm:$0xff] %v8046_v36 }
  0xd7   :  { %4026 = vmatprep.subr.bf16.mxu0 %v6725_v34  ;;  %v1008_v34 = vunpack.c.l.s8.bf16 %v8038_v45 }
  0xd8   :  { %v6749_v4 = vcombine.high %v980_v5, %v984_v57 }
  0xd9   :  { %4156 = vmatpush1.bf16.msra.mxu1 %v7862_v43  ;;  %v6740_v43 = vcombine.low %v972_v49, %v976_v19  ;;  %v8054_v49 = vld [vmem:[#allocation5 + $0x610] sm:$0xff] }
  0xda   :  { %4027 = vmatpush1.bf16.msra.mxu0 %v6724_v13  ;;  %4157 = vmatprep.subr.bf16.mxu1 %v7866_v53  ;;  %v988_v53 = vunpack.c.l.s8.bf16 %v8020_v18  ;;  %v1012_v13 = vunpack.c.l.s8.bf16 %v8044_v14  ;;  %9142 = vst [vmem:[#allocation19_spill] sm:$0xff] %v8054_v49  ;;  %v7192_v19 = vld [vmem:[#allocation2 + $0xc] ss:$18 sps:$4 sm:$0xff]   ;;  %v9059_v14 = vmov 0  }
  0xdb   :  { %4028 = vmatprep.subr.bf16.mxu0 %v6733_v48  ;;  %v8052_v48 = vld [vmem:[#allocation5 + $0x600] sm:$0xff] }
  0xdc   :  { %v6757_v11 = vcombine.high %v988_v53, %v992_v0  ;;  %9141 = vst [vmem:[#allocation20_spill] sm:$0xff] %v8052_v48 }
  0xdd   :  { %4158 = vmatpush1.bf16.msra.mxu1 %v7868_v63  ;;  %v6748_v63 = vcombine.low %v980_v5, %v984_v57  ;;  %v7194_v5 = vld [vmem:[#allocation2 + $0x54] ss:$18 sps:$4 sm:$0xff]   ;;  %v7195_v57 = vld [vmem:[#allocation2 + $0x78] ss:$18 sps:$4 sm:$0xff]  }
  0xde   :  { %4029 = vmatpush1.bf16.msra.mxu0 %v6732_v28  ;;  %4159 = vmatprep.subr.bf16.mxu1 %v7878_v2  ;;  %v996_v2 = vunpack.c.l.s8.bf16 %v8028_v51 }
  0xdf   :  { %4030 = vmatprep.subr.bf16.mxu0 %v6741_v56  ;;  %v7193_v56 = vld [vmem:[#allocation2 + $0x30] ss:$18 sps:$4 sm:$0xff]  }
  0xe0   :  { %v6765_v62 = vcombine.high %v996_v2, %v1000_v6 }
  0xe1   :  { %4160 = vmatpush1.bf16.msra.mxu1 %v7880_v58  ;;  %v6756_v58 = vcombine.low %v988_v53, %v992_v0  ;;  %v8060_v53 = vld [vmem:[#allocation5 + $0x620] sm:$0xff]  ;;  %v8063_v0 = vrot.slane %v7192_v19, %v9129_v32 }
  0xe2   :  { %4031 = vmatpush1.bf16.msra.mxu0 %v6740_v43  ;;  %4161 = vmatprep.subr.bf16.mxu1 %v7894_v61  ;;  %v1004_v61 = vunpack.c.l.s8.bf16 %v8036_v10  ;;  %v1020_v43 = vunpack.c.l.s8.bf16 %v8052_v48  ;;  %9143 = vst [vmem:[#allocation27_spill] sm:$0xff] %v8060_v53  ;;  %v921_v48 = vunpack.c.h.s8.bf16 %v7917_v3 }
  0xe3   :  { %4032 = vmatprep.subr.bf16.mxu0 %v6749_v4  ;;  %v1024_v4 = vunpack.c.l.s8.bf16 %v8054_v49 }
  0xe4   :  { %v6773_v28 = vcombine.high %v1004_v61, %v1008_v34 }
  0xe5   :  { %4162 = vmatpush1.bf16.msra.mxu1 %v7896_v39  ;;  %v6764_v39 = vcombine.low %v996_v2, %v1000_v6  ;;  %v221_v2 = vcombine.low %v7925_v26, %v7930_v35  ;;  %v310_v6 = vcombine.low %v7937_v52, %v7943_v60  ;;  %v8088_v52 = vld [vmem:[#allocation5 + $0x640] sm:$0xff] }
  0xe6   :  { %4033 = vmatpush1.bf16.msra.mxu0 %v6748_v63  ;;  %4163 = vmatprep.subr.bf16.mxu1 %v7900_v38  ;;  %v1016_v38 = vunpack.c.l.s8.bf16 %v8046_v36  ;;  %v8066_v63 = vrot.slane %v7193_v56, %v9129_v32  ;;  %9145 = vst [vmem:[#allocation29_spill] sm:$0xff] %v8088_v52  ;;  %v7314_v56 = vld [vmem:[#allocation5 + $0x240] sm:$0xff] }
  0xe7   :  { %4034 = vmatprep.subr.bf16.mxu0 %v6757_v11  ;;  %v8074_v11 = vld [vmem:[#allocation5 + $0x630] sm:$0xff]  ;;  %v8093_v60 = vpack.c.bf16 %v310_v6, %v221_v2 }
  0xe8   :  { %9144 = vst [vmem:[#allocation28_spill] sm:$0xff] %v8074_v11  ;;  %v224_v26 = vcombine.high %v8063_v0, %v8066_v63  ;;  %v8103_v2 = vld [vmem:[#allocation5 + $0x670] sm:$0xff] }
  0xe9   :  { %4164 = vmatpush1.bf16.msra.mxu1 %v7902_v17  ;;  %v6772_v17 = vcombine.low %v1004_v61, %v1008_v34  ;;  %v7312_v61 = vld [vmem:[#allocation5 + $0x220] sm:$0xff]  ;;  %9147 = vst [vmem:[#allocation32_spill] sm:$0xff] %v8093_v60  ;;  %9150 = vst [vmem:[#allocation35_spill] sm:$0xff] %v8103_v2 }
  0xea   :  { %4035 = vmatpush1.bf16.msra.mxu0 %v6756_v58  ;;  %4165 = vmatprep.subr.bf16.mxu1 %v7910_v22  ;;  %v6781_v22 = vcombine.high %v1012_v13, %v1016_v38  ;;  %v6780_v58 = vcombine.low %v1012_v13, %v1016_v38  ;;  %v773_v34 = vunpack.c.h.s8.bf16 %v7312_v61  ;;  %v6788_v13 = vcombine.low %v1020_v43, %v1024_v4 }
  0xeb   :  { %4036 = vmatprep.subr.bf16.mxu0 %v6765_v62  ;;  %v1028_v62 = vunpack.c.l.s8.bf16 %v8060_v53  ;;  %v1036_v61 = vunpack.c.l.s8.bf16 %v8088_v52  ;;  %v8203_v53 = vld [vmem:[#allocation5 + $0x860] sm:$0xff] }
  0xed   :  { %4166 = vmatpush1.bf16.msra.mxu1 %v7912_v41  ;;  %v8069_v41 = vrot.slane %v7194_v5, %v9129_v32  ;;  %v781_v5 = vunpack.c.h.s8.bf16 %v7314_v56  ;;  %v7317_v56 = vld [vmem:[#allocation5 + $0x270] sm:$0xff] }
  0xee   :  { %4037 = vmatpush1.bf16.msra.mxu0 %v6764_v39  ;;  %4167 = vmatprep.subr.bf16.mxu1 %v7919_v8  ;;  %v8072_v8 = vrot.slane %v7195_v57, %v9129_v32  ;;  %v7313_v39 = vld [vmem:[#allocation5 + $0x230] sm:$0xff] }
  0xef   :  { %4038 = vmatprep.subr.bf16.mxu0 %v6773_v28  ;;  %v777_v19 = vunpack.c.h.s8.bf16 %v7313_v39  ;;  %v6789_v28 = vcombine.high %v1020_v43, %v1024_v4  ;;  %v7315_v57 = vld [vmem:[#allocation5 + $0x250] sm:$0xff] }
  0xf0   :  { %v313_v35 = vcombine.high %v8069_v41, %v8072_v8 }
  0xf1   :  { %4168 = vmatpush1.bf16.msra.mxu1 %v7921_v42  ;;  %v1032_v42 = vunpack.c.l.s8.bf16 %v8074_v11  ;;  %v6543_v38 = vcombine.high %v773_v34, %v777_v19  ;;  %v6542_v43 = vcombine.low %v773_v34, %v777_v19  ;;  %v9154_v34 = vld [vmem:[#allocation26_spill] sm:$0xff] }
  0xf2   :  { %4039 = vmatpush1.bf16.msra.mxu0 %v6772_v17  ;;  %4169 = vmatprep.subr.bf16.mxu1 %v7932_v29  ;;  %v8090_v29 = vld [vmem:[#allocation5 + $0x650] sm:$0xff]  ;;  %v785_v17 = vunpack.c.h.s8.bf16 %v7315_v57  ;;  %v8098_v11 = vpack.c.bf16 %v313_v35, %v224_v26  ;;  %v793_v26 = vunpack.c.h.s8.bf16 %v7317_v56 }
  0xf3   :  { %4040 = vmatprep.subr.bf16.mxu0 %v6781_v22  ;;  %9146 = vst [vmem:[#allocation30_spill] sm:$0xff] %v8090_v29  ;;  %v6797_v22 = vcombine.high %v1028_v62, %v1032_v42  ;;  %v1040_v39 = vunpack.c.l.s8.bf16 %v8090_v29  ;;  %v6796_v4 = vcombine.low %v1028_v62, %v1032_v42  ;;  %v8119_v29 = vld [vmem:[#allocation5 + $0x6b0] sm:$0xff] }
  0xf4   :  { %9148 = vst [vmem:[#allocation33_spill] sm:$0xff] %v8098_v11  ;;  %v6551_v6 = vcombine.high %v781_v5, %v785_v17  ;;  %v6550_v62 = vcombine.low %v781_v5, %v785_v17  ;;  %9156 = vst [vmem:[#allocation38_spill] sm:$0xff] %v8119_v29 }
  0xf5   :  { %4170 = vmatpush1.bf16.msra.mxu1 %v7934_v27  ;;  %v8101_v27 = vld [vmem:[#allocation5 + $0x660] sm:$0xff]  ;;  %v6805_v35 = vcombine.high %v1036_v61, %v1040_v39  ;;  %v6804_v19 = vcombine.low %v1036_v61, %v1040_v39 }
  0xf6   :  { %4041 = vmatpush1.bf16.msra.mxu0 %v6780_v58  ;;  %4182 = vmatprep.subr.bf16.mxu1 %v7950_v9  ;;  %9149 = vst [vmem:[#allocation34_spill] sm:$0xff] %v8101_v27  ;;  %v9151_v9 = vld [vmem:[#allocation21_spill] sm:$0xff]  ;;  %v1044_v57 = vunpack.c.l.s8.bf16 %v8101_v27 }
  0xf7   :  { %4053 = vmatprep.subr.bf16.mxu0 %v6789_v28  ;;  %v7316_v58 = vld [vmem:[#allocation5 + $0x260] sm:$0xff] }
  0xf8   :  { %4172 = vmatmul.mubr.bf16.vlgmr.msra.gmra.mrb[4].mxu1 %v7871_v55  ;;  %v789_v28 = vunpack.c.h.s8.bf16 %v7316_v58  ;;  %v1048_v55 = vunpack.c.l.s8.bf16 %v8103_v2  ;;  %v7320_v39 = vld [vmem:[#allocation5 + $0x2a0] sm:$0xff] }
  0xf9   :  { %4043 = vmatmul.mubr.bf16.vlgmr.msra.gmra.mrb[0].mxu0 %v8093_v60  ;;  %4183 = vmatpush1.bf16.msra.mxu1 %v9151_v9  ;;  %v8110_v60 = vld [vmem:[#allocation5 + $0x680] sm:$0xff]  ;;  %v8112_v9 = vld [vmem:[#allocation5 + $0x690] sm:$0xff] }
  0xfa   :  { %4054 = vmatpush1.bf16.msra.mxu0 %v6788_v13  ;;  %4184 = vmatprep.subr.bf16.mxu1 %v6543_v38  ;;  %9152 = vst [vmem:[#allocation21_spill] sm:$0xff] %v8110_v60  ;;  %9153 = vst [vmem:[#allocation36_spill] sm:$0xff] %v8112_v9  ;;  %v6559_v42 = vcombine.high %v789_v28, %v793_v26  ;;  %v7318_v13 = vld [vmem:[#allocation5 + $0x280] sm:$0xff]  ;;  %v6813_v56 = vcombine.high %v1044_v57, %v1048_v55  ;;  %v1052_v2 = vunpack.c.l.s8.bf16 %v8110_v60 }
  0xfb   :  { %4055 = vmatprep.subr.bf16.mxu0 %v6797_v22  ;;  %4085 = vmatprep.mubr.bf16.mxu0 %v8098_v11  ;;  %v797_v38 = vunpack.c.h.s8.bf16 %v7318_v13  ;;  %v7319_v22 = vld [vmem:[#allocation5 + $0x290] sm:$0xff]  ;;  %v1056_v27 = vunpack.c.l.s8.bf16 %v8112_v9  ;;  %v8117_v11 = vld [vmem:[#allocation5 + $0x6a0] sm:$0xff]  ;;  %v6558_v5 = vcombine.low %v789_v28, %v793_v26  ;;  %v6812_v17 = vcombine.low %v1044_v57, %v1048_v55 }
  0xfc   :  { %4214 = vmatprep.mubr.bf16.mxu1 %v9154_v34  ;;  %v801_v58 = vunpack.c.h.s8.bf16 %v7319_v22  ;;  %9155 = vst [vmem:[#allocation37_spill] sm:$0xff] %v8117_v11  ;;  %v1060_v13 = vunpack.c.l.s8.bf16 %v8117_v11  ;;  %v1064_v22 = vunpack.c.l.s8.bf16 %v8119_v29  ;;  %v8123_v34 = vld [vmem:[#allocation5 + $0x6c0] sm:$0xff]  ;;  %v8125_v9 = vld [vmem:[#allocation5 + $0x6d0] sm:$0xff] }
  0xfd   :  { %4185 = vmatpush1.bf16.msra.mxu1 %v6542_v43  ;;  %v805_v43 = vunpack.c.h.s8.bf16 %v7320_v39  ;;  %9157 = vst [vmem:[#allocation39_spill] sm:$0xff] %v8123_v34  ;;  %9158 = vst [vmem:[#allocation40_spill] sm:$0xff] %v8125_v9  ;;  %v6820_v55 = vcombine.low %v1052_v2, %v1056_v27  ;;  %v7322_v57 = vld [vmem:[#allocation5 + $0x2c0] sm:$0xff]  ;;  %v1068_v39 = vunpack.c.l.s8.bf16 %v8123_v34  ;;  %v8131_v11 = vld [vmem:[#allocation5 + $0x6f0] sm:$0xff] }
  0xfe   :  { %4056 = vmatpush1.bf16.msra.mxu0 %v6796_v4  ;;  %4186 = vmatprep.subr.bf16.mxu1 %v6551_v6  ;;  %v6567_v61 = vcombine.high %v797_v38, %v801_v58  ;;  %v7321_v4 = vld [vmem:[#allocation5 + $0x2b0] sm:$0xff]  ;;  %v6566_v28 = vcombine.low %v797_v38, %v801_v58  ;;  %v8129_v29 = vld [vmem:[#allocation5 + $0x6e0] sm:$0xff]  ;;  %9160 = vst [vmem:[#allocation42_spill] sm:$0xff] %v8131_v11 }
  0xff   :  { %4057 = vmatprep.subr.bf16.mxu0 %v6805_v35  ;;  %v809_v6 = vunpack.c.h.s8.bf16 %v7321_v4  ;;  %v6821_v35 = vcombine.high %v1052_v2, %v1056_v27  ;;  %v1072_v4 = vunpack.c.l.s8.bf16 %v8125_v9  ;;  %9159 = vst [vmem:[#allocation41_spill] sm:$0xff] %v8129_v29  ;;  %v6828_v27 = vcombine.low %v1060_v13, %v1064_v22  ;;  %v7324_v58 = vld [vmem:[#allocation5 + $0x2e0] sm:$0xff]  ;;  %v8137_v34 = vld [vmem:[#allocation5 + $0x710] sm:$0xff] }
 0x100   :  { %v8135_v9 = vld [vmem:[#allocation5 + $0x700] sm:$0xff]  ;;  %9162 = vst [vmem:[#allocation44_spill] sm:$0xff] %v8137_v34 }
 0x101   :  { %4187 = vmatpush1.bf16.msra.mxu1 %v6550_v62  ;;  %v6575_v26 = vcombine.high %v805_v43, %v809_v6  ;;  %v813_v62 = vunpack.c.h.s8.bf16 %v7322_v57  ;;  %v6574_v38 = vcombine.low %v805_v43, %v809_v6  ;;  %v1076_v57 = vunpack.c.l.s8.bf16 %v8129_v29  ;;  %9161 = vst [vmem:[#allocation43_spill] sm:$0xff] %v8135_v9  ;;  %v8143_v29 = vld [vmem:[#allocation5 + $0x730] sm:$0xff] }
 0x102   :  { %4058 = vmatpush1.bf16.msra.mxu0 %v6804_v19  ;;  %4188 = vmatprep.subr.bf16.mxu1 %v6559_v42  ;;  %v7323_v19 = vld [vmem:[#allocation5 + $0x2d0] sm:$0xff]  ;;  %v6836_v6 = vcombine.low %v1068_v39, %v1072_v4  ;;  %9164 = vst [vmem:[#allocation46_spill] sm:$0xff] %v8143_v29 }
 0x103   :  { %4059 = vmatprep.subr.bf16.mxu0 %v6813_v56  ;;  %v817_v42 = vunpack.c.h.s8.bf16 %v7323_v19  ;;  %v6829_v56 = vcombine.high %v1060_v13, %v1064_v22  ;;  %v1080_v19 = vunpack.c.l.s8.bf16 %v8131_v11  ;;  %v7326_v22 = vld [vmem:[#allocation5 + $0x300] sm:$0xff] }
 0x104   :  { %v8141_v11 = vld [vmem:[#allocation5 + $0x720] sm:$0xff] }
 0x105   :  { %4189 = vmatpush1.bf16.msra.mxu1 %v6558_v5  ;;  %v6583_v2 = vcombine.high %v813_v62, %v817_v42  ;;  %v821_v5 = vunpack.c.h.s8.bf16 %v7324_v58  ;;  %v6582_v43 = vcombine.low %v813_v62, %v817_v42  ;;  %v1084_v58 = vunpack.c.l.s8.bf16 %v8135_v9  ;;  %9163 = vst [vmem:[#allocation45_spill] sm:$0xff] %v8141_v11  ;;  %v8149_v9 = vld [vmem:[#allocation5 + $0x750] sm:$0xff] }
 0x106   :  { %4060 = vmatpush1.bf16.msra.mxu0 %v6812_v17  ;;  %4190 = vmatprep.subr.bf16.mxu1 %v6567_v61  ;;  %v7325_v17 = vld [vmem:[#allocation5 + $0x2f0] sm:$0xff]  ;;  %v6844_v42 = vcombine.low %v1076_v57, %v1080_v19  ;;  %9166 = vst [vmem:[#allocation48_spill] sm:$0xff] %v8149_v9 }
 0x107   :  { %4061 = vmatprep.subr.bf16.mxu0 %v6821_v35  ;;  %v825_v61 = vunpack.c.h.s8.bf16 %v7325_v17  ;;  %v6837_v35 = vcombine.high %v1068_v39, %v1072_v4  ;;  %v1088_v17 = vunpack.c.l.s8.bf16 %v8137_v34  ;;  %v7328_v4 = vld [vmem:[#allocation5 + $0x320] sm:$0xff] }
 0x108   :  { %v8147_v34 = vld [vmem:[#allocation5 + $0x740] sm:$0xff] }
 0x109   :  { %4191 = vmatpush1.bf16.msra.mxu1 %v6566_v28  ;;  %v6591_v13 = vcombine.high %v821_v5, %v825_v61  ;;  %v829_v28 = vunpack.c.h.s8.bf16 %v7326_v22  ;;  %v6590_v62 = vcombine.low %v821_v5, %v825_v61  ;;  %v1092_v22 = vunpack.c.l.s8.bf16 %v8141_v11  ;;  %9165 = vst [vmem:[#allocation47_spill] sm:$0xff] %v8147_v34  ;;  %v8155_v11 = vld [vmem:[#allocation5 + $0x770] sm:$0xff] }
 0x10a   :  { %4062 = vmatpush1.bf16.msra.mxu0 %v6820_v55  ;;  %4192 = vmatprep.subr.bf16.mxu1 %v6575_v26  ;;  %v7327_v55 = vld [vmem:[#allocation5 + $0x310] sm:$0xff]  ;;  %v6852_v61 = vcombine.low %v1084_v58, %v1088_v17  ;;  %9168 = vst [vmem:[#allocation50_spill] sm:$0xff] %v8155_v11 }
 0x10b   :  { %4063 = vmatprep.subr.bf16.mxu0 %v6829_v56  ;;  %v833_v26 = vunpack.c.h.s8.bf16 %v7327_v55  ;;  %v6845_v56 = vcombine.high %v1076_v57, %v1080_v19  ;;  %v1096_v55 = vunpack.c.l.s8.bf16 %v8143_v29  ;;  %v7330_v19 = vld [vmem:[#allocation5 + $0x340] sm:$0xff] }
 0x10c   :  { %v8153_v29 = vld [vmem:[#allocation5 + $0x760] sm:$0xff] }
 0x10d   :  { %4193 = vmatpush1.bf16.msra.mxu1 %v6574_v38  ;;  %v6599_v39 = vcombine.high %v829_v28, %v833_v26  ;;  %v837_v38 = vunpack.c.h.s8.bf16 %v7328_v4  ;;  %v6598_v5 = vcombine.low %v829_v28, %v833_v26  ;;  %v1100_v4 = vunpack.c.l.s8.bf16 %v8147_v34  ;;  %9167 = vst [vmem:[#allocation49_spill] sm:$0xff] %v8153_v29  ;;  %v8161_v34 = vld [vmem:[#allocation5 + $0x790] sm:$0xff] }
 0x10e   :  { %4064 = vmatpush1.bf16.msra.mxu0 %v6828_v27  ;;  %4194 = vmatprep.subr.bf16.mxu1 %v6583_v2  ;;  %v7329_v27 = vld [vmem:[#allocation5 + $0x330] sm:$0xff]  ;;  %v6860_v26 = vcombine.low %v1092_v22, %v1096_v55  ;;  %9170 = vst [vmem:[#allocation52_spill] sm:$0xff] %v8161_v34 }
 0x10f   :  { %4065 = vmatprep.subr.bf16.mxu0 %v6837_v35  ;;  %v841_v2 = vunpack.c.h.s8.bf16 %v7329_v27  ;;  %v6853_v35 = vcombine.high %v1084_v58, %v1088_v17  ;;  %v1104_v27 = vunpack.c.l.s8.bf16 %v8149_v9  ;;  %v7332_v17 = vld [vmem:[#allocation5 + $0x360] sm:$0xff] }
 0x110   :  { %v8159_v9 = vld [vmem:[#allocation5 + $0x780] sm:$0xff] }
 0x111   :  { %4195 = vmatpush1.bf16.msra.mxu1 %v6582_v43  ;;  %v6607_v57 = vcombine.high %v837_v38, %v841_v2  ;;  %v845_v43 = vunpack.c.h.s8.bf16 %v7330_v19  ;;  %v6606_v28 = vcombine.low %v837_v38, %v841_v2  ;;  %v1108_v19 = vunpack.c.l.s8.bf16 %v8153_v29  ;;  %9169 = vst [vmem:[#allocation51_spill] sm:$0xff] %v8159_v9  ;;  %v8167_v29 = vld [vmem:[#allocation5 + $0x7b0] sm:$0xff] }
 0x112   :  { %4066 = vmatpush1.bf16.msra.mxu0 %v6836_v6  ;;  %4196 = vmatprep.subr.bf16.mxu1 %v6591_v13  ;;  %v7331_v6 = vld [vmem:[#allocation5 + $0x350] sm:$0xff]  ;;  %v6868_v2 = vcombine.low %v1100_v4, %v1104_v27  ;;  %9172 = vst [vmem:[#allocation54_spill] sm:$0xff] %v8167_v29 }
 0x113   :  { %4067 = vmatprep.subr.bf16.mxu0 %v6845_v56  ;;  %v849_v13 = vunpack.c.h.s8.bf16 %v7331_v6  ;;  %v6861_v56 = vcombine.high %v1092_v22, %v1096_v55  ;;  %v1112_v6 = vunpack.c.l.s8.bf16 %v8155_v11  ;;  %v7334_v55 = vld [vmem:[#allocation5 + $0x380] sm:$0xff] }
 0x114   :  { %v8165_v11 = vld [vmem:[#allocation5 + $0x7a0] sm:$0xff] }
 0x115   :  { %4197 = vmatpush1.bf16.msra.mxu1 %v6590_v62  ;;  %v6615_v58 = vcombine.high %v845_v43, %v849_v13  ;;  %v853_v62 = vunpack.c.h.s8.bf16 %v7332_v17  ;;  %v6614_v38 = vcombine.low %v845_v43, %v849_v13  ;;  %v1116_v17 = vunpack.c.l.s8.bf16 %v8159_v9  ;;  %9171 = vst [vmem:[#allocation53_spill] sm:$0xff] %v8165_v11  ;;  %v8173_v9 = vld [vmem:[#allocation5 + $0x7d0] sm:$0xff] }
 0x116   :  { %4068 = vmatpush1.bf16.msra.mxu0 %v6844_v42  ;;  %4198 = vmatprep.subr.bf16.mxu1 %v6599_v39  ;;  %v7333_v42 = vld [vmem:[#allocation5 + $0x370] sm:$0xff]  ;;  %v6876_v13 = vcombine.low %v1108_v19, %v1112_v6  ;;  %9174 = vst [vmem:[#allocation56_spill] sm:$0xff] %v8173_v9 }
 0x117   :  { %4069 = vmatprep.subr.bf16.mxu0 %v6853_v35  ;;  %v857_v39 = vunpack.c.h.s8.bf16 %v7333_v42  ;;  %v6869_v35 = vcombine.high %v1100_v4, %v1104_v27  ;;  %v1120_v42 = vunpack.c.l.s8.bf16 %v8161_v34  ;;  %v7336_v27 = vld [vmem:[#allocation5 + $0x3a0] sm:$0xff] }
 0x118   :  { %v8171_v34 = vld [vmem:[#allocation5 + $0x7c0] sm:$0xff] }
 0x119   :  { %4199 = vmatpush1.bf16.msra.mxu1 %v6598_v5  ;;  %v6623_v22 = vcombine.high %v853_v62, %v857_v39  ;;  %v861_v5 = vunpack.c.h.s8.bf16 %v7334_v55  ;;  %v6622_v43 = vcombine.low %v853_v62, %v857_v39  ;;  %v1124_v55 = vunpack.c.l.s8.bf16 %v8165_v11  ;;  %9173 = vst [vmem:[#allocation55_spill] sm:$0xff] %v8171_v34  ;;  %v8179_v11 = vld [vmem:[#allocation5 + $0x7f0] sm:$0xff] }
 0x11a   :  { %4070 = vmatpush1.bf16.msra.mxu0 %v6852_v61  ;;  %4200 = vmatprep.subr.bf16.mxu1 %v6607_v57  ;;  %v7335_v61 = vld [vmem:[#allocation5 + $0x390] sm:$0xff]  ;;  %v6884_v39 = vcombine.low %v1116_v17, %v1120_v42  ;;  %9176 = vst [vmem:[#allocation58_spill] sm:$0xff] %v8179_v11 }
 0x11b   :  { %4071 = vmatprep.subr.bf16.mxu0 %v6861_v56  ;;  %v865_v57 = vunpack.c.h.s8.bf16 %v7335_v61  ;;  %v6877_v56 = vcombine.high %v1108_v19, %v1112_v6  ;;  %v1128_v61 = vunpack.c.l.s8.bf16 %v8167_v29  ;;  %v7338_v6 = vld [vmem:[#allocation5 + $0x3c0] sm:$0xff] }
 0x11c   :  { %v8177_v29 = vld [vmem:[#allocation5 + $0x7e0] sm:$0xff] }
 0x11d   :  { %4201 = vmatpush1.bf16.msra.mxu1 %v6606_v28  ;;  %v6631_v4 = vcombine.high %v861_v5, %v865_v57  ;;  %v869_v28 = vunpack.c.h.s8.bf16 %v7336_v27  ;;  %v6630_v62 = vcombine.low %v861_v5, %v865_v57  ;;  %v1132_v27 = vunpack.c.l.s8.bf16 %v8171_v34  ;;  %9175 = vst [vmem:[#allocation57_spill] sm:$0xff] %v8177_v29  ;;  %v8185_v34 = vld [vmem:[#allocation5 + $0x810] sm:$0xff] }
 0x11e   :  { %4072 = vmatpush1.bf16.msra.mxu0 %v6860_v26  ;;  %4202 = vmatprep.subr.bf16.mxu1 %v6615_v58  ;;  %v7337_v26 = vld [vmem:[#allocation5 + $0x3b0] sm:$0xff]  ;;  %v6892_v57 = vcombine.low %v1124_v55, %v1128_v61 }
 0x11f   :  { %4073 = vmatprep.subr.bf16.mxu0 %v6869_v35  ;;  %v873_v58 = vunpack.c.h.s8.bf16 %v7337_v26  ;;  %v6885_v35 = vcombine.high %v1116_v17, %v1120_v42  ;;  %v1136_v26 = vunpack.c.l.s8.bf16 %v8173_v9  ;;  %v7340_v42 = vld [vmem:[#allocation5 + $0x3e0] sm:$0xff] }
 0x120   :  { %v8183_v9 = vld [vmem:[#allocation5 + $0x800] sm:$0xff] }
 0x121   :  { %4203 = vmatpush1.bf16.msra.mxu1 %v6614_v38  ;;  %v6639_v19 = vcombine.high %v869_v28, %v873_v58  ;;  %v877_v38 = vunpack.c.h.s8.bf16 %v7338_v6  ;;  %v6638_v5 = vcombine.low %v869_v28, %v873_v58  ;;  %v1140_v6 = vunpack.c.l.s8.bf16 %v8177_v29  ;;  %v8187_v58 = vld [vmem:[#allocation5 + $0x820] sm:$0xff] }
 0x122   :  { %4074 = vmatpush1.bf16.msra.mxu0 %v6868_v2  ;;  %4204 = vmatprep.subr.bf16.mxu1 %v6623_v22  ;;  %v7339_v2 = vld [vmem:[#allocation5 + $0x3d0] sm:$0xff]  ;;  %v1152_v29 = vunpack.c.l.s8.bf16 %v8185_v34 }
 0x123   :  { %4075 = vmatprep.subr.bf16.mxu0 %v6877_v56  ;;  %v881_v22 = vunpack.c.h.s8.bf16 %v7339_v2  ;;  %v6893_v56 = vcombine.high %v1124_v55, %v1128_v61  ;;  %v1144_v2 = vunpack.c.l.s8.bf16 %v8179_v11  ;;  %v8189_v55 = vld [vmem:[#allocation5 + $0x830] sm:$0xff]  ;;  %v6900_v61 = vcombine.low %v1132_v27, %v1136_v26 }
 0x124   :  { %v1148_v11 = vunpack.c.l.s8.bf16 %v8183_v9 }
 0x125   :  { %4205 = vmatpush1.bf16.msra.mxu1 %v6622_v43  ;;  %v6647_v17 = vcombine.high %v877_v38, %v881_v22  ;;  %v885_v43 = vunpack.c.h.s8.bf16 %v7340_v42  ;;  %v6646_v28 = vcombine.low %v877_v38, %v881_v22  ;;  %v1156_v38 = vunpack.c.l.s8.bf16 %v8187_v58 }
 0x126   :  { %4076 = vmatpush1.bf16.msra.mxu0 %v6876_v13  ;;  %4206 = vmatprep.subr.bf16.mxu1 %v6631_v4  ;;  %v7341_v13 = vld [vmem:[#allocation5 + $0x3f0] sm:$0xff]  ;;  %v1160_v22 = vunpack.c.l.s8.bf16 %v8189_v55  ;;  %v6916_v52 = vcombine.low %v1148_v11, %v1152_v29 }
 0x127   :  { %4077 = vmatprep.subr.bf16.mxu0 %v6885_v35  ;;  %v889_v4 = vunpack.c.h.s8.bf16 %v7341_v13  ;;  %v6901_v35 = vcombine.high %v1132_v27, %v1136_v26  ;;  %v6909_v13 = vcombine.high %v1140_v6, %v1144_v2  ;;  %v223_v27 = vcombine.low %v8063_v0, %v8066_v63  ;;  %v8205_v0 = vld [vmem:[#allocation5 + $0x870] sm:$0xff] }
 0x128   :  { %v312_v26 = vcombine.low %v8069_v41, %v8072_v8  ;;  %v6925_v8 = vcombine.high %v1156_v38, %v1160_v22 }
 0x129   :  { %4207 = vmatpush1.bf16.msra.mxu1 %v6630_v62  ;;  %v6655_v62 = vcombine.high %v885_v43, %v889_v4 }
 0x12a   :  { %4078 = vmatpush1.bf16.msra.mxu0 %v6884_v39  ;;  %4208 = vmatprep.subr.bf16.mxu1 %v6639_v19  ;;  %v7342_v39 = vld [vmem:[#allocation5 + $0x400] sm:$0xff]  ;;  %v8207_v63 = vpack.c.bf16 %v312_v26, %v223_v27  ;;  %v7532_v26 = vmov 65535  }
 0x12b   :  { %4079 = vmatprep.subr.bf16.mxu0 %v6893_v56  ;;  %v893_v19 = vunpack.c.h.s8.bf16 %v7342_v39  ;;  %v7343_v56 = vld [vmem:[#allocation5 + $0x410] sm:$0xff] }
 0x12c   :  { %v897_v42 = vunpack.c.h.s8.bf16 %v7343_v56  ;;  %v6908_v56 = vcombine.low %v1140_v6, %v1144_v2  ;;  %9177 = vst [vmem:[#allocation59_spill] sm:$0xff] %v8207_v63  ;;  %v7346_v6 = vld [vmem:[#allocation5 + $0x440] sm:$0xff] }
 0x12d   :  { %4209 = vmatpush1.bf16.msra.mxu1 %v6638_v5  ;;  %v6654_v5 = vcombine.low %v885_v43, %v889_v4  ;;  %v6917_v43 = vcombine.high %v1148_v11, %v1152_v29  ;;  %v8199_v4 = vld [vmem:[#allocation5 + $0x840] sm:$0xff]  ;;  %v909_v2 = vunpack.c.h.s8.bf16 %v7346_v6 }
 0x12e   :  { %4080 = vmatpush1.bf16.msra.mxu0 %v6892_v57  ;;  %4210 = vmatprep.subr.bf16.mxu1 %v6647_v17  ;;  %v7344_v57 = vld [vmem:[#allocation5 + $0x420] sm:$0xff]  ;;  %v6663_v60 = vcombine.high %v893_v19, %v897_v42  ;;  %v6662_v41 = vcombine.low %v893_v19, %v897_v42  ;;  %v1164_v11 = vunpack.c.l.s8.bf16 %v8199_v4  ;;  %v7198_v42 = vld [vmem:[#allocation2 + $0x58] ss:$18 sps:$4 sm:$0x33]  }
 0x12f   :  { %4081 = vmatprep.subr.bf16.mxu0 %v6901_v35  ;;  %v901_v17 = vunpack.c.h.s8.bf16 %v7344_v57  ;;  %v7345_v35 = vld [vmem:[#allocation5 + $0x430] sm:$0xff]  ;;  %v1172_v57 = vunpack.c.l.s8.bf16 %v8203_v53  ;;  %v322_v3 = vrot.slane %v7198_v42, %v9129_v32 }
 0x130   :  { %v905_v39 = vunpack.c.h.s8.bf16 %v7345_v35  ;;  %v7196_v27 = vld [vmem:[#allocation2 + $0x10] ss:$18 sps:$4 sm:$0x33]   ;;  %v7197_v19 = vld [vmem:[#allocation2 + $0x34] ss:$18 sps:$4 sm:$0x33]  }
 0x131   :  { %4211 = vmatpush1.bf16.msra.mxu1 %v6646_v28  ;;  %v8201_v28 = vld [vmem:[#allocation5 + $0x850] sm:$0xff]  ;;  %v3898_v35 = vsel %vm3896_vm0, 4294967295, %v7532_v26  ;;  %v941_v26 = vunpack.c.h.s8.bf16 %v7970_v47 }
 0x132   :  { %4082 = vmatpush1.bf16.msra.mxu0 %v6900_v61  ;;  %4212 = vmatprep.subr.bf16.mxu1 %v6655_v62  ;;  %v6671_v61 = vcombine.high %v901_v17, %v905_v39  ;;  %v7347_v62 = vld [vmem:[#allocation5 + $0x450] sm:$0xff]  ;;  %v1168_v29 = vunpack.c.l.s8.bf16 %v8201_v28 }
 0x133   :  { %4083 = vmatprep.subr.bf16.mxu0 %v6909_v13  ;;  %v913_v13 = vunpack.c.h.s8.bf16 %v7347_v62  ;;  %v7348_v62 = vld [vmem:[#allocation5 + $0x460] sm:$0xff] }
 0x134   :  { %v917_v49 = vunpack.c.h.s8.bf16 %v7348_v62  ;;  %v6933_v36 = vcombine.high %v1164_v11, %v1168_v29  ;;  %v953_v62 = vunpack.c.h.s8.bf16 %v7980_v23  ;;  %v961_v23 = vunpack.c.h.s8.bf16 %v7988_v37 }
 0x135   :  { %4213 = vmatpush1.bf16.msra.mxu1 %v6654_v5  ;;  %v1176_v5 = vunpack.c.l.s8.bf16 %v8205_v0  ;;  %v6679_v6 = vcombine.high %v909_v2, %v913_v13  ;;  %v965_v37 = vunpack.c.h.s8.bf16 %v7996_v7  ;;  %v973_v7 = vunpack.c.h.s8.bf16 %v8004_v59 }
 0x136   :  { %4084 = vmatpush1.bf16.msra.mxu0 %v6908_v56  ;;  %4225 = vmatprep.subr.bf16.mxu1 %v6663_v60  ;;  %v6670_v60 = vcombine.low %v901_v17, %v905_v39  ;;  %v7199_v56 = vld [vmem:[#allocation2 + $0x7c] ss:$18 sps:$4 sm:$0x33]   ;;  %v8218_v17 = vsel %vm3897_vm1, %v3898_v35, 0  ;;  %v1173_v35 = vunpack.c.h.s8.bf16 %v8203_v53 }
 0x137   :  { %4096 = vmatprep.subr.bf16.mxu0 %v6917_v43  ;;  %v6924_v43 = vcombine.low %v1156_v38, %v1160_v22  ;;  %9178 = vst [vmem:[#allocation60_spill] sm:$0xff] %v8218_v17  ;;  %v6940_v39 = vcombine.low %v1172_v57, %v1176_v5  ;;  %v240_v38 = vrot.slane %v7197_v19, %v9129_v32  ;;  %v8248_v53 = vld [vmem:[#allocation5 + $0x8] sm:$0xff] }
 0x138   :  { %4215 = vmatmul.mubr.bf16.vlgmr.msra.gmra.mrb[4].mxu1 %v7905_v20  ;;  %v6941_v20 = vcombine.high %v1172_v57, %v1176_v5  ;;  %v329_v22 = vrot.slane %v7199_v56, %v9129_v32  ;;  %v1149_v5 = vunpack.c.h.s8.bf16 %v8183_v9  ;;  %v6686_v19 = vcombine.low %v917_v49, %v921_v48 }
 0x139   :  { %4086 = vmatmul.mubr.bf16.vlgmr.msra.gmra.mrb[0].mxu0 %v8207_v63  ;;  %4226 = vmatpush1.bf16.msra.mxu1 %v6662_v41  ;;  %v6678_v41 = vcombine.low %v909_v2, %v913_v13  ;;  %v925_v2 = vunpack.c.h.s8.bf16 %v7952_v21  ;;  %v929_v13 = vunpack.c.h.s8.bf16 %v7954_v15  ;;  %v3901_v42 = vand.u32 %v6940_v39, %v8218_v17 }
 0x13a   :  { %4097 = vmatpush1.bf16.msra.mxu0 %v6916_v52  ;;  %4227 = vmatprep.subr.bf16.mxu1 %v6671_v61  ;;  %v233_v52 = vrot.slane %v7196_v27, %v9129_v32  ;;  %v6687_v61 = vcombine.high %v917_v49, %v921_v48  ;;  %v3904_v57 = vand.u32 %v6941_v20, %v8218_v17  ;;  %v1153_v27 = vunpack.c.h.s8.bf16 %v8185_v34 }
 0x13b   :  { %4098 = vmatprep.subr.bf16.mxu0 %v6925_v8  ;;  %4128 = vmatprep.mubr.bf16.mxu0 %v9059_v14  ;;  %v6932_v8 = vcombine.low %v1164_v11, %v1168_v29  ;;  %v933_v11 = vunpack.c.h.s8.bf16 %v7959_v33  ;;  %v6695_v21 = vcombine.high %v925_v2, %v929_v13  ;;  %v937_v15 = vunpack.c.h.s8.bf16 %v7961_v24 }
 0x13c   :  { %4257 = vmatprep.mubr.bf16.mxu1 %v7965_v25  ;;  %v241_v32 = vcombine.low %v233_v52, %v240_v38  ;;  %v1161_v20 = vunpack.c.h.s8.bf16 %v8189_v55  ;;  %v6919_v9 = vcombine.high %v1149_v5, %v1153_v27  ;;  %v6694_v49 = vcombine.low %v925_v2, %v929_v13  ;;  %v8259_v2 = vld [vmem:[#allocation5 + $0x38] sm:$0xff] }
 0x13d   :  { %4228 = vmatpush1.bf16.msra.mxu1 %v6670_v60  ;;  %v330_v60 = vcombine.low %v322_v3, %v329_v22  ;;  %v6918_v34 = vcombine.low %v1149_v5, %v1153_v27  ;;  %v6703_v33 = vcombine.high %v933_v11, %v937_v15  ;;  %v945_v24 = vunpack.c.h.s8.bf16 %v7972_v40 }
 0x13e   :  { %4099 = vmatpush1.bf16.msra.mxu0 %v6924_v43  ;;  %4229 = vmatprep.subr.bf16.mxu1 %v6679_v6  ;;  %v1169_v55 = vunpack.c.h.s8.bf16 %v8201_v28  ;;  %v1177_v56 = vunpack.c.h.s8.bf16 %v8205_v0  ;;  %v6702_v43 = vcombine.low %v933_v11, %v937_v15  ;;  %v949_v40 = vunpack.c.h.s8.bf16 %v7978_v44  ;;  %v8250_v0 = vld [vmem:[#allocation5 + $0x18] sm:$0xff] }
 0x13f   :  { %4100 = vmatprep.subr.bf16.mxu0 %v6933_v36  ;;  %v1157_v36 = vunpack.c.h.s8.bf16 %v8187_v58  ;;  %v8235_v48 = vpack.c.bf16 %v330_v60, %v241_v32  ;;  %v1165_v58 = vunpack.c.h.s8.bf16 %v8199_v4  ;;  %v6711_v47 = vcombine.high %v941_v26, %v945_v24  ;;  %v8266_v32 = vld [vmem:[#allocation5 + $0x48] sm:$0xff]  ;;  %v8268_v60 = vld [vmem:[#allocation5 + $0x58] sm:$0xff] }
 0x140   :  { %v6943_v28 = vcombine.high %v1173_v35, %v1177_v56  ;;  %v6719_v52 = vcombine.high %v949_v40, %v953_v62  ;;  %v6942_v38 = vcombine.low %v1173_v35, %v1177_v56  ;;  %v957_v44 = vunpack.c.h.s8.bf16 %v7986_v50  ;;  %v8285_v35 = vld [vmem:[#allocation5 + $0x88] sm:$0xff]  ;;  %v8287_v56 = vld [vmem:[#allocation5 + $0x98] sm:$0xff] }
 0x141   :  { %4230 = vmatpush1.bf16.msra.mxu1 %v6678_v41  ;;  %9179 = vst [vmem:[#allocation61_spill] sm:$0xff] %v8235_v48  ;;  %v6927_v29 = vcombine.high %v1157_v36, %v1161_v20  ;;  %v6926_v6 = vcombine.low %v1157_v36, %v1161_v20  ;;  %v6935_v4 = vcombine.high %v1165_v58, %v1169_v55  ;;  %v638_v22 = vunpack.c.l.s8.bf16 %v8248_v53 }
 0x142   :  { %4101 = vmatpush1.bf16.msra.mxu0 %v6932_v8  ;;  %4231 = vmatprep.subr.bf16.mxu1 %v6687_v61  ;;  %v6710_v41 = vcombine.low %v941_v26, %v945_v24  ;;  %v6934_v39 = vcombine.low %v1165_v58, %v1169_v55  ;;  %v3910_v3 = vand.u32 %v6943_v28, %v8218_v17  ;;  %v642_v8 = vunpack.c.l.s8.bf16 %v8250_v0  ;;  %v8257_v61 = vld [vmem:[#allocation5 + $0x28] sm:$0xff] }
 0x143   :  { %4102 = vmatprep.subr.bf16.mxu0 %v3904_v57  ;;  %v6718_v13 = vcombine.low %v949_v40, %v953_v62  ;;  %v3907_v57 = vand.u32 %v6942_v38, %v8218_v17  ;;  %v6727_v50 = vcombine.high %v957_v44, %v961_v23  ;;  %v969_v5 = vunpack.c.h.s8.bf16 %v7998_v31  ;;  %v8293_v28 = vld [vmem:[#allocation5 + $0xa8] sm:$0xff] }
 0x144   :  { %v6409_v27 = vcombine.high %v638_v22, %v642_v8  ;;  %v6726_v11 = vcombine.low %v957_v44, %v961_v23  ;;  %v977_v31 = vunpack.c.h.s8.bf16 %v8006_v12  ;;  %v654_v20 = vunpack.c.l.s8.bf16 %v8266_v32 }
 0x145   :  { %4232 = vmatpush1.bf16.msra.mxu1 %v6686_v19  ;;  %v646_v19 = vunpack.c.l.s8.bf16 %v8257_v61  ;;  %v6735_v15 = vcombine.high %v965_v37, %v969_v5  ;;  %v981_v12 = vunpack.c.h.s8.bf16 %v8012_v30  ;;  %v985_v26 = vunpack.c.h.s8.bf16 %v8014_v54 }
 0x146   :  { %4103 = vmatpush1.bf16.msra.mxu0 %v3901_v42  ;;  %4233 = vmatprep.subr.bf16.mxu1 %v6695_v21  ;;  %v650_v42 = vunpack.c.l.s8.bf16 %v8259_v2  ;;  %v6408_v21 = vcombine.low %v638_v22, %v642_v8  ;;  %v989_v54 = vunpack.c.h.s8.bf16 %v8020_v18  ;;  %v670_v62 = vunpack.c.l.s8.bf16 %v8285_v35  ;;  %v8301_v22 = vld [vmem:[#allocation5 + $0xc8] sm:$0xff]  ;;  %v8303_v8 = vld [vmem:[#allocation5 + $0xd8] sm:$0xff] }
 0x147   :  { %4311 = vmatprep.subr.bf16.mxu0 %v6919_v9  ;;  %v658_v9 = vunpack.c.l.s8.bf16 %v8268_v60  ;;  %v6751_v30 = vcombine.high %v981_v12, %v985_v26  ;;  %v997_v18 = vunpack.c.h.s8.bf16 %v8028_v51  ;;  %v678_v23 = vunpack.c.l.s8.bf16 %v8293_v28 }
 0x148   :  { %v6417_v36 = vcombine.high %v646_v19, %v650_v42  ;;  %v6416_v59 = vcombine.low %v646_v19, %v650_v42  ;;  %v1005_v51 = vunpack.c.h.s8.bf16 %v8036_v10  ;;  %v8309_v19 = vld [vmem:[#allocation5 + $0xe8] sm:$0xff]  ;;  %v8311_v42 = vld [vmem:[#allocation5 + $0xf8] sm:$0xff] }
 0x149   :  { %6948 = vmatmul.mubr.msk.bf16.vlgmr.msra.gmra.mrb[0].mxu0 %vm3892_vm2, %v8235_v48  ;;  %4234 = vmatpush1.bf16.msra.mxu1 %v6694_v49  ;;  %v8274_v49 = vld [vmem:[#allocation5 + $0x68] sm:$0xff]  ;;  %v6425_v24 = vcombine.high %v654_v20, %v658_v9 }
 0x14a   :  { %4312 = vmatpush1.bf16.msra.mxu0 %v6918_v34  ;;  %4235 = vmatprep.subr.bf16.mxu1 %v6703_v33  ;;  %v8276_v34 = vld [vmem:[#allocation5 + $0x78] sm:$0xff]  ;;  %v6734_v33 = vcombine.low %v965_v37, %v969_v5  ;;  %v662_v58 = vunpack.c.l.s8.bf16 %v8274_v49  ;;  %v686_v5 = vunpack.c.l.s8.bf16 %v8301_v22 }
 0x14b   :  { %4313 = vmatprep.subr.bf16.mxu0 %v6927_v29  ;;  %4343 = vmatprep.mubr.bf16.mxu0 %v9059_v14  ;;  %v6743_v29 = vcombine.high %v973_v7, %v977_v31  ;;  %v666_v55 = vunpack.c.l.s8.bf16 %v8276_v34 }
 0x14d   :  { %4236 = vmatpush1.bf16.msra.mxu1 %v6702_v43  ;;  %v6742_v43 = vcombine.low %v973_v7, %v977_v31  ;;  %v6433_v40 = vcombine.high %v662_v58, %v666_v55  ;;  %v9180_v7 = vld [vmem:[#allocation23_spill] sm:$0xff]  ;;  %v9181_v31 = vld [vmem:[#allocation25_spill] sm:$0xff] }
 0x14e   :  { %4314 = vmatpush1.bf16.msra.mxu0 %v6926_v6  ;;  %4237 = vmatprep.subr.bf16.mxu1 %v6711_v47  ;;  %v6424_v6 = vcombine.low %v654_v20, %v658_v9  ;;  %v993_v47 = vunpack.c.h.s8.bf16 %v8022_v16  ;;  %v1001_v16 = vunpack.c.h.s8.bf16 %v8030_v46  ;;  %v1009_v46 = vunpack.c.h.s8.bf16 %v8038_v45 }
 0x14f   :  { %4315 = vmatprep.subr.bf16.mxu0 %v6935_v4  ;;  %v674_v4 = vunpack.c.l.s8.bf16 %v8287_v56  ;;  %v1013_v10 = vunpack.c.h.s8.bf16 %v9180_v7  ;;  %v1017_v45 = vunpack.c.h.s8.bf16 %v9181_v31  ;;  %v694_v20 = vunpack.c.l.s8.bf16 %v8309_v19  ;;  %v8342_v31 = vld [vmem:[#allocation5 + $0x168] sm:$0xff] }
 0x150   :  { %v6759_v38 = vcombine.high %v989_v54, %v993_v47  ;;  %v698_v9 = vunpack.c.l.s8.bf16 %v8311_v42 }
 0x151   :  { %4238 = vmatpush1.bf16.msra.mxu1 %v6710_v41  ;;  %v8295_v41 = vld [vmem:[#allocation5 + $0xb8] sm:$0xff]  ;;  %v6441_v44 = vcombine.high %v670_v62, %v674_v4 }
 0x152   :  { %4316 = vmatpush1.bf16.msra.mxu0 %v6934_v39  ;;  %4239 = vmatprep.subr.bf16.mxu1 %v6719_v52  ;;  %v6750_v39 = vcombine.low %v981_v12, %v985_v26  ;;  %v6432_v52 = vcombine.low %v662_v58, %v666_v55  ;;  %v6783_v26 = vcombine.high %v1013_v10, %v1017_v45  ;;  %v9183_v55 = vld [vmem:[#allocation19_spill] sm:$0xff] }
 0x153   :  { %4317 = vmatprep.subr.bf16.mxu0 %v3910_v3  ;;  %v682_v3 = vunpack.c.l.s8.bf16 %v8295_v41 }
 0x155   :  { %4240 = vmatpush1.bf16.msra.mxu1 %v6718_v13  ;;  %v6758_v13 = vcombine.low %v989_v54, %v993_v47  ;;  %v6449_v37 = vcombine.high %v678_v23, %v682_v3  ;;  %v8325_v47 = vld [vmem:[#allocation5 + $0x128] sm:$0xff] }
 0x156   :  { %4318 = vmatpush1.bf16.msra.mxu0 %v3907_v57  ;;  %4241 = vmatprep.subr.bf16.mxu1 %v6727_v50  ;;  %v6440_v57 = vcombine.low %v670_v62, %v674_v4  ;;  %v6767_v50 = vcombine.high %v997_v18, %v1001_v16  ;;  %v6782_v62 = vcombine.low %v1013_v10, %v1017_v45  ;;  %v9188_v10 = vld [vmem:[#allocation32_spill] sm:$0xff] }
 0x157   :  { %4354 = vmatprep.subr.bf16.mxu0 %v6409_v27  ;;  %v690_v27 = vunpack.c.l.s8.bf16 %v8303_v8  ;;  %v6464_v4 = vcombine.low %v694_v20, %v698_v9  ;;  %v8344_v45 = vld [vmem:[#allocation5 + $0x178] sm:$0xff] }
 0x159   :  { %4242 = vmatpush1.bf16.msra.mxu1 %v6726_v11  ;;  %6949 = vmatmul.mubr.msk.bf16.vlgmr.msra.gmra.mrb[4].mxu0 %vm3892_vm2, %v8235_v48  ;;  %v6766_v11 = vcombine.low %v997_v18, %v1001_v16  ;;  %v6456_v12 = vcombine.low %v686_v5, %v690_v27  ;;  %v9185_v18 = vld [vmem:[#allocation28_spill] sm:$0xff] }
 0x15a   :  { %4355 = vmatpush1.bf16.msra.mxu0 %v6408_v21  ;;  %4243 = vmatprep.subr.bf16.mxu1 %v6735_v15  ;;  %v6448_v21 = vcombine.low %v678_v23, %v682_v3  ;;  %v6775_v15 = vcombine.high %v1005_v51, %v1009_v46  ;;  %v1033_v16 = vunpack.c.h.s8.bf16 %v9185_v18  ;;  %v710_v23 = vunpack.c.l.s8.bf16 %v8325_v47  ;;  %v9193_v18 = vld [vmem:[#allocation36_spill] sm:$0xff] }
 0x15b   :  { %4356 = vmatprep.subr.bf16.mxu0 %v6417_v36  ;;  %4386 = vmatprep.mubr.bf16.mxu0 %v9130_v1  ;;  %v6457_v36 = vcombine.high %v686_v5, %v690_v27  ;;  %v9187_v27 = vld [vmem:[#allocation30_spill] sm:$0xff] }
 0x15d   :  { %4244 = vmatpush1.bf16.msra.mxu1 %v6734_v33  ;;  %v8317_v33 = vld [vmem:[#allocation5 + $0x108] sm:$0xff] }
 0x15e   :  { %4357 = vmatpush1.bf16.msra.mxu0 %v6416_v59  ;;  %4245 = vmatprep.subr.bf16.mxu1 %v6743_v29  ;;  %v8319_v59 = vld [vmem:[#allocation5 + $0x118] sm:$0xff]  ;;  %v6774_v29 = vcombine.low %v1005_v51, %v1009_v46 }
 0x15f   :  { %4358 = vmatprep.subr.bf16.mxu0 %v6425_v24  ;;  %v9182_v24 = vld [vmem:[#allocation20_spill] sm:$0xff]  ;;  %v706_v54 = vunpack.c.l.s8.bf16 %v8319_v59 }
 0x160   :  { %v1021_v58 = vunpack.c.h.s8.bf16 %v9182_v24  ;;  %v9191_v24 = vld [vmem:[#allocation35_spill] sm:$0xff] }
 0x161   :  { %4246 = vmatpush1.bf16.msra.mxu1 %v6742_v43  ;;  %v1025_v43 = vunpack.c.h.s8.bf16 %v9183_v55 }
 0x162   :  { %4359 = vmatpush1.bf16.msra.mxu0 %v6424_v6  ;;  %4247 = vmatprep.subr.bf16.mxu1 %v6751_v30  ;;  %v6465_v6 = vcombine.high %v694_v20, %v698_v9  ;;  %v702_v30 = vunpack.c.l.s8.bf16 %v8317_v33  ;;  %v9189_v20 = vld [vmem:[#allocation33_spill] sm:$0xff] }
 0x163   :  { %4360 = vmatprep.subr.bf16.mxu0 %v6433_v40  ;;  %v8327_v40 = vld [vmem:[#allocation5 + $0x138] sm:$0xff] }
 0x164   :  { %v714_v3 = vunpack.c.l.s8.bf16 %v8327_v40  ;;  %v6472_v51 = vcombine.low %v702_v30, %v706_v54 }
 0x165   :  { %4248 = vmatpush1.bf16.msra.mxu1 %v6750_v39  ;;  %v6791_v39 = vcombine.high %v1021_v58, %v1025_v43 }
 0x166   :  { %4361 = vmatpush1.bf16.msra.mxu0 %v6432_v52  ;;  %4249 = vmatprep.subr.bf16.mxu1 %v6759_v38  ;;  %v9184_v52 = vld [vmem:[#allocation27_spill] sm:$0xff]  ;;  %v6480_v9 = vcombine.low %v710_v23, %v714_v3 }
 0x167   :  { %4362 = vmatprep.subr.bf16.mxu0 %v6441_v44  ;;  %v1029_v38 = vunpack.c.h.s8.bf16 %v9184_v52  ;;  %v6473_v44 = vcombine.high %v702_v30, %v706_v54  ;;  %v8351_v30 = vld [vmem:[#allocation5 + $0x188] sm:$0xff]  ;;  %v8353_v54 = vld [vmem:[#allocation5 + $0x198] sm:$0xff] }
 0x168   :  { %v9192_v52 = vld [vmem:[#allocation21_spill] sm:$0xff] }
 0x169   :  { %4250 = vmatpush1.bf16.msra.mxu1 %v6758_v13  ;;  %v8333_v13 = vld [vmem:[#allocation5 + $0x148] sm:$0xff]  ;;  %v6799_v46 = vcombine.high %v1029_v38, %v1033_v16 }
 0x16a   :  { %4363 = vmatpush1.bf16.msra.mxu0 %v6440_v57  ;;  %4251 = vmatprep.subr.bf16.mxu1 %v6767_v50  ;;  %v8335_v57 = vld [vmem:[#allocation5 + $0x158] sm:$0xff]  ;;  %v6790_v50 = vcombine.low %v1021_v58, %v1025_v43  ;;  %v1049_v58 = vunpack.c.h.s8.bf16 %v9191_v24  ;;  %v726_v43 = vunpack.c.l.s8.bf16 %v8342_v31 }
 0x16b   :  { %4364 = vmatprep.subr.bf16.mxu0 %v6449_v37  ;;  %v9186_v37 = vld [vmem:[#allocation29_spill] sm:$0xff]  ;;  %v722_v7 = vunpack.c.l.s8.bf16 %v8335_v57 }
 0x16c   :  { %v1037_v5 = vunpack.c.h.s8.bf16 %v9186_v37 }
 0x16d   :  { %4252 = vmatpush1.bf16.msra.mxu1 %v6766_v11  ;;  %v1041_v11 = vunpack.c.h.s8.bf16 %v9187_v27  ;;  %v9194_v27 = vld [vmem:[#allocation37_spill] sm:$0xff] }
 0x16e   :  { %4365 = vmatpush1.bf16.msra.mxu0 %v6448_v21  ;;  %4253 = vmatprep.subr.bf16.mxu1 %v6775_v15  ;;  %v6481_v21 = vcombine.high %v710_v23, %v714_v3  ;;  %v718_v15 = vunpack.c.l.s8.bf16 %v8333_v13  ;;  %v734_v23 = vunpack.c.l.s8.bf16 %v8351_v30  ;;  %v738_v3 = vunpack.c.l.s8.bf16 %v8353_v54 }
 0x16f   :  { %4366 = vmatprep.subr.bf16.mxu0 %v6457_v36  ;;  %v6798_v36 = vcombine.low %v1029_v38, %v1033_v16  ;;  %v1053_v38 = vunpack.c.h.s8.bf16 %v9192_v52  ;;  %v1057_v16 = vunpack.c.h.s8.bf16 %v9193_v18  ;;  %v8375_v18 = vld [vmem:[#allocation5 + $0x1e8] sm:$0xff] }
 0x170   :  { %v6489_v55 = vcombine.high %v718_v15, %v722_v7  ;;  %v6504_v24 = vcombine.low %v734_v23, %v738_v3 }
 0x171   :  { %4254 = vmatpush1.bf16.msra.mxu1 %v6774_v29  ;;  %v6807_v29 = vcombine.high %v1037_v5, %v1041_v11 }
 0x172   :  { %4367 = vmatpush1.bf16.msra.mxu0 %v6456_v12  ;;  %4255 = vmatprep.subr.bf16.mxu1 %v6783_v26  ;;  %v9190_v12 = vld [vmem:[#allocation34_spill] sm:$0xff] }
 0x173   :  { %4368 = vmatprep.subr.bf16.mxu0 %v6465_v6  ;;  %v1045_v26 = vunpack.c.h.s8.bf16 %v9190_v12  ;;  %v730_v6 = vunpack.c.l.s8.bf16 %v8344_v45  ;;  %v8369_v12 = vld [vmem:[#allocation5 + $0x1d8] sm:$0xff] }
 0x174   :  { %v754_v52 = vunpack.c.l.s8.bf16 %v8369_v12 }
 0x175   :  { %4256 = vmatpush1.bf16.msra.mxu1 %v6782_v62  ;;  %v6806_v62 = vcombine.low %v1037_v5, %v1041_v11  ;;  %v6496_v37 = vcombine.low %v726_v43, %v730_v6  ;;  %v6823_v5 = vcombine.high %v1053_v38, %v1057_v16  ;;  %v1061_v11 = vunpack.c.h.s8.bf16 %v9194_v27 }
 0x176   :  { %4369 = vmatpush1.bf16.msra.mxu0 %v6464_v4  ;;  %4268 = vmatprep.subr.bf16.mxu1 %v6791_v39  ;;  %v6488_v4 = vcombine.low %v718_v15, %v722_v7  ;;  %v6815_v39 = vcombine.high %v1045_v26, %v1049_v58  ;;  %v6505_v7 = vcombine.high %v734_v23, %v738_v3  ;;  %v9198_v3 = vld [vmem:[#allocation41_spill] sm:$0xff] }
 0x177   :  { %4370 = vmatprep.subr.bf16.mxu0 %v6473_v44  ;;  %v6497_v44 = vcombine.high %v726_v43, %v730_v6  ;;  %v9197_v6 = vld [vmem:[#allocation40_spill] sm:$0xff] }
 0x178   :  { %4258 = vmatmul.mubr.bf16.vlgmr.msra.gmra.mrb[4].mxu1 %v9188_v10  ;;  %v8415_v10 = vld [vmem:[#allocation5 + $0x268] sm:$0xff] }
 0x179   :  { %4269 = vmatpush1.bf16.msra.mxu1 %v6790_v50  ;;  %4300 = vmatprep.mubr.bf16.mxu1 %v9189_v20  ;;  %v8359_v50 = vld [vmem:[#allocation5 + $0x1a8] sm:$0xff]  ;;  %v8409_v20 = vld [vmem:[#allocation5 + $0x258] sm:$0xff]  ;;  %9213 = vst [vmem:[#allocation30_spill] sm:$0xff] %v8415_v10 }
 0x17a   :  { %4371 = vmatpush1.bf16.msra.mxu0 %v6472_v51  ;;  %4270 = vmatprep.subr.bf16.mxu1 %v6799_v46  ;;  %v8361_v51 = vld [vmem:[#allocation5 + $0x1b8] sm:$0xff]  ;;  %v6814_v46 = vcombine.low %v1045_v26, %v1049_v58  ;;  %v6822_v26 = vcombine.low %v1053_v38, %v1057_v16  ;;  %9210 = vst [vmem:[#allocation29_spill] sm:$0xff] %v8409_v20 }
 0x17b   :  { %4372 = vmatprep.subr.bf16.mxu0 %v6481_v21  ;;  %v9195_v21 = vld [vmem:[#allocation38_spill] sm:$0xff] }
 0x17c   :  { %v1065_v15 = vunpack.c.h.s8.bf16 %v9195_v21 }
 0x17d   :  { %4271 = vmatpush1.bf16.msra.mxu1 %v6798_v36  ;;  %v742_v36 = vunpack.c.l.s8.bf16 %v8359_v50 }
 0x17e   :  { %4373 = vmatpush1.bf16.msra.mxu0 %v6480_v9  ;;  %4272 = vmatprep.subr.bf16.mxu1 %v6807_v29  ;;  %v746_v9 = vunpack.c.l.s8.bf16 %v8361_v51  ;;  %v8367_v29 = vld [vmem:[#allocation5 + $0x1c8] sm:$0xff]  ;;  %v6831_v58 = vcombine.high %v1061_v11, %v1065_v15  ;;  %v6830_v38 = vcombine.low %v1061_v11, %v1065_v15  ;;  %v8389_v11 = vld [vmem:[#allocation5 + $0x218] sm:$0xff] }
 0x17f   :  { %4374 = vmatprep.subr.bf16.mxu0 %v6489_v55  ;;  %v9196_v55 = vld [vmem:[#allocation39_spill] sm:$0xff] }
 0x180   :  { %v1069_v43 = vunpack.c.h.s8.bf16 %v9196_v55  ;;  %v6512_v16 = vcombine.low %v742_v36, %v746_v9 }
 0x181   :  { %4273 = vmatpush1.bf16.msra.mxu1 %v6806_v62  ;;  %v1073_v62 = vunpack.c.h.s8.bf16 %v9197_v6 }
 0x182   :  { %4375 = vmatpush1.bf16.msra.mxu0 %v6488_v4  ;;  %4274 = vmatprep.subr.bf16.mxu1 %v6815_v39  ;;  %v6513_v4 = vcombine.high %v742_v36, %v746_v9  ;;  %v750_v39 = vunpack.c.l.s8.bf16 %v8367_v29 }
 0x183   :  { %4376 = vmatprep.subr.bf16.mxu0 %v6497_v44  ;;  %v8377_v44 = vld [vmem:[#allocation5 + $0x1f8] sm:$0xff]  ;;  %v6839_v23 = vcombine.high %v1069_v43, %v1073_v62  ;;  %v6838_v36 = vcombine.low %v1069_v43, %v1073_v62 }
 0x184   :  { %v6521_v21 = vcombine.high %v750_v39, %v754_v52  ;;  %v762_v55 = vunpack.c.l.s8.bf16 %v8377_v44 }
 0x185   :  { %4275 = vmatpush1.bf16.msra.mxu1 %v6814_v46  ;;  %v1077_v46 = vunpack.c.h.s8.bf16 %v9198_v3 }
 0x186   :  { %4377 = vmatpush1.bf16.msra.mxu0 %v6496_v37  ;;  %4276 = vmatprep.subr.bf16.mxu1 %v6823_v5  ;;  %v9199_v37 = vld [vmem:[#allocation42_spill] sm:$0xff] }
 0x187   :  { %4378 = vmatprep.subr.bf16.mxu0 %v6505_v7  ;;  %v1081_v5 = vunpack.c.h.s8.bf16 %v9199_v37  ;;  %v758_v7 = vunpack.c.l.s8.bf16 %v8375_v18  ;;  %v9205_v37 = vld [vmem:[#allocation44_spill] sm:$0xff] }
 0x188   :  { %v1089_v14 = vunpack.c.h.s8.bf16 %v9205_v37 }
 0x189   :  { %4277 = vmatpush1.bf16.msra.mxu1 %v6822_v26  ;;  %v8387_v26 = vld [vmem:[#allocation5 + $0x208] sm:$0xff]  ;;  %v6529_v48 = vcombine.high %v758_v7, %v762_v55  ;;  %v6846_v43 = vcombine.low %v1077_v46, %v1081_v5  ;;  %v6528_v62 = vcombine.low %v758_v7, %v762_v55 }
 0x18a   :  { %4379 = vmatpush1.bf16.msra.mxu0 %v6504_v24  ;;  %4278 = vmatprep.subr.bf16.mxu1 %v6831_v58  ;;  %v6520_v24 = vcombine.low %v750_v39, %v754_v52  ;;  %v6847_v58 = vcombine.high %v1077_v46, %v1081_v5  ;;  %v766_v17 = vunpack.c.l.s8.bf16 %v8387_v26  ;;  %v9207_v52 = vld [vmem:[#allocation45_spill] sm:$0xff]  ;;  %v9211_v55 = vld [vmem:[#allocation47_spill] sm:$0xff] }
 0x18b   :  { %v8381_v27 = vpop.f32.mrb[0].mxu1  ;;  %4380 = vmatprep.subr.bf16.mxu0 %v6513_v4  ;;  %v9204_v4 = vld [vmem:[#allocation43_spill] sm:$0xff] }
 0x18c   :  { %9200 = vst [vmem:[#allocation23_spill] sm:$0xff] %v8381_v27  ;;  %v8385_v6 = vpop.f32.mrb[1].mxu1  ;;  %v1085_v3 = vunpack.c.h.s8.bf16 %v9204_v4  ;;  %v8399_v27 = vld [vmem:[#allocation5 + $0x228] sm:$0xff] }
 0x18d   :  { %9201 = vst [vmem:[#allocation25_spill] sm:$0xff] %v8385_v6  ;;  %v8391_v15 = vpop.f32.mrb[2].mxu1  ;;  %4279 = vmatpush1.bf16.msra.mxu1 %v6830_v38  ;;  %v770_v6 = vunpack.c.l.s8.bf16 %v8389_v11  ;;  %v8401_v38 = vld [vmem:[#allocation5 + $0x238] sm:$0xff]  ;;  %v774_v37 = vunpack.c.l.s8.bf16 %v8399_v27 }
 0x18e   :  { %9202 = vst [vmem:[#allocation20_spill] sm:$0xff] %v8391_v15  ;;  %4381 = vmatpush1.bf16.msra.mxu0 %v6512_v16  ;;  %v8393_v9 = vpop.f32.mrb[3].mxu1  ;;  %4280 = vmatprep.subr.bf16.mxu1 %v6839_v23  ;;  %9206 = vst [vmem:[#allocation27_spill] sm:$0xff] %v8401_v38  ;;  %v6855_v39 = vcombine.high %v1085_v3, %v1089_v14  ;;  %v1093_v16 = vunpack.c.h.s8.bf16 %v9207_v52  ;;  %v9208_v23 = vld [vmem:[#allocation46_spill] sm:$0xff]  ;;  %v6854_v46 = vcombine.low %v1085_v3, %v1089_v14  ;;  %v9215_v14 = vld [vmem:[#allocation31_spill] sm:$0xff] }
 0x18f   :  { %9203 = vst [vmem:[#allocation19_spill] sm:$0xff] %v8393_v9  ;;  %4382 = vmatprep.subr.bf16.mxu0 %v6521_v21  ;;  %v1097_v4 = vunpack.c.h.s8.bf16 %v9208_v23  ;;  %v6537_v21 = vcombine.high %v766_v17, %v770_v6  ;;  %v778_v9 = vunpack.c.l.s8.bf16 %v8401_v38  ;;  %v8407_v15 = vld [vmem:[#allocation5 + $0x248] sm:$0xff]  ;;  %v6536_v5 = vcombine.low %v766_v17, %v770_v6  ;;  %v8417_v38 = vld [vmem:[#allocation5 + $0x278] sm:$0xff] }
 0x190   :  { %9209 = vst [vmem:[#allocation28_spill] sm:$0xff] %v8407_v15  ;;  %v782_v52 = vunpack.c.l.s8.bf16 %v8407_v15  ;;  %v786_v23 = vunpack.c.l.s8.bf16 %v8409_v20  ;;  %9214 = vst [vmem:[#allocation34_spill] sm:$0xff] %v8417_v38  ;;  %v794_v20 = vunpack.c.l.s8.bf16 %v8417_v38  ;;  %v9218_v15 = vld [vmem:[#allocation26_spill] sm:$0xff] }
 0x191   :  { %4281 = vmatpush1.bf16.msra.mxu1 %v6838_v36  ;;  %v6863_v7 = vcombine.high %v1093_v16, %v1097_v4  ;;  %v1101_v36 = vunpack.c.h.s8.bf16 %v9211_v55  ;;  %v6862_v3 = vcombine.low %v1093_v16, %v1097_v4  ;;  %v6544_v17 = vcombine.low %v774_v37, %v778_v9 }
 0x192   :  { %4383 = vmatpush1.bf16.msra.mxu0 %v6520_v24  ;;  %4282 = vmatprep.subr.bf16.mxu1 %v6847_v58  ;;  %v9212_v24 = vld [vmem:[#allocation48_spill] sm:$0xff]  ;;  %v6553_v55 = vcombine.high %v782_v52, %v786_v23 }
 0x193   :  { %4384 = vmatprep.subr.bf16.mxu0 %v6529_v48  ;;  %v1105_v58 = vunpack.c.h.s8.bf16 %v9212_v24  ;;  %v6545_v48 = vcombine.high %v774_v37, %v778_v9  ;;  %v790_v24 = vunpack.c.l.s8.bf16 %v8415_v10  ;;  %v6552_v9 = vcombine.low %v782_v52, %v786_v23  ;;  %v9221_v37 = vld [vmem:[#allocation51_spill] sm:$0xff]  ;;  %v9225_v23 = vld [vmem:[#allocation53_spill] sm:$0xff] }
 0x194   :  { %v8433_v10 = vld [vmem:[#allocation5 + $0x2a8] sm:$0xff] }
 0x195   :  { %4283 = vmatpush1.bf16.msra.mxu1 %v6846_v43  ;;  %v6871_v6 = vcombine.high %v1101_v36, %v1105_v58  ;;  %v9216_v43 = vld [vmem:[#allocation49_spill] sm:$0xff]  ;;  %v6870_v16 = vcombine.low %v1101_v36, %v1105_v58  ;;  %9223 = vst [vmem:[#allocation36_spill] sm:$0xff] %v8433_v10  ;;  %v6560_v58 = vcombine.low %v790_v24, %v794_v20 }
 0x196   :  { %4385 = vmatpush1.bf16.msra.mxu0 %v6528_v62  ;;  %4284 = vmatprep.subr.bf16.mxu1 %v6855_v39  ;;  %v1109_v62 = vunpack.c.h.s8.bf16 %v9216_v43  ;;  %v9217_v39 = vld [vmem:[#allocation50_spill] sm:$0xff]  ;;  %v6561_v43 = vcombine.high %v790_v24, %v794_v20  ;;  %v9229_v24 = vld [vmem:[#allocation55_spill] sm:$0xff] }
 0x197   :  { %4397 = vmatprep.subr.bf16.mxu0 %v6537_v21  ;;  %v1113_v21 = vunpack.c.h.s8.bf16 %v9217_v39 }
 0x199   :  { %4285 = vmatpush1.bf16.msra.mxu1 %v6854_v46  ;;  %4387 = vmatmul.mubr.bf16.vlgmr.msra.gmra.mrb[8].mxu0 %v9215_v14  ;;  %v8425_v46 = vld [vmem:[#allocation5 + $0x288] sm:$0xff]  ;;  %v8427_v14 = vld [vmem:[#allocation5 + $0x298] sm:$0xff]  ;;  %v6879_v4 = vcombine.high %v1109_v62, %v1113_v21  ;;  %v6878_v36 = vcombine.low %v1109_v62, %v1113_v21 }
 0x19a   :  { %4398 = vmatpush1.bf16.msra.mxu0 %v6536_v5  ;;  %4286 = vmatprep.subr.bf16.mxu1 %v6863_v7  ;;  %9219 = vst [vmem:[#allocation35_spill] sm:$0xff] %v8425_v46  ;;  %9220 = vst [vmem:[#allocation21_spill] sm:$0xff] %v8427_v14  ;;  %v1117_v5 = vunpack.c.h.s8.bf16 %v9221_v37  ;;  %v9222_v7 = vld [vmem:[#allocation52_spill] sm:$0xff]  ;;  %v798_v39 = vunpack.c.l.s8.bf16 %v8425_v46  ;;  %v802_v38 = vunpack.c.l.s8.bf16 %v8427_v14  ;;  %v806_v37 = vunpack.c.l.s8.bf16 %v8433_v10  ;;  %v8441_v14 = vld [vmem:[#allocation5 + $0x2c8] sm:$0xff] }
 0x19b   :  { %4399 = vmatprep.subr.bf16.mxu0 %v6545_v48  ;;  %4429 = vmatprep.mubr.bf16.mxu0 %v9218_v15  ;;  %v1121_v48 = vunpack.c.h.s8.bf16 %v9222_v7  ;;  %v8435_v15 = vld [vmem:[#allocation5 + $0x2b8] sm:$0xff]  ;;  %9227 = vst [vmem:[#allocation38_spill] sm:$0xff] %v8441_v14 }
 0x19c   :  { %9224 = vst [vmem:[#allocation37_spill] sm:$0xff] %v8435_v15  ;;  %v810_v7 = vunpack.c.l.s8.bf16 %v8435_v15  ;;  %v8443_v46 = vld [vmem:[#allocation5 + $0x2d8] sm:$0xff]  ;;  %v6568_v20 = vcombine.low %v798_v39, %v802_v38  ;;  %v8449_v15 = vld [vmem:[#allocation5 + $0x2e8] sm:$0xff] }
 0x19d   :  { %4287 = vmatpush1.bf16.msra.mxu1 %v6862_v3  ;;  %v6887_v52 = vcombine.high %v1117_v5, %v1121_v48  ;;  %v1125_v3 = vunpack.c.h.s8.bf16 %v9225_v23  ;;  %9228 = vst [vmem:[#allocation39_spill] sm:$0xff] %v8443_v46  ;;  %v6886_v62 = vcombine.low %v1117_v5, %v1121_v48  ;;  %v814_v23 = vunpack.c.l.s8.bf16 %v8441_v14  ;;  %v8451_v10 = vld [vmem:[#allocation5 + $0x2f8] sm:$0xff] }
 0x19e   :  { %4400 = vmatpush1.bf16.msra.mxu0 %v6544_v17  ;;  %4288 = vmatprep.subr.bf16.mxu1 %v6871_v6  ;;  %v9226_v17 = vld [vmem:[#allocation54_spill] sm:$0xff]  ;;  %v8459_v14 = vld [vmem:[#allocation5 + $0x318] sm:$0xff] }
 0x19f   :  { %4401 = vmatprep.subr.bf16.mxu0 %v6553_v55  ;;  %v1129_v6 = vunpack.c.h.s8.bf16 %v9226_v17  ;;  %v6569_v55 = vcombine.high %v798_v39, %v802_v38  ;;  %v818_v17 = vunpack.c.l.s8.bf16 %v8443_v46  ;;  %v6576_v38 = vcombine.low %v806_v37, %v810_v7  ;;  %v9231_v39 = vld [vmem:[#allocation57_spill] sm:$0xff]  ;;  %v8457_v46 = vld [vmem:[#allocation5 + $0x308] sm:$0xff] }
 0x1a1   :  { %4289 = vmatpush1.bf16.msra.mxu1 %v6870_v16  ;;  %v6895_v21 = vcombine.high %v1125_v3, %v1129_v6  ;;  %v1133_v16 = vunpack.c.h.s8.bf16 %v9229_v24  ;;  %v6894_v5 = vcombine.low %v1125_v3, %v1129_v6  ;;  %v822_v24 = vunpack.c.l.s8.bf16 %v8449_v15 }
 0x1a2   :  { %4402 = vmatpush1.bf16.msra.mxu0 %v6552_v9  ;;  %4290 = vmatprep.subr.bf16.mxu1 %v6879_v4  ;;  %v9230_v9 = vld [vmem:[#allocation56_spill] sm:$0xff]  ;;  %v6584_v6 = vcombine.low %v814_v23, %v818_v17 }
 0x1a3   :  { %4403 = vmatprep.subr.bf16.mxu0 %v6561_v43  ;;  %v1137_v4 = vunpack.c.h.s8.bf16 %v9230_v9  ;;  %v6577_v43 = vcombine.high %v806_v37, %v810_v7  ;;  %v826_v9 = vunpack.c.l.s8.bf16 %v8451_v10  ;;  %v639_v7 = vunpack.c.h.s8.bf16 %v8248_v53 }
 0x1a4   :  { %v647_v53 = vunpack.c.h.s8.bf16 %v8257_v61  ;;  %v655_v61 = vunpack.c.h.s8.bf16 %v8266_v32 }
 0x1a5   :  { %4291 = vmatpush1.bf16.msra.mxu1 %v6878_v36  ;;  %v6903_v48 = vcombine.high %v1133_v16, %v1137_v4  ;;  %v1141_v36 = vunpack.c.h.s8.bf16 %v9231_v39  ;;  %v6902_v3 = vcombine.low %v1133_v16, %v1137_v4  ;;  %v8465_v39 = vld [vmem:[#allocation5 + $0x328] sm:$0xff]  ;;  %v6592_v4 = vcombine.low %v822_v24, %v826_v9 }
 0x1a6   :  { %4404 = vmatpush1.bf16.msra.mxu0 %v6560_v58  ;;  %4292 = vmatprep.subr.bf16.mxu1 %v6887_v52  ;;  %v9232_v58 = vld [vmem:[#allocation58_spill] sm:$0xff] }
 0x1a7   :  { %4405 = vmatprep.subr.bf16.mxu0 %v6569_v55  ;;  %v1145_v52 = vunpack.c.h.s8.bf16 %v9232_v58  ;;  %v6585_v55 = vcombine.high %v814_v23, %v818_v17  ;;  %v8467_v58 = vld [vmem:[#allocation5 + $0x338] sm:$0xff] }
 0x1a9   :  { %4293 = vmatpush1.bf16.msra.mxu1 %v6886_v62  ;;  %v6911_v37 = vcombine.high %v1141_v36, %v1145_v52  ;;  %v643_v62 = vunpack.c.h.s8.bf16 %v8250_v0  ;;  %v6910_v16 = vcombine.low %v1141_v36, %v1145_v52  ;;  %v651_v0 = vunpack.c.h.s8.bf16 %v8259_v2 }
 0x1aa   :  { %4406 = vmatpush1.bf16.msra.mxu0 %v6568_v20  ;;  %4294 = vmatprep.subr.bf16.mxu1 %v6895_v21  ;;  %v6593_v20 = vcombine.high %v822_v24, %v826_v9  ;;  %v830_v21 = vunpack.c.l.s8.bf16 %v8457_v46  ;;  %v659_v2 = vunpack.c.h.s8.bf16 %v8268_v60 }
 0x1ab   :  { %4407 = vmatprep.subr.bf16.mxu0 %v6577_v43  ;;  %v834_v43 = vunpack.c.l.s8.bf16 %v8459_v14  ;;  %v6411_v23 = vcombine.high %v639_v7, %v643_v62  ;;  %v6410_v36 = vcombine.low %v639_v7, %v643_v62  ;;  %v6419_v24 = vcombine.high %v647_v53, %v651_v0 }
 0x1ac   :  { %v6418_v7 = vcombine.low %v647_v53, %v651_v0  ;;  %v6427_v60 = vcombine.high %v655_v61, %v659_v2  ;;  %v663_v62 = vunpack.c.h.s8.bf16 %v8274_v49  ;;  %v671_v49 = vunpack.c.h.s8.bf16 %v8285_v35 }
 0x1ad   :  { %4295 = vmatpush1.bf16.msra.mxu1 %v6894_v5  ;;  %v6601_v17 = vcombine.high %v830_v21, %v834_v43  ;;  %v838_v5 = vunpack.c.l.s8.bf16 %v8465_v39  ;;  %v6600_v52 = vcombine.low %v830_v21, %v834_v43  ;;  %v667_v21 = vunpack.c.h.s8.bf16 %v8276_v34 }
 0x1ae   :  { %4408 = vmatpush1.bf16.msra.mxu0 %v6576_v38  ;;  %4296 = vmatprep.subr.bf16.mxu1 %v6903_v48  ;;  %v842_v38 = vunpack.c.l.s8.bf16 %v8467_v58  ;;  %v8473_v48 = vld [vmem:[#allocation5 + $0x348] sm:$0xff]  ;;  %v675_v34 = vunpack.c.h.s8.bf16 %v8287_v56  ;;  %v679_v35 = vunpack.c.h.s8.bf16 %v8293_v28  ;;  %v683_v56 = vunpack.c.h.s8.bf16 %v8295_v41 }
 0x1af   :  { %4409 = vmatprep.subr.bf16.mxu0 %v6585_v55  ;;  %v8475_v55 = vld [vmem:[#allocation5 + $0x358] sm:$0xff]  ;;  %v6435_v0 = vcombine.high %v663_v62, %v667_v21  ;;  %v687_v28 = vunpack.c.h.s8.bf16 %v8301_v22  ;;  %v691_v41 = vunpack.c.h.s8.bf16 %v8303_v8  ;;  %v695_v22 = vunpack.c.h.s8.bf16 %v8309_v19 }
 0x1b0   :  { %v6609_v9 = vcombine.high %v838_v5, %v842_v38  ;;  %v6608_v32 = vcombine.low %v838_v5, %v842_v38  ;;  %v699_v8 = vunpack.c.h.s8.bf16 %v8311_v42  ;;  %v703_v19 = vunpack.c.h.s8.bf16 %v8317_v33 }
 0x1b1   :  { %4297 = vmatpush1.bf16.msra.mxu1 %v6902_v3  ;;  %v846_v3 = vunpack.c.l.s8.bf16 %v8473_v48  ;;  %v707_v42 = vunpack.c.h.s8.bf16 %v8319_v59  ;;  %v711_v33 = vunpack.c.h.s8.bf16 %v8325_v47  ;;  %v715_v59 = vunpack.c.h.s8.bf16 %v8327_v40 }
 0x1b2   :  { %4410 = vmatpush1.bf16.msra.mxu0 %v6584_v6  ;;  %4298 = vmatprep.subr.bf16.mxu1 %v6911_v37  ;;  %v850_v6 = vunpack.c.l.s8.bf16 %v8475_v55  ;;  %v8482_v37 = vld [vmem:[#allocation5 + $0x368] sm:$0xff]  ;;  %v719_v47 = vunpack.c.h.s8.bf16 %v8333_v13  ;;  %v723_v40 = vunpack.c.h.s8.bf16 %v8335_v57  ;;  %v727_v57 = vunpack.c.h.s8.bf16 %v8342_v31 }
 0x1b3   :  { %4411 = vmatprep.subr.bf16.mxu0 %v6593_v20  ;;  %v8484_v20 = vld [vmem:[#allocation5 + $0x378] sm:$0xff] }
 0x1b4   :  { %v6617_v43 = vcombine.high %v846_v3, %v850_v6  ;;  %v6616_v53 = vcombine.low %v846_v3, %v850_v6  ;;  %v6491_v13 = vcombine.high %v719_v47, %v723_v40 }
 0x1b5   :  { %4299 = vmatpush1.bf16.msra.mxu1 %v6910_v16  ;;  %v854_v16 = vunpack.c.l.s8.bf16 %v8482_v37 }
 0x1b6   :  { %4412 = vmatpush1.bf16.msra.mxu0 %v6592_v4  ;;  %4569 = vmatprep.subr.bf16.mxu1 %v6411_v23  ;;  %v858_v4 = vunpack.c.l.s8.bf16 %v8484_v20  ;;  %v8491_v23 = vld [vmem:[#allocation5 + $0x388] sm:$0xff] }
 0x1b7   :  { %4413 = vmatprep.subr.bf16.mxu0 %v6601_v17  ;;  %v8493_v17 = vld [vmem:[#allocation5 + $0x398] sm:$0xff]  ;;  %v862_v38 = vunpack.c.l.s8.bf16 %v8491_v23 }
 0x1b8   :  { %4301 = vmatmul.mubr.bf16.vlgmr.msra.gmra.mrb[4].mxu1 %v8207_v63  ;;  %v6625_v5 = vcombine.high %v854_v16, %v858_v4  ;;  %v8607_v63 = vld [vmem:[#allocation5 + $0x558] sm:$0xff] }
 0x1b9   :  { %4570 = vmatpush1.bf16.msra.mxu1 %v6410_v36  ;;  %4601 = vmatprep.mubr.bf16.mxu1 %v9130_v1  ;;  %v6426_v1 = vcombine.low %v655_v61, %v659_v2  ;;  %v866_v36 = vunpack.c.l.s8.bf16 %v8493_v17  ;;  %v6434_v61 = vcombine.low %v663_v62, %v667_v21  ;;  %v6624_v2 = vcombine.low %v854_v16, %v858_v4 }
 0x1ba   :  { %4414 = vmatpush1.bf16.msra.mxu0 %v6600_v52  ;;  %4571 = vmatprep.subr.bf16.mxu1 %v6419_v24  ;;  %v8499_v52 = vld [vmem:[#allocation5 + $0x3a8] sm:$0xff]  ;;  %v8501_v24 = vld [vmem:[#allocation5 + $0x3b8] sm:$0xff]  ;;  %v6442_v62 = vcombine.low %v671_v49, %v675_v34  ;;  %9238 = vst [vmem:[#allocation43_spill] sm:$0xff] %v8607_v63 }
 0x1bb   :  { %4415 = vmatprep.subr.bf16.mxu0 %v6609_v9  ;;  %v6443_v9 = vcombine.high %v671_v49, %v675_v34  ;;  %v6633_v3 = vcombine.high %v862_v38, %v866_v36  ;;  %v870_v6 = vunpack.c.l.s8.bf16 %v8499_v52  ;;  %v6632_v21 = vcombine.low %v862_v38, %v866_v36 }
 0x1bc   :  { %v6450_v49 = vcombine.low %v679_v35, %v683_v56 }
 0x1bd   :  { %4572 = vmatpush1.bf16.msra.mxu1 %v6418_v7  ;;  %v874_v7 = vunpack.c.l.s8.bf16 %v8501_v24 }
 0x1be   :  { %4416 = vmatpush1.bf16.msra.mxu0 %v6608_v32  ;;  %4573 = vmatprep.subr.bf16.mxu1 %v6427_v60  ;;  %v8507_v32 = vld [vmem:[#allocation5 + $0x3c8] sm:$0xff]  ;;  %v8509_v60 = vld [vmem:[#allocation5 + $0x3d8] sm:$0xff] }
 0x1bf   :  { %4417 = vmatprep.subr.bf16.mxu0 %v6617_v43  ;;  %v6451_v43 = vcombine.high %v679_v35, %v683_v56  ;;  %v6641_v16 = vcombine.high %v870_v6, %v874_v7  ;;  %v878_v4 = vunpack.c.l.s8.bf16 %v8507_v32  ;;  %v6640_v34 = vcombine.low %v870_v6, %v874_v7 }
 0x1c0   :  { %v6458_v35 = vcombine.low %v687_v28, %v691_v41 }
 0x1c1   :  { %4574 = vmatpush1.bf16.msra.mxu1 %v6426_v1  ;;  %v882_v1 = vunpack.c.l.s8.bf16 %v8509_v60 }
 0x1c2   :  { %4418 = vmatpush1.bf16.msra.mxu0 %v6616_v53  ;;  %4575 = vmatprep.subr.bf16.mxu1 %v6435_v0  ;;  %v8515_v53 = vld [vmem:[#allocation5 + $0x3e8] sm:$0xff]  ;;  %v8517_v0 = vld [vmem:[#allocation5 + $0x3f8] sm:$0xff] }
 0x1c3   :  { %4419 = vmatprep.subr.bf16.mxu0 %v6625_v5  ;;  %v6459_v5 = vcombine.high %v687_v28, %v691_v41  ;;  %v6649_v38 = vcombine.high %v878_v4, %v882_v1  ;;  %v886_v36 = vunpack.c.l.s8.bf16 %v8515_v53  ;;  %v6648_v56 = vcombine.low %v878_v4, %v882_v1 }
 0x1c4   :  { %v6466_v28 = vcombine.low %v695_v22, %v699_v8 }
 0x1c5   :  { %4576 = vmatpush1.bf16.msra.mxu1 %v6434_v61  ;;  %v890_v61 = vunpack.c.l.s8.bf16 %v8517_v0 }
 0x1c6   :  { %4420 = vmatpush1.bf16.msra.mxu0 %v6624_v2  ;;  %4577 = vmatprep.subr.bf16.mxu1 %v6443_v9  ;;  %v8523_v2 = vld [vmem:[#allocation5 + $0x408] sm:$0xff]  ;;  %v8525_v9 = vld [vmem:[#allocation5 + $0x418] sm:$0xff] }
 0x1c7   :  { %4421 = vmatprep.subr.bf16.mxu0 %v6633_v3  ;;  %v6467_v3 = vcombine.high %v695_v22, %v699_v8  ;;  %v6657_v6 = vcombine.high %v886_v36, %v890_v61  ;;  %v894_v7 = vunpack.c.l.s8.bf16 %v8523_v2  ;;  %v6656_v41 = vcombine.low %v886_v36, %v890_v61 }
 0x1c8   :  { %v6474_v22 = vcombine.low %v703_v19, %v707_v42 }
 0x1c9   :  { %4578 = vmatpush1.bf16.msra.mxu1 %v6442_v62  ;;  %v898_v62 = vunpack.c.l.s8.bf16 %v8525_v9 }
 0x1ca   :  { %4422 = vmatpush1.bf16.msra.mxu0 %v6632_v21  ;;  %4579 = vmatprep.subr.bf16.mxu1 %v6451_v43  ;;  %v8531_v21 = vld [vmem:[#allocation5 + $0x428] sm:$0xff]  ;;  %v8533_v43 = vld [vmem:[#allocation5 + $0x438] sm:$0xff] }
 0x1cb   :  { %4423 = vmatprep.subr.bf16.mxu0 %v6641_v16  ;;  %v6475_v16 = vcombine.high %v703_v19, %v707_v42  ;;  %v6665_v4 = vcombine.high %v894_v7, %v898_v62  ;;  %v902_v1 = vunpack.c.l.s8.bf16 %v8531_v21  ;;  %v6664_v8 = vcombine.low %v894_v7, %v898_v62 }
 0x1cc   :  { %v6482_v19 = vcombine.low %v711_v33, %v715_v59  ;;  %v731_v7 = vunpack.c.h.s8.bf16 %v8344_v45  ;;  %v735_v45 = vunpack.c.h.s8.bf16 %v8351_v30  ;;  %v743_v30 = vunpack.c.h.s8.bf16 %v8359_v50 }
 0x1cd   :  { %4580 = vmatpush1.bf16.msra.mxu1 %v6450_v49  ;;  %v906_v49 = vunpack.c.l.s8.bf16 %v8533_v43  ;;  %v751_v50 = vunpack.c.h.s8.bf16 %v8367_v29  ;;  %v759_v29 = vunpack.c.h.s8.bf16 %v8375_v18  ;;  %v767_v18 = vunpack.c.h.s8.bf16 %v8387_v26 }
 0x1ce   :  { %4424 = vmatpush1.bf16.msra.mxu0 %v6640_v34  ;;  %4581 = vmatprep.subr.bf16.mxu1 %v6459_v5  ;;  %v8539_v34 = vld [vmem:[#allocation5 + $0x448] sm:$0xff]  ;;  %v8541_v5 = vld [vmem:[#allocation5 + $0x458] sm:$0xff]  ;;  %v6499_v31 = vcombine.high %v727_v57, %v731_v7  ;;  %v775_v26 = vunpack.c.h.s8.bf16 %v8399_v27 }
 0x1cf   :  { %4425 = vmatprep.subr.bf16.mxu0 %v6649_v38  ;;  %v6483_v38 = vcombine.high %v711_v33, %v715_v59  ;;  %v6673_v36 = vcombine.high %v902_v1, %v906_v49  ;;  %v910_v61 = vunpack.c.l.s8.bf16 %v8539_v34  ;;  %v6672_v42 = vcombine.low %v902_v1, %v906_v49 }
 0x1d0   :  { %v6490_v33 = vcombine.low %v719_v47, %v723_v40  ;;  %v739_v1 = vunpack.c.h.s8.bf16 %v8353_v54  ;;  %v6498_v47 = vcombine.low %v727_v57, %v731_v7  ;;  %v747_v54 = vunpack.c.h.s8.bf16 %v8361_v51 }
 0x1d1   :  { %4582 = vmatpush1.bf16.msra.mxu1 %v6458_v35  ;;  %v914_v35 = vunpack.c.l.s8.bf16 %v8541_v5  ;;  %v755_v51 = vunpack.c.h.s8.bf16 %v8369_v12  ;;  %v763_v12 = vunpack.c.h.s8.bf16 %v8377_v44  ;;  %v771_v44 = vunpack.c.h.s8.bf16 %v8389_v11 }
 0x1d2   :  { %4426 = vmatpush1.bf16.msra.mxu0 %v6648_v56  ;;  %4583 = vmatprep.subr.bf16.mxu1 %v6467_v3  ;;  %v8547_v56 = vld [vmem:[#allocation5 + $0x468] sm:$0xff]  ;;  %v8549_v3 = vld [vmem:[#allocation5 + $0x478] sm:$0xff]  ;;  %v6506_v57 = vcombine.low %v735_v45, %v739_v1 }
 0x1d3   :  { %4427 = vmatprep.subr.bf16.mxu0 %v6657_v6  ;;  %v9233_v6 = vld [vmem:[#allocation24_spill] sm:$0xff]  ;;  %v6681_v62 = vcombine.high %v910_v61, %v914_v35  ;;  %v6680_v59 = vcombine.low %v910_v61, %v914_v35  ;;  %v6507_v61 = vcombine.high %v735_v45, %v739_v1  ;;  %v6514_v45 = vcombine.low %v743_v30, %v747_v54 }
 0x1d5   :  { %4584 = vmatpush1.bf16.msra.mxu1 %v6466_v28  ;;  %v918_v28 = vunpack.c.l.s8.bf16 %v8547_v56 }
 0x1d6   :  { %4428 = vmatpush1.bf16.msra.mxu0 %v6656_v41  ;;  %4585 = vmatprep.subr.bf16.mxu1 %v6475_v16  ;;  %v922_v41 = vunpack.c.l.s8.bf16 %v8549_v3  ;;  %v8557_v16 = vld [vmem:[#allocation5 + $0x488] sm:$0xff] }
 0x1d7   :  { %4440 = vmatprep.subr.bf16.mxu0 %v6665_v4  ;;  %v8559_v4 = vld [vmem:[#allocation5 + $0x498] sm:$0xff] }
 0x1d8   :  { %v6689_v49 = vcombine.high %v918_v28, %v922_v41  ;;  %v6688_v40 = vcombine.low %v918_v28, %v922_v41  ;;  %v6515_v28 = vcombine.high %v743_v30, %v747_v54  ;;  %v6522_v30 = vcombine.low %v751_v50, %v755_v51 }
 0x1d9   :  { %4430 = vmatmul.mubr.bf16.vlgmr.msra.gmra.mrb[8].mxu0 %v9233_v6  ;;  %4586 = vmatpush1.bf16.msra.mxu1 %v6474_v22  ;;  %v926_v22 = vunpack.c.l.s8.bf16 %v8557_v16 }
 0x1da   :  { %4441 = vmatpush1.bf16.msra.mxu0 %v6664_v8  ;;  %4587 = vmatprep.subr.bf16.mxu1 %v6483_v38  ;;  %v930_v8 = vunpack.c.l.s8.bf16 %v8559_v4  ;;  %v8565_v38 = vld [vmem:[#allocation5 + $0x4a8] sm:$0xff] }
 0x1db   :  { %4442 = vmatprep.subr.bf16.mxu0 %v6673_v36  ;;  %4472 = vmatprep.mubr.bf16.mxu0 %v7965_v25  ;;  %v8567_v36 = vld [vmem:[#allocation5 + $0x4b8] sm:$0xff] }
 0x1dc   :  { %v6697_v35 = vcombine.high %v926_v22, %v930_v8  ;;  %v6696_v7 = vcombine.low %v926_v22, %v930_v8  ;;  %v6523_v22 = vcombine.high %v751_v50, %v755_v51  ;;  %v6530_v50 = vcombine.low %v759_v29, %v763_v12 }
 0x1dd   :  { %4588 = vmatpush1.bf16.msra.mxu1 %v6482_v19  ;;  %v934_v19 = vunpack.c.l.s8.bf16 %v8565_v38 }
 0x1de   :  { %4443 = vmatpush1.bf16.msra.mxu0 %v6672_v42  ;;  %4589 = vmatprep.subr.bf16.mxu1 %v6491_v13  ;;  %v938_v42 = vunpack.c.l.s8.bf16 %v8567_v36  ;;  %v8573_v13 = vld [vmem:[#allocation5 + $0x4c8] sm:$0xff] }
 0x1df   :  { %4444 = vmatprep.subr.bf16.mxu0 %v6681_v62  ;;  %v8575_v62 = vld [vmem:[#allocation5 + $0x4d8] sm:$0xff] }
 0x1e0   :  { %v6705_v41 = vcombine.high %v934_v19, %v938_v42  ;;  %v6704_v1 = vcombine.low %v934_v19, %v938_v42  ;;  %v6531_v19 = vcombine.high %v759_v29, %v763_v12  ;;  %v6538_v29 = vcombine.low %v767_v18, %v771_v44 }
 0x1e1   :  { %4590 = vmatpush1.bf16.msra.mxu1 %v6490_v33  ;;  %v942_v33 = vunpack.c.l.s8.bf16 %v8573_v13 }
 0x1e2   :  { %4445 = vmatpush1.bf16.msra.mxu0 %v6680_v59  ;;  %4591 = vmatprep.subr.bf16.mxu1 %v6499_v31  ;;  %v946_v59 = vunpack.c.l.s8.bf16 %v8575_v62  ;;  %v8581_v31 = vld [vmem:[#allocation5 + $0x4e8] sm:$0xff] }
 0x1e3   :  { %4446 = vmatprep.subr.bf16.mxu0 %v6689_v49  ;;  %v8583_v49 = vld [vmem:[#allocation5 + $0x4f8] sm:$0xff] }
 0x1e4   :  { %v6713_v8 = vcombine.high %v942_v33, %v946_v59  ;;  %v6712_v54 = vcombine.low %v942_v33, %v946_v59  ;;  %v6539_v33 = vcombine.high %v767_v18, %v771_v44  ;;  %v9236_v59 = vld [vmem:[#allocation27_spill] sm:$0xff]  ;;  %v9244_v44 = vld [vmem:[#allocation26_spill] sm:$0xff] }
 0x1e5   :  { %4592 = vmatpush1.bf16.msra.mxu1 %v6498_v47  ;;  %v950_v47 = vunpack.c.l.s8.bf16 %v8581_v31  ;;  %v779_v11 = vunpack.c.h.s8.bf16 %v9236_v59  ;;  %v978_v59 = vunpack.c.l.s8.bf16 %v8607_v63 }
 0x1e6   :  { %4447 = vmatpush1.bf16.msra.mxu0 %v6688_v40  ;;  %4593 = vmatprep.subr.bf16.mxu1 %v6507_v61  ;;  %v954_v40 = vunpack.c.l.s8.bf16 %v8583_v49  ;;  %v8589_v61 = vld [vmem:[#allocation5 + $0x508] sm:$0xff] }
 0x1e7   :  { %4448 = vmatprep.subr.bf16.mxu0 %v6697_v35  ;;  %v8591_v35 = vld [vmem:[#allocation5 + $0x518] sm:$0xff]  ;;  %v6546_v18 = vcombine.low %v775_v26, %v779_v11 }
 0x1e8   :  { %v6721_v42 = vcombine.high %v950_v47, %v954_v40  ;;  %v6720_v51 = vcombine.low %v950_v47, %v954_v40  ;;  %v6547_v47 = vcombine.high %v775_v26, %v779_v11  ;;  %v9239_v40 = vld [vmem:[#allocation28_spill] sm:$0xff] }
 0x1e9   :  { %4594 = vmatpush1.bf16.msra.mxu1 %v6506_v57  ;;  %v958_v57 = vunpack.c.l.s8.bf16 %v8589_v61  ;;  %v783_v27 = vunpack.c.h.s8.bf16 %v9239_v40 }
 0x1ea   :  { %4449 = vmatpush1.bf16.msra.mxu0 %v6696_v7  ;;  %4595 = vmatprep.subr.bf16.mxu1 %v6515_v28  ;;  %v962_v7 = vunpack.c.l.s8.bf16 %v8591_v35  ;;  %v8597_v28 = vld [vmem:[#allocation5 + $0x528] sm:$0xff] }
 0x1eb   :  { %4450 = vmatprep.subr.bf16.mxu0 %v6705_v41  ;;  %9234 = vst [vmem:[#allocation40_spill] sm:$0xff] %v8597_v28  ;;  %v8599_v41 = vld [vmem:[#allocation5 + $0x538] sm:$0xff] }
 0x1ec   :  { %9235 = vst [vmem:[#allocation41_spill] sm:$0xff] %v8599_v41  ;;  %v6728_v12 = vcombine.low %v958_v57, %v962_v7 }
 0x1ed   :  { %4596 = vmatpush1.bf16.msra.mxu1 %v6514_v45  ;;  %v6729_v45 = vcombine.high %v958_v57, %v962_v7 }
 0x1ee   :  { %4451 = vmatpush1.bf16.msra.mxu0 %v6704_v1  ;;  %4597 = vmatprep.subr.bf16.mxu1 %v6523_v22  ;;  %v966_v1 = vunpack.c.l.s8.bf16 %v8597_v28  ;;  %v970_v22 = vunpack.c.l.s8.bf16 %v8599_v41  ;;  %v9241_v41 = vld [vmem:[#allocation31_spill] sm:$0xff] }
 0x1ef   :  { %4452 = vmatprep.subr.bf16.mxu0 %v6713_v8  ;;  %v8605_v8 = vld [vmem:[#allocation5 + $0x548] sm:$0xff] }
 0x1f0   :  { %9237 = vst [vmem:[#allocation42_spill] sm:$0xff] %v8605_v8  ;;  %v8614_v28 = vld [vmem:[#allocation5 + $0x568] sm:$0xff]  ;;  %v6736_v57 = vcombine.low %v966_v1, %v970_v22 }
 0x1f1   :  { %4598 = vmatpush1.bf16.msra.mxu1 %v6522_v30  ;;  %v9240_v30 = vld [vmem:[#allocation29_spill] sm:$0xff]  ;;  %9242 = vst [vmem:[#allocation44_spill] sm:$0xff] %v8614_v28 }
 0x1f2   :  { %4453 = vmatpush1.bf16.msra.mxu0 %v6712_v54  ;;  %4599 = vmatprep.subr.bf16.mxu1 %v6531_v19  ;;  %v787_v54 = vunpack.c.h.s8.bf16 %v9240_v30  ;;  %v6737_v19 = vcombine.high %v966_v1, %v970_v22  ;;  %v9249_v22 = vld [vmem:[#allocation35_spill] sm:$0xff] }
 0x1f3   :  { %4454 = vmatprep.subr.bf16.mxu0 %v6721_v42  ;;  %v974_v42 = vunpack.c.l.s8.bf16 %v8605_v8  ;;  %v8623_v8 = vld [vmem:[#allocation5 + $0x588] sm:$0xff] }
 0x1f4   :  { %v6555_v7 = vcombine.high %v783_v27, %v787_v54  ;;  %9247 = vst [vmem:[#allocation46_spill] sm:$0xff] %v8623_v8  ;;  %v6554_v26 = vcombine.low %v783_v27, %v787_v54 }
 0x1f5   :  { %4600 = vmatpush1.bf16.msra.mxu1 %v6530_v50  ;;  %v8616_v50 = vld [vmem:[#allocation5 + $0x578] sm:$0xff]  ;;  %v6745_v30 = vcombine.high %v974_v42, %v978_v59  ;;  %v6744_v11 = vcombine.low %v974_v42, %v978_v59 }
 0x1f6   :  { %4455 = vmatpush1.bf16.msra.mxu0 %v6720_v51  ;;  %4612 = vmatprep.subr.bf16.mxu1 %v6539_v33  ;;  %9243 = vst [vmem:[#allocation45_spill] sm:$0xff] %v8616_v50  ;;  %v9245_v51 = vld [vmem:[#allocation30_spill] sm:$0xff]  ;;  %v986_v63 = vunpack.c.l.s8.bf16 %v8616_v50  ;;  %v9253_v59 = vld [vmem:[#allocation36_spill] sm:$0xff] }
 0x1f7   :  { %4456 = vmatprep.subr.bf16.mxu0 %v6729_v45  ;;  %v791_v33 = vunpack.c.h.s8.bf16 %v9245_v51  ;;  %v9246_v45 = vld [vmem:[#allocation34_spill] sm:$0xff]  ;;  %v990_v51 = vunpack.c.l.s8.bf16 %v8623_v8  ;;  %v8641_v8 = vld [vmem:[#allocation5 + $0x5d8] sm:$0xff] }
 0x1f8   :  { %4602 = vmatmul.mubr.bf16.vlgmr.msra.gmra.mrb[8].mxu1 %v9241_v41  ;;  %v795_v40 = vunpack.c.h.s8.bf16 %v9246_v45  ;;  %v982_v41 = vunpack.c.l.s8.bf16 %v8614_v28  ;;  %v8631_v50 = vld [vmem:[#allocation5 + $0x5a8] sm:$0xff]  ;;  %v8633_v28 = vld [vmem:[#allocation5 + $0x5b8] sm:$0xff]  ;;  %9255 = vst [vmem:[#allocation50_spill] sm:$0xff] %v8641_v8 }
 0x1f9   :  { %4613 = vmatpush1.bf16.msra.mxu1 %v6538_v29  ;;  %4644 = vmatprep.mubr.bf16.mxu1 %v9244_v44  ;;  %v8625_v29 = vld [vmem:[#allocation5 + $0x598] sm:$0xff]  ;;  %9251 = vst [vmem:[#allocation48_spill] sm:$0xff] %v8631_v50  ;;  %9252 = vst [vmem:[#allocation49_spill] sm:$0xff] %v8633_v28 }
 0x1fa   :  { %4457 = vmatpush1.bf16.msra.mxu0 %v6728_v12  ;;  %4614 = vmatprep.subr.bf16.mxu1 %v6547_v47  ;;  %9248 = vst [vmem:[#allocation47_spill] sm:$0xff] %v8625_v29  ;;  %v6563_v1 = vcombine.high %v791_v33, %v795_v40  ;;  %v799_v12 = vunpack.c.h.s8.bf16 %v9249_v22  ;;  %v9250_v47 = vld [vmem:[#allocation21_spill] sm:$0xff]  ;;  %v994_v45 = vunpack.c.l.s8.bf16 %v8625_v29  ;;  %v6562_v27 = vcombine.low %v791_v33, %v795_v40  ;;  %v8639_v29 = vld [vmem:[#allocation5 + $0x5c8] sm:$0xff] }
 0x1fb   :  { %4458 = vmatprep.subr.bf16.mxu0 %v6737_v19  ;;  %v803_v44 = vunpack.c.h.s8.bf16 %v9250_v47  ;;  %v6753_v19 = vcombine.high %v982_v41, %v986_v63  ;;  %v6752_v54 = vcombine.low %v982_v41, %v986_v63  ;;  %v998_v22 = vunpack.c.l.s8.bf16 %v8631_v50  ;;  %v9256_v41 = vld [vmem:[#allocation38_spill] sm:$0xff]  ;;  %v8649_v50 = vld [vmem:[#allocation5 + $0x5f8] sm:$0xff] }
 0x1fc   :  { %v1002_v47 = vunpack.c.l.s8.bf16 %v8633_v28  ;;  %v6760_v63 = vcombine.low %v990_v51, %v994_v45  ;;  %v8647_v28 = vld [vmem:[#allocation5 + $0x5e8] sm:$0xff]  ;;  %9259 = vst [vmem:[#allocation52_spill] sm:$0xff] %v8649_v50 }
 0x1fd   :  { %4615 = vmatpush1.bf16.msra.mxu1 %v6546_v18  ;;  %v6571_v42 = vcombine.high %v799_v12, %v803_v44  ;;  %v807_v18 = vunpack.c.h.s8.bf16 %v9253_v59  ;;  %v6570_v33 = vcombine.low %v799_v12, %v803_v44  ;;  %v1006_v59 = vunpack.c.l.s8.bf16 %v8639_v29  ;;  %9258 = vst [vmem:[#allocation51_spill] sm:$0xff] %v8647_v28 }
 0x1fe   :  { %4459 = vmatpush1.bf16.msra.mxu0 %v6736_v57  ;;  %4616 = vmatprep.subr.bf16.mxu1 %v6555_v7  ;;  %v9254_v57 = vld [vmem:[#allocation37_spill] sm:$0xff]  ;;  %v6768_v44 = vcombine.low %v998_v22, %v1002_v47 }
 0x1ff   :  { %4460 = vmatprep.subr.bf16.mxu0 %v6745_v30  ;;  %v811_v7 = vunpack.c.h.s8.bf16 %v9254_v57  ;;  %v6761_v30 = vcombine.high %v990_v51, %v994_v45  ;;  %v1010_v57 = vunpack.c.l.s8.bf16 %v8641_v8  ;;  %v823_v45 = vunpack.c.h.s8.bf16 %v8449_v15 }
 0x200   :  { %v831_v15 = vunpack.c.h.s8.bf16 %v8457_v46  ;;  %v839_v46 = vunpack.c.h.s8.bf16 %v8465_v39  ;;  %v847_v39 = vunpack.c.h.s8.bf16 %v8473_v48  ;;  %v9272_v48 = vld [vmem:[#allocation32_spill] sm:$0xff] }
 0x201   :  { %4617 = vmatpush1.bf16.msra.mxu1 %v6554_v26  ;;  %v6579_v40 = vcombine.high %v807_v18, %v811_v7  ;;  %v815_v26 = vunpack.c.h.s8.bf16 %v9256_v41  ;;  %v6578_v12 = vcombine.low %v807_v18, %v811_v7  ;;  %v8655_v41 = vld [vmem:[#allocation5 + $0x608] sm:$0xff]  ;;  %v6776_v7 = vcombine.low %v1006_v59, %v1010_v57 }
 0x202   :  { %4461 = vmatpush1.bf16.msra.mxu0 %v6744_v11  ;;  %4618 = vmatprep.subr.bf16.mxu1 %v6563_v1  ;;  %v9257_v11 = vld [vmem:[#allocation39_spill] sm:$0xff]  ;;  %9260 = vst [vmem:[#allocation53_spill] sm:$0xff] %v8655_v41 }
 0x203   :  { %4462 = vmatprep.subr.bf16.mxu0 %v6753_v19  ;;  %v819_v1 = vunpack.c.h.s8.bf16 %v9257_v11  ;;  %v6769_v19 = vcombine.high %v998_v22, %v1002_v47  ;;  %v8657_v11 = vld [vmem:[#allocation5 + $0x618] sm:$0xff] }
 0x204   :  { %9261 = vst [vmem:[#allocation54_spill] sm:$0xff] %v8657_v11 }
 0x205   :  { %4619 = vmatpush1.bf16.msra.mxu1 %v6562_v27  ;;  %v6587_v51 = vcombine.high %v815_v26, %v819_v1  ;;  %v827_v27 = vunpack.c.h.s8.bf16 %v8451_v10  ;;  %v6586_v18 = vcombine.low %v815_v26, %v819_v1  ;;  %v835_v10 = vunpack.c.h.s8.bf16 %v8459_v14 }
 0x206   :  { %4463 = vmatpush1.bf16.msra.mxu0 %v6752_v54  ;;  %4620 = vmatprep.subr.bf16.mxu1 %v6571_v42  ;;  %v6777_v54 = vcombine.high %v1006_v59, %v1010_v57  ;;  %v1014_v42 = vunpack.c.l.s8.bf16 %v8647_v28  ;;  %v843_v14 = vunpack.c.h.s8.bf16 %v8467_v58  ;;  %v851_v58 = vunpack.c.h.s8.bf16 %v8475_v55  ;;  %v8692_v55 = vld [vmem:[#allocation11] sm:$0xff] }
 0x207   :  { %4464 = vmatprep.subr.bf16.mxu0 %v6761_v30  ;;  %v1018_v30 = vunpack.c.l.s8.bf16 %v8649_v50  ;;  %v6595_v22 = vcombine.high %v823_v45, %v827_v27  ;;  %v6594_v26 = vcombine.low %v823_v45, %v827_v27  ;;  %v6603_v59 = vcombine.high %v831_v15, %v835_v10  ;;  %9273 = vst [vmem:[#allocation26_spill] sm:$0xff] %v8692_v55  ;;  %v9277_v50 = vld [vmem:[#allocation20_spill] sm:$0xff] }
 0x208   :  { %v6602_v45 = vcombine.low %v831_v15, %v835_v10  ;;  %v8686_v10 = vld [vmem:[#allocation11 + $0xf] sm:$0xff] }
 0x209   :  { %4621 = vmatpush1.bf16.msra.mxu1 %v6570_v33  ;;  %v6785_v47 = vcombine.high %v1014_v42, %v1018_v30  ;;  %v1022_v33 = vunpack.c.l.s8.bf16 %v8655_v41  ;;  %v6784_v1 = vcombine.low %v1014_v42, %v1018_v30  ;;  %v6611_v42 = vcombine.high %v839_v46, %v843_v14  ;;  %v8677_v30 = vld [vmem:[#allocation5 + $0x668] sm:$0xff]  ;;  %9270 = vst [vmem:[#allocation29_spill] sm:$0xff] %v8686_v10 }
 0x20a   :  { %4465 = vmatpush1.bf16.msra.mxu0 %v6760_v63  ;;  %4622 = vmatprep.subr.bf16.mxu1 %v6579_v40  ;;  %v1026_v63 = vunpack.c.l.s8.bf16 %v8657_v11  ;;  %v8663_v40 = vld [vmem:[#allocation5 + $0x628] sm:$0xff]  ;;  %9266 = vst [vmem:[#allocation24_spill] sm:$0xff] %v8677_v30  ;;  %v863_v41 = vunpack.c.h.s8.bf16 %v8491_v23 }
 0x20b   :  { %4466 = vmatprep.subr.bf16.mxu0 %v6769_v19  ;;  %9262 = vst [vmem:[#allocation55_spill] sm:$0xff] %v8663_v40  ;;  %v8665_v19 = vld [vmem:[#allocation5 + $0x638] sm:$0xff] }
 0x20c   :  { %9263 = vst [vmem:[#allocation56_spill] sm:$0xff] %v8665_v19  ;;  %v6793_v57 = vcombine.high %v1022_v33, %v1026_v63  ;;  %v6792_v27 = vcombine.low %v1022_v33, %v1026_v63  ;;  %v6610_v63 = vcombine.low %v839_v46, %v843_v14 }
 0x20d   :  { %4623 = vmatpush1.bf16.msra.mxu1 %v6578_v12  ;;  %v1030_v12 = vunpack.c.l.s8.bf16 %v8663_v40  ;;  %v9276_v40 = vld [vmem:[#allocation25_spill] sm:$0xff] }
 0x20e   :  { %4467 = vmatpush1.bf16.msra.mxu0 %v6768_v44  ;;  %4624 = vmatprep.subr.bf16.mxu1 %v6587_v51  ;;  %v1034_v44 = vunpack.c.l.s8.bf16 %v8665_v19  ;;  %v8671_v51 = vld [vmem:[#allocation5 + $0x648] sm:$0xff]  ;;  %v859_v19 = vunpack.c.h.s8.bf16 %v8484_v20  ;;  %v8709_v20 = vld [vmem:[#allocation5 + $0x698] sm:$0xff] }
 0x20f   :  { %4468 = vmatprep.subr.bf16.mxu0 %v6777_v54  ;;  %9264 = vst [vmem:[#allocation57_spill] sm:$0xff] %v8671_v51  ;;  %v8673_v54 = vld [vmem:[#allocation5 + $0x658] sm:$0xff] }
 0x210   :  { %9265 = vst [vmem:[#allocation58_spill] sm:$0xff] %v8673_v54  ;;  %v1042_v15 = vunpack.c.l.s8.bf16 %v8673_v54  ;;  %v855_v54 = vunpack.c.h.s8.bf16 %v8482_v37  ;;  %v8707_v37 = vld [vmem:[#allocation5 + $0x688] sm:$0xff] }
 0x211   :  { %4625 = vmatpush1.bf16.msra.mxu1 %v6586_v18  ;;  %v8679_v18 = vld [vmem:[#allocation5 + $0x678] sm:$0xff] }
 0x212   :  { %4469 = vmatpush1.bf16.msra.mxu0 %v6776_v7  ;;  %4626 = vmatprep.subr.bf16.mxu1 %v6595_v22  ;;  %9267 = vst [vmem:[#allocation27_spill] sm:$0xff] %v8679_v18  ;;  %v9268_v7 = vld [vmem:[#allocation22_spill] sm:$0xff] }
 0x213   :  { %4470 = vmatprep.subr.bf16.mxu0 %v6785_v47  ;;  %v8682_v22 = vsub.s32 0, %v9268_v7  ;;  %v6801_v47 = vcombine.high %v1030_v12, %v1034_v44  ;;  %v8689_v33 = vsub.s32 1, %v9268_v7 }
 0x215   :  { %4627 = vmatpush1.bf16.msra.mxu1 %v6594_v26  ;;  %9269 = vst [vmem:[#allocation28_spill] sm:$0xff] %v8682_v22  ;;  %v1038_v26 = vunpack.c.l.s8.bf16 %v8671_v51  ;;  %9271 = vst [vmem:[#allocation31_spill] sm:$0xff] %v8689_v33  ;;  %v6619_v51 = vcombine.high %v847_v39, %v851_v58  ;;  %v4788_v7 = vrot.slane %v8686_v10, %v8682_v22 }
 0x216   :  { %4471 = vmatpush1.bf16.msra.mxu0 %v6784_v1  ;;  %4628 = vmatprep.subr.bf16.mxu1 %v6603_v59  ;;  %v1046_v1 = vunpack.c.l.s8.bf16 %v8677_v30  ;;  %v1050_v59 = vunpack.c.l.s8.bf16 %v8679_v18  ;;  %v4845_v14 = vrot.slane %v8692_v55, %v8682_v22  ;;  %v6618_v30 = vcombine.low %v847_v39, %v851_v58 }
 0x217   :  { %4483 = vmatprep.subr.bf16.mxu0 %v6793_v57  ;;  %v6800_v57 = vcombine.low %v1030_v12, %v1034_v44  ;;  %v4849_v12 = vrot.slane %v8692_v55, %v8689_v33  ;;  %v9275_v44 = vld [vmem:[#allocation23_spill] sm:$0xff]  ;;  %v6808_v18 = vcombine.low %v1038_v26, %v1042_v15  ;;  %v1058_v39 = vunpack.c.l.s8.bf16 %v8709_v20 }
 0x219   :  { %4473 = vmatmul.mubr.bf16.vlgmr.msra.gmra.mrb[8].mxu0 %v9272_v48  ;;  %4629 = vmatpush1.bf16.msra.mxu1 %v6602_v45  ;;  %v6809_v45 = vcombine.high %v1038_v26, %v1042_v15  ;;  %v9274_v48 = vld [vmem:[#allocation33_spill] sm:$0xff]  ;;  %v9278_v26 = vld [vmem:[#allocation19_spill] sm:$0xff]  ;;  %v6816_v15 = vcombine.low %v1046_v1, %v1050_v59 }
 0x21a   :  { %4484 = vmatpush1.bf16.msra.mxu0 %v6792_v27  ;;  %4630 = vmatprep.subr.bf16.mxu1 %v6611_v42  ;;  %v4792_v27 = vrot.slane %v8686_v10, %v8689_v33  ;;  %v6627_v10 = vcombine.high %v855_v54, %v859_v19  ;;  %v867_v33 = vunpack.c.h.s8.bf16 %v8493_v17 }
 0x21b   :  { %4485 = vmatprep.subr.bf16.mxu0 %v6801_v47  ;;  %4515 = vmatprep.mubr.bf16.mxu0 %v9274_v48  ;;  %v6817_v48 = vcombine.high %v1046_v1, %v1050_v59 }
 0x21c   :  { %v4130_v46 = vpop.f32.mrb[0].mxu0 }
 0x21d   :  { %v7055_v42 = vadd.f32 %v4130_v46, %v9275_v44  ;;  %v4132_v47 = vpop.f32.mrb[1].mxu0  ;;  %4631 = vmatpush1.bf16.msra.mxu1 %v6610_v63  ;;  %v1054_v63 = vunpack.c.l.s8.bf16 %v8707_v37  ;;  %v8721_v46 = vld [vmem:[#allocation5 + $0x6b8] sm:$0xff] }
 0x21e   :  { %v7056_v11 = vadd.f32 %v4132_v47, %v9276_v40  ;;  %v4134_v22 = vpop.f32.mrb[2].mxu0  ;;  %4486 = vmatpush1.bf16.msra.mxu0 %v6800_v57  ;;  %4632 = vmatprep.subr.bf16.mxu1 %v6619_v51  ;;  %v6626_v57 = vcombine.low %v855_v54, %v859_v19  ;;  %v8719_v51 = vld [vmem:[#allocation5 + $0x6a8] sm:$0xff]  ;;  %v1066_v54 = vunpack.c.l.s8.bf16 %v8721_v46 }
 0x21f   :  { %v4825_v55 = vmul.f32 %v7055_v42, %v4788_v7  ;;  %v7057_v28 = vadd.f32 %v4134_v22, %v9277_v50  ;;  %v4136_v8 = vpop.f32.mrb[3].mxu0  ;;  %4487 = vmatprep.subr.bf16.mxu0 %v6809_v45  ;;  %v871_v50 = vunpack.c.h.s8.bf16 %v8499_v52  ;;  %v875_v22 = vunpack.c.h.s8.bf16 %v8501_v24 }
 0x220   :  { %v4826_v58 = vmul.f32 %v7056_v11, %v4792_v27  ;;  %v7058_v40 = vadd.f32 %v4136_v8, %v9278_v26  ;;  %v6635_v11 = vcombine.high %v863_v41, %v867_v33  ;;  %v6825_v8 = vcombine.high %v1054_v63, %v1058_v39 }
 0x221   :  { %v4882_v23 = vadd.f32 %v4845_v14, %v4825_v55  ;;  %v4833_v17 = vmul.f32 %v7057_v28, %v4788_v7  ;;  %4633 = vmatpush1.bf16.msra.mxu1 %v6618_v30  ;;  %v1062_v19 = vunpack.c.l.s8.bf16 %v8719_v51  ;;  %v6824_v55 = vcombine.low %v1054_v63, %v1058_v39  ;;  %v8727_v28 = vld [vmem:[#allocation5 + $0x6c8] sm:$0xff]  ;;  %v8729_v30 = vld [vmem:[#allocation5 + $0x6d8] sm:$0xff] }
 0x222   :  { %v4883_v45 = vadd.f32 %v4849_v12, %v4826_v58  ;;  %v4834_v44 = vmul.f32 %v7058_v40, %v4792_v27  ;;  %4488 = vmatpush1.bf16.msra.mxu0 %v6808_v18  ;;  %4634 = vmatprep.subr.bf16.mxu1 %v6627_v10  ;;  %v6634_v7 = vcombine.low %v863_v41, %v867_v33  ;;  %v1070_v47 = vunpack.c.l.s8.bf16 %v8727_v28  ;;  %v8737_v39 = vld [vmem:[#allocation5 + $0x6e8] sm:$0xff]  ;;  %v8739_v41 = vld [vmem:[#allocation5 + $0x6f8] sm:$0xff] }
 0x223   :  { %v4890_v42 = vadd.f32 %v4845_v14, %v4833_v17  ;;  %4489 = vmatprep.subr.bf16.mxu0 %v6817_v48  ;;  %v4898_v52 = vmax.f32 %v4882_v23, 0.0  ;;  %v6643_v18 = vcombine.high %v871_v50, %v875_v22  ;;  %v879_v48 = vunpack.c.h.s8.bf16 %v8507_v32  ;;  %v8747_v17 = vld [vmem:[#allocation5 + $0x708] sm:$0xff] }
 0x224   :  { %v4891_v1 = vadd.f32 %v4849_v12, %v4834_v44  ;;  %v4899_v10 = vmax.f32 %v4883_v45, 0.0  ;;  %v883_v14 = vunpack.c.h.s8.bf16 %v8509_v60  ;;  %v6833_v12 = vcombine.high %v1062_v19, %v1066_v54  ;;  %v8749_v45 = vld [vmem:[#allocation5 + $0x718] sm:$0xff] }
 0x225   :  { %v4906_v24 = vmax.f32 %v4890_v42, 0.0  ;;  %4635 = vmatpush1.bf16.msra.mxu1 %v6626_v57  ;;  %v1074_v63 = vunpack.c.l.s8.bf16 %v8729_v30  ;;  %v6642_v58 = vcombine.low %v871_v50, %v875_v22  ;;  %v6832_v32 = vcombine.low %v1062_v19, %v1066_v54 }
 0x226   :  { %v4907_v59 = vmax.f32 %v4891_v1, 0.0  ;;  %4490 = vmatpush1.bf16.msra.mxu0 %v6816_v15  ;;  %4636 = vmatprep.subr.bf16.mxu1 %v6635_v11  ;;  %v6651_v60 = vcombine.high %v879_v48, %v883_v14  ;;  %v887_v26 = vunpack.c.h.s8.bf16 %v8515_v53  ;;  %v891_v40 = vunpack.c.h.s8.bf16 %v8517_v0 }
 0x227   :  { %v8733_v27 = vpack.c.bf16 %v4906_v24, %v4898_v52  ;;  %4491 = vmatprep.subr.bf16.mxu0 %v6825_v8  ;;  %v6841_v15 = vcombine.high %v1070_v47, %v1074_v63  ;;  %v1078_v57 = vunpack.c.l.s8.bf16 %v8737_v39  ;;  %v1082_v23 = vunpack.c.l.s8.bf16 %v8739_v41  ;;  %v8763_v52 = vld [vmem:[#allocation5 + $0x728] sm:$0xff]  ;;  %v8765_v24 = vld [vmem:[#allocation5 + $0x738] sm:$0xff] }
 0x228   :  { %v8741_v33 = vpack.c.bf16 %v4907_v59, %v4899_v10  ;;  %v6650_v50 = vcombine.low %v879_v48, %v883_v14  ;;  %v6840_v53 = vcombine.low %v1070_v47, %v1074_v63  ;;  %v6659_v0 = vcombine.high %v887_v26, %v891_v40  ;;  %v8773_v47 = vld [vmem:[#allocation5 + $0x758] sm:$0xff] }
 0x229   :  { %4637 = vmatpush1.bf16.msra.mxu1 %v6634_v7  ;;  %v895_v11 = vunpack.c.h.s8.bf16 %v8523_v2  ;;  %v899_v42 = vunpack.c.h.s8.bf16 %v8525_v9  ;;  %v6849_v19 = vcombine.high %v1078_v57, %v1082_v23  ;;  %v1086_v54 = vunpack.c.l.s8.bf16 %v8747_v17 }
 0x22a   :  { %4492 = vmatpush1.bf16.msra.mxu0 %v6824_v55  ;;  %4638 = vmatprep.subr.bf16.mxu1 %v6643_v18  ;;  %v1090_v1 = vunpack.c.l.s8.bf16 %v8749_v45  ;;  %v6658_v7 = vcombine.low %v887_v26, %v891_v40  ;;  %v6848_v2 = vcombine.low %v1078_v57, %v1082_v23  ;;  %v903_v18 = vunpack.c.h.s8.bf16 %v8531_v21  ;;  %v8782_v57 = vld [vmem:[#allocation5 + $0x778] sm:$0xff] }
 0x22b   :  { %4493 = vmatprep.subr.bf16.mxu0 %v6833_v12  ;;  %v6667_v9 = vcombine.high %v895_v11, %v899_v42  ;;  %v907_v10 = vunpack.c.h.s8.bf16 %v8533_v43  ;;  %v1094_v48 = vunpack.c.l.s8.bf16 %v8763_v52  ;;  %v1098_v14 = vunpack.c.l.s8.bf16 %v8765_v24  ;;  %v8771_v12 = vld [vmem:[#allocation5 + $0x748] sm:$0xff] }
 0x22c   :  { %v8751_v44 = vpop.f32.mrb[4].mxu0  ;;  %v6857_v59 = vcombine.high %v1086_v54, %v1090_v1  ;;  %v6666_v63 = vcombine.low %v895_v11, %v899_v42  ;;  %v911_v21 = vunpack.c.h.s8.bf16 %v8539_v34  ;;  %v915_v43 = vunpack.c.h.s8.bf16 %v8541_v5  ;;  %v8789_v42 = vld [vmem:[#allocation5 + $0x788] sm:$0xff] }
 0x22d   :  { %4639 = vmatpush1.bf16.msra.mxu1 %v6642_v58  ;;  %v8753_v22 = vpop.f32.mrb[5].mxu0  ;;  %v6856_v58 = vcombine.low %v1086_v54, %v1090_v1  ;;  %v1102_v26 = vunpack.c.l.s8.bf16 %v8771_v12  ;;  %v1106_v40 = vunpack.c.l.s8.bf16 %v8773_v47  ;;  %v6674_v23 = vcombine.low %v903_v18, %v907_v10 }
 0x22e   :  { %4494 = vmatpush1.bf16.msra.mxu0 %v6832_v32  ;;  %4640 = vmatprep.subr.bf16.mxu1 %v6651_v60  ;;  %v8757_v8 = vpop.f32.mrb[6].mxu0  ;;  %v6675_v32 = vcombine.high %v903_v18, %v907_v10  ;;  %v6865_v60 = vcombine.high %v1094_v48, %v1098_v14  ;;  %v6864_v34 = vcombine.low %v1094_v48, %v1098_v14  ;;  %v1114_v11 = vunpack.c.l.s8.bf16 %v8782_v57  ;;  %v8797_v18 = vld [vmem:[#allocation5 + $0x7a8] sm:$0xff]  ;;  %v8799_v10 = vld [vmem:[#allocation5 + $0x7b8] sm:$0xff] }
 0x22f   :  { %4495 = vmatprep.subr.bf16.mxu0 %v6841_v15  ;;  %v8761_v55 = vpop.f32.mrb[7].mxu0  ;;  %v8780_v15 = vld [vmem:[#allocation5 + $0x768] sm:$0xff]  ;;  %v6683_v5 = vcombine.high %v911_v21, %v915_v43  ;;  %v6872_v54 = vcombine.low %v1102_v26, %v1106_v40 }
 0x231   :  { %4641 = vmatpush1.bf16.msra.mxu1 %v6650_v50  ;;  %v919_v50 = vunpack.c.h.s8.bf16 %v8547_v56  ;;  %v927_v56 = vunpack.c.h.s8.bf16 %v8557_v16  ;;  %v935_v16 = vunpack.c.h.s8.bf16 %v8565_v38  ;;  %v943_v38 = vunpack.c.h.s8.bf16 %v8573_v13 }
 0x232   :  { %4496 = vmatpush1.bf16.msra.mxu0 %v6840_v53  ;;  %4642 = vmatprep.subr.bf16.mxu1 %v6659_v0  ;;  %v923_v53 = vunpack.c.h.s8.bf16 %v8549_v3  ;;  %v6873_v0 = vcombine.high %v1102_v26, %v1106_v40  ;;  %v931_v3 = vunpack.c.h.s8.bf16 %v8559_v4  ;;  %v939_v4 = vunpack.c.h.s8.bf16 %v8567_v36 }
 0x233   :  { %4497 = vmatprep.subr.bf16.mxu0 %v6849_v19  ;;  %v8791_v19 = vld [vmem:[#allocation5 + $0x798] sm:$0xff]  ;;  %v947_v36 = vunpack.c.h.s8.bf16 %v8575_v62  ;;  %v951_v13 = vunpack.c.h.s8.bf16 %v8581_v31  ;;  %v955_v62 = vunpack.c.h.s8.bf16 %v8583_v49 }
 0x234   :  { %v6691_v1 = vcombine.high %v919_v50, %v923_v53  ;;  %v6699_v14 = vcombine.high %v927_v56, %v931_v3  ;;  %v6707_v40 = vcombine.high %v935_v16, %v939_v4 }
 0x235   :  { %4643 = vmatpush1.bf16.msra.mxu1 %v6658_v7  ;;  %v6723_v49 = vcombine.high %v951_v13, %v955_v62 }
 0x236   :  { %4498 = vmatpush1.bf16.msra.mxu0 %v6848_v2  ;;  %4655 = vmatprep.subr.bf16.mxu1 %v6667_v9  ;;  %v1118_v2 = vunpack.c.l.s8.bf16 %v8789_v42  ;;  %v1122_v9 = vunpack.c.l.s8.bf16 %v8791_v19 }
 0x237   :  { %4499 = vmatprep.subr.bf16.mxu0 %v6857_v59  ;;  %v6690_v59 = vcombine.low %v919_v50, %v923_v53  ;;  %v8813_v50 = vld [vmem:[#allocation5 + $0x7e8] sm:$0xff]  ;;  %v8815_v53 = vld [vmem:[#allocation5 + $0x7f8] sm:$0xff] }
 0x238   :  { %4645 = vmatmul.mubr.bf16.vlgmr.msra.gmra.mrb[8].mxu1 %v9233_v6  ;;  %v1110_v6 = vunpack.c.l.s8.bf16 %v8780_v15  ;;  %v6888_v26 = vcombine.low %v1118_v2, %v1122_v9 }
 0x239   :  { %4656 = vmatpush1.bf16.msra.mxu1 %v6666_v63  ;;  %4687 = vmatprep.mubr.bf16.mxu1 %v7965_v25  ;;  %v6682_v25 = vcombine.low %v911_v21, %v915_v43  ;;  %v6889_v63 = vcombine.high %v1118_v2, %v1122_v9  ;;  %v8805_v21 = vld [vmem:[#allocation5 + $0x7c8] sm:$0xff]  ;;  %v8807_v43 = vld [vmem:[#allocation5 + $0x7d8] sm:$0xff]  ;;  %v959_v2 = vunpack.c.h.s8.bf16 %v8589_v61  ;;  %v963_v9 = vunpack.c.h.s8.bf16 %v8591_v35 }
 0x23a   :  { %4500 = vmatpush1.bf16.msra.mxu0 %v6856_v58  ;;  %4657 = vmatprep.subr.bf16.mxu1 %v6675_v32  ;;  %v6881_v7 = vcombine.high %v1110_v6, %v1114_v11  ;;  %v6880_v48 = vcombine.low %v1110_v6, %v1114_v11  ;;  %v1126_v58 = vunpack.c.l.s8.bf16 %v8797_v18  ;;  %v1130_v32 = vunpack.c.l.s8.bf16 %v8799_v10 }
 0x23b   :  { %4501 = vmatprep.subr.bf16.mxu0 %v6865_v60  ;;  %v6698_v60 = vcombine.low %v927_v56, %v931_v3  ;;  %v6715_v11 = vcombine.high %v943_v38, %v947_v36  ;;  %v8821_v56 = vld [vmem:[#allocation5 + $0x808] sm:$0xff]  ;;  %v8823_v3 = vld [vmem:[#allocation5 + $0x818] sm:$0xff]  ;;  %v6731_v61 = vcombine.high %v959_v2, %v963_v9 }
 0x23c   :  { %v6896_v6 = vcombine.low %v1126_v58, %v1130_v32 }
 0x23d   :  { %4658 = vmatpush1.bf16.msra.mxu1 %v6674_v23  ;;  %v6897_v23 = vcombine.high %v1126_v58, %v1130_v32  ;;  %v6722_v58 = vcombine.low %v951_v13, %v955_v62 }
 0x23e   :  { %4502 = vmatpush1.bf16.msra.mxu0 %v6864_v34  ;;  %4659 = vmatprep.subr.bf16.mxu1 %v6683_v5  ;;  %v1134_v34 = vunpack.c.l.s8.bf16 %v8805_v21  ;;  %v1138_v5 = vunpack.c.l.s8.bf16 %v8807_v43 }
 0x23f   :  { %4503 = vmatprep.subr.bf16.mxu0 %v6873_v0  ;;  %v6706_v0 = vcombine.low %v935_v16, %v939_v4  ;;  %v8829_v16 = vld [vmem:[#allocation5 + $0x828] sm:$0xff]  ;;  %v8831_v4 = vld [vmem:[#allocation5 + $0x838] sm:$0xff] }
 0x240   :  { %v6904_v31 = vcombine.low %v1134_v34, %v1138_v5  ;;  %v1158_v35 = vunpack.c.l.s8.bf16 %v8829_v16  ;;  %v1162_v32 = vunpack.c.l.s8.bf16 %v8831_v4 }
 0x241   :  { %4660 = vmatpush1.bf16.msra.mxu1 %v6682_v25  ;;  %v6905_v25 = vcombine.high %v1134_v34, %v1138_v5  ;;  %v8839_v34 = vld [vmem:[#allocation5 + $0x858] sm:$0xff]  ;;  %v8841_v5 = vld [vmem:[#allocation5 + $0x868] sm:$0xff] }
 0x242   :  { %4504 = vmatpush1.bf16.msra.mxu0 %v6872_v54  ;;  %4661 = vmatprep.subr.bf16.mxu1 %v6691_v1  ;;  %v1142_v54 = vunpack.c.l.s8.bf16 %v8813_v50  ;;  %v1146_v1 = vunpack.c.l.s8.bf16 %v8815_v53  ;;  %9281 = vst [vmem:[#allocation30_spill] sm:$0xff] %v8841_v5  ;;  %v6929_v13 = vcombine.high %v1158_v35, %v1162_v32 }
 0x243   :  { %4505 = vmatprep.subr.bf16.mxu0 %v6881_v7  ;;  %v6714_v7 = vcombine.low %v943_v38, %v947_v36 }
 0x245   :  { %4662 = vmatpush1.bf16.msra.mxu1 %v6690_v59  ;;  %v6913_v59 = vcombine.high %v1142_v54, %v1146_v1 }
 0x246   :  { %4506 = vmatpush1.bf16.msra.mxu0 %v6880_v48  ;;  %4663 = vmatprep.subr.bf16.mxu1 %v6699_v14  ;;  %v1150_v48 = vunpack.c.l.s8.bf16 %v8821_v56  ;;  %v1154_v14 = vunpack.c.l.s8.bf16 %v8823_v3 }
 0x247   :  { %4507 = vmatprep.subr.bf16.mxu0 %v6889_v63  ;;  %v6912_v63 = vcombine.low %v1142_v54, %v1146_v1  ;;  %v9284_v1 = vld [vmem:[#allocation43_spill] sm:$0xff] }
 0x248   :  { %v6921_v36 = vcombine.high %v1150_v48, %v1154_v14 }
 0x249   :  { %4664 = vmatpush1.bf16.msra.mxu1 %v6698_v60  ;;  %v9279_v60 = vld [vmem:[#allocation40_spill] sm:$0xff] }
 0x24a   :  { %4508 = vmatpush1.bf16.msra.mxu0 %v6888_v26  ;;  %4665 = vmatprep.subr.bf16.mxu1 %v6707_v40  ;;  %v967_v26 = vunpack.c.h.s8.bf16 %v9279_v60  ;;  %v9280_v40 = vld [vmem:[#allocation41_spill] sm:$0xff] }
 0x24b   :  { %4509 = vmatprep.subr.bf16.mxu0 %v6897_v23  ;;  %v971_v38 = vunpack.c.h.s8.bf16 %v9280_v40  ;;  %v8837_v23 = vld [vmem:[#allocation5 + $0x848] sm:$0xff] }
 0x24d   :  { %4666 = vmatpush1.bf16.msra.mxu1 %v6706_v0  ;;  %v8843_v0 = vld [vmem:[#allocation5 + $0x878] sm:$0xff]  ;;  %v6739_v62 = vcombine.high %v967_v26, %v971_v38 }
 0x24e   :  { %4510 = vmatpush1.bf16.msra.mxu0 %v6896_v6  ;;  %4667 = vmatprep.subr.bf16.mxu1 %v6715_v11  ;;  %9282 = vst [vmem:[#allocation34_spill] sm:$0xff] %v8843_v0  ;;  %v6920_v6 = vcombine.low %v1150_v48, %v1154_v14  ;;  %v6730_v11 = vcombine.low %v959_v2, %v963_v9  ;;  %v1178_v60 = vunpack.c.l.s8.bf16 %v8843_v0  ;;  %v9286_v14 = vld [vmem:[#allocation44_spill] sm:$0xff] }
 0x24f   :  { %4511 = vmatprep.subr.bf16.mxu0 %v6905_v25  ;;  %v9283_v25 = vld [vmem:[#allocation42_spill] sm:$0xff]  ;;  %v6738_v2 = vcombine.low %v967_v26, %v971_v38  ;;  %v6928_v9 = vcombine.low %v1158_v35, %v1162_v32  ;;  %v9290_v35 = vld [vmem:[#allocation47_spill] sm:$0xff] }
 0x250   :  { %v975_v54 = vunpack.c.h.s8.bf16 %v9283_v25  ;;  %v9289_v38 = vld [vmem:[#allocation46_spill] sm:$0xff]  ;;  %v995_v32 = vunpack.c.h.s8.bf16 %v9290_v35 }
 0x251   :  { %4668 = vmatpush1.bf16.msra.mxu1 %v6714_v7  ;;  %v979_v7 = vunpack.c.h.s8.bf16 %v9284_v1  ;;  %v9288_v1 = vmov 0  }
 0x252   :  { %4512 = vmatpush1.bf16.msra.mxu0 %v6904_v31  ;;  %4669 = vmatprep.subr.bf16.mxu1 %v6723_v49  ;;  %v1166_v31 = vunpack.c.l.s8.bf16 %v8837_v23  ;;  %v1170_v49 = vunpack.c.l.s8.bf16 %v8839_v34 }
 0x253   :  { %4513 = vmatprep.subr.bf16.mxu0 %v6913_v59  ;;  %v1174_v59 = vunpack.c.l.s8.bf16 %v8841_v5  ;;  %v6747_v48 = vcombine.high %v975_v54, %v979_v7  ;;  %v6746_v0 = vcombine.low %v975_v54, %v979_v7  ;;  %v4922_v7 = vld [vmem:[#allocation7] sm:$0xff] }
 0x254   :  { %v6936_v5 = vcombine.low %v1166_v31, %v1170_v49 }
 0x255   :  { %4670 = vmatpush1.bf16.msra.mxu1 %v6722_v58  ;;  %v9285_v58 = vld [vmem:[#allocation59_spill] sm:$0xff]  ;;  %v6945_v25 = vcombine.high %v1174_v59, %v1178_v60  ;;  %v6944_v26 = vcombine.low %v1174_v59, %v1178_v60  ;;  %v9293_v60 = vld [vmem:[#allocation49_spill] sm:$0xff] }
 0x256   :  { %4514 = vmatpush1.bf16.msra.mxu0 %v6912_v63  ;;  %4671 = vmatprep.subr.bf16.mxu1 %v6731_v61  ;;  %v983_v63 = vunpack.c.h.s8.bf16 %v9286_v14  ;;  %v9287_v61 = vld [vmem:[#allocation45_spill] sm:$0xff] }
 0x257   :  { %4526 = vmatprep.subr.bf16.mxu0 %v6921_v36  ;;  %v987_v40 = vunpack.c.h.s8.bf16 %v9287_v61  ;;  %v6937_v36 = vcombine.high %v1166_v31, %v1170_v49  ;;  %v4923_v61 = vld [vmem:[#allocation7 + $0x8] sm:$0xff]  ;;  %v9292_v49 = vld [vmem:[#allocation48_spill] sm:$0xff] }
 0x258   :  { %v5051_v54 = vunpack.c.l.s8.bf16 %v4923_v61  ;;  %v999_v59 = vunpack.c.h.s8.bf16 %v9292_v49 }
 0x259   :  { %4516 = vmatmul.mubr.bf16.vlgmr.msra.gmra.mrb[8].mxu0 %v9285_v58  ;;  %4672 = vmatpush1.bf16.msra.mxu1 %v6730_v11  ;;  %v6755_v11 = vcombine.high %v983_v63, %v987_v40 }
 0x25a   :  { %4527 = vmatpush1.bf16.msra.mxu0 %v6920_v6  ;;  %4673 = vmatprep.subr.bf16.mxu1 %v6739_v62  ;;  %v991_v6 = vunpack.c.h.s8.bf16 %v9289_v38  ;;  %v9291_v62 = vld [vmem:[#allocation60_spill] sm:$0xff] }
 0x25b   :  { %4528 = vmatprep.subr.bf16.mxu0 %v6929_v13  ;;  %4558 = vmatprep.mubr.bf16.mxu0 %v9288_v1  ;;  %v3916_v14 = vand.u32 %v6945_v25, %v9291_v62  ;;  %v6754_v13 = vcombine.low %v983_v63, %v987_v40  ;;  %v9294_v63 = vld [vmem:[#allocation50_spill] sm:$0xff]  ;;  %v5055_v25 = vunpack.c.h.s8.bf16 %v4923_v61 }
 0x25c   :  { %v6763_v31 = vcombine.high %v991_v6, %v995_v32 }
 0x25d   :  { %4674 = vmatpush1.bf16.msra.mxu1 %v6738_v2  ;;  %v3913_v2 = vand.u32 %v6944_v26, %v9291_v62  ;;  %v9295_v26 = vld [vmem:[#allocation61_spill] sm:$0xff] }
 0x25e   :  { %4529 = vmatpush1.bf16.msra.mxu0 %v6928_v9  ;;  %4675 = vmatprep.subr.bf16.mxu1 %v6747_v48  ;;  %v1003_v9 = vunpack.c.h.s8.bf16 %v9293_v60  ;;  %v6762_v48 = vcombine.low %v991_v6, %v995_v32  ;;  %v5054_v6 = vunpack.c.h.s8.bf16 %v4922_v7  ;;  %v9296_v32 = vld [vmem:[#allocation51_spill] sm:$0xff] }
 0x25f   :  { %4530 = vmatprep.subr.bf16.mxu0 %v6937_v36  ;;  %v5050_v36 = vunpack.c.l.s8.bf16 %v4922_v7 }
 0x260   :  { %v6771_v40 = vcombine.high %v999_v59, %v1003_v9  ;;  %v6770_v38 = vcombine.low %v999_v59, %v1003_v9  ;;  %v9298_v59 = vld [vmem:[#allocation53_spill] sm:$0xff]  ;;  %v9299_v9 = vld [vmem:[#allocation54_spill] sm:$0xff] }
 0x261   :  { %4676 = vmatpush1.bf16.msra.mxu1 %v6746_v0  ;;  %v1007_v0 = vunpack.c.h.s8.bf16 %v8639_v29  ;;  %v1023_v60 = vunpack.c.h.s8.bf16 %v9298_v59  ;;  %v9302_v59 = vld [vmem:[#allocation57_spill] sm:$0xff] }
 0x262   :  { %4531 = vmatpush1.bf16.msra.mxu0 %v6936_v5  ;;  %4677 = vmatprep.subr.bf16.mxu1 %v6755_v11  ;;  %v1011_v5 = vunpack.c.h.s8.bf16 %v9294_v63  ;;  %v4927_v11 = vld [vmem:[#allocation7 + $0x28] sm:$0xff] }
 0x263   :  { %4532 = vmatprep.subr.bf16.mxu0 %v3916_v14  ;;  %v1015_v14 = vunpack.c.h.s8.bf16 %v9296_v32  ;;  %v5063_v7 = vunpack.c.h.s8.bf16 %v4927_v11  ;;  %v9300_v32 = vld [vmem:[#allocation55_spill] sm:$0xff] }
 0x264   :  { %v6779_v35 = vcombine.high %v1007_v0, %v1011_v5  ;;  %v6778_v61 = vcombine.low %v1007_v0, %v1011_v5  ;;  %v9301_v0 = vld [vmem:[#allocation56_spill] sm:$0xff] }
 0x265   :  { %4678 = vmatpush1.bf16.msra.mxu1 %v6754_v13  ;;  %v9297_v13 = vld [vmem:[#allocation52_spill] sm:$0xff]  ;;  %v1035_v5 = vunpack.c.h.s8.bf16 %v9301_v0 }
 0x266   :  { %4533 = vmatpush1.bf16.msra.mxu0 %v3913_v2  ;;  %4679 = vmatprep.subr.bf16.mxu1 %v6763_v31  ;;  %v1019_v29 = vunpack.c.h.s8.bf16 %v9297_v13  ;;  %v5059_v2 = vunpack.c.l.s8.bf16 %v4927_v11  ;;  %v4926_v31 = vld [vmem:[#allocation7 + $0x20] sm:$0xff] }
 0x267   :  { %5306 = vmatprep.subr.bf16.mxu0 %v5051_v54  ;;  %v5058_v54 = vunpack.c.l.s8.bf16 %v4926_v31 }
 0x268   :  { %v6787_v49 = vcombine.high %v1015_v14, %v1019_v29  ;;  %v6786_v63 = vcombine.low %v1015_v14, %v1019_v29  ;;  %v9303_v14 = vld [vmem:[#allocation58_spill] sm:$0xff] }
 0x269   :  { %6950 = vmatmul.mubr.msk.bf16.vlgmr.msra.gmra.mrb[8].mxu0 %vm3892_vm2, %v9295_v26  ;;  %4680 = vmatpush1.bf16.msra.mxu1 %v6762_v48  ;;  %v1027_v48 = vunpack.c.h.s8.bf16 %v9299_v9  ;;  %v1043_v29 = vunpack.c.h.s8.bf16 %v9303_v14 }
 0x26a   :  { %5307 = vmatpush1.bf16.msra.mxu0 %v5050_v36  ;;  %5338 = vmatprep.mubr.bf16.mxu0 %v8741_v33  ;;  %v4931_v36 = vld [vmem:[#allocation7 + $0x48] sm:$0xff] }
 0x26b   :  { %4681 = vmatprep.subr.bf16.mxu1 %v6771_v40  ;;  %5308 = vmatprep.subr.bf16.mxu0 %v5055_v25  ;;  %v5062_v40 = vunpack.c.h.s8.bf16 %v4926_v31  ;;  %v6795_v25 = vcombine.high %v1023_v60, %v1027_v48  ;;  %v6794_v13 = vcombine.low %v1023_v60, %v1027_v48  ;;  %v5071_v31 = vunpack.c.h.s8.bf16 %v4931_v36 }
 0x26d   :  { %4682 = vmatpush1.bf16.msra.mxu1 %v6770_v38  ;;  %v1031_v38 = vunpack.c.h.s8.bf16 %v9300_v32 }
 0x26e   :  { %5309 = vmatpush1.bf16.msra.mxu0 %v5054_v6  ;;  %4683 = vmatprep.subr.bf16.mxu1 %v6779_v35  ;;  %v5067_v6 = vunpack.c.l.s8.bf16 %v4931_v36  ;;  %v4930_v35 = vld [vmem:[#allocation7 + $0x40] sm:$0xff] }
 0x26f   :  { %5310 = vmatprep.subr.bf16.mxu0 %v5059_v2  ;;  %v5066_v2 = vunpack.c.l.s8.bf16 %v4930_v35  ;;  %v6803_v11 = vcombine.high %v1031_v38, %v1035_v5  ;;  %v6802_v9 = vcombine.low %v1031_v38, %v1035_v5  ;;  %v5070_v60 = vunpack.c.h.s8.bf16 %v4930_v35 }
 0x270   :  { %v1055_v38 = vunpack.c.h.s8.bf16 %v8707_v37  ;;  %v1059_v5 = vunpack.c.h.s8.bf16 %v8709_v20  ;;  %v9308_v20 = vld [vmem:[#allocation22_spill] sm:$0xff] }
 0x271   :  { %4684 = vmatpush1.bf16.msra.mxu1 %v6778_v61  ;;  %v1039_v61 = vunpack.c.h.s8.bf16 %v9302_v59  ;;  %v4934_v59 = vld [vmem:[#allocation7 + $0x60] sm:$0xff] }
 0x272   :  { %5311 = vmatpush1.bf16.msra.mxu0 %v5058_v54  ;;  %4685 = vmatprep.subr.bf16.mxu1 %v6787_v49  ;;  %v9304_v54 = vld [vmem:[#allocation32_spill] sm:$0xff]  ;;  %v4935_v49 = vld [vmem:[#allocation7 + $0x68] sm:$0xff]  ;;  %v5078_v14 = vunpack.c.h.s8.bf16 %v4934_v59  ;;  %v6826_v37 = vcombine.low %v1055_v38, %v1059_v5 }
 0x273   :  { %5312 = vmatprep.subr.bf16.mxu0 %v5063_v7  ;;  %v9305_v7 = vld [vmem:[#allocation33_spill] sm:$0xff]  ;;  %v6811_v48 = vcombine.high %v1039_v61, %v1043_v29  ;;  %v5075_v0 = vunpack.c.l.s8.bf16 %v4935_v49  ;;  %v6810_v36 = vcombine.low %v1039_v61, %v1043_v29  ;;  %v5079_v35 = vunpack.c.h.s8.bf16 %v4935_v49 }
 0x274   :  { %v1063_v61 = vunpack.c.h.s8.bf16 %v8719_v51  ;;  %v1067_v29 = vunpack.c.h.s8.bf16 %v8721_v46  ;;  %v8883_v49 = vsub.s32 2, %v9308_v20  ;;  %v8888_v51 = vsub.s32 3, %v9308_v20 }
 0x275   :  { %4686 = vmatpush1.bf16.msra.mxu1 %v6786_v63  ;;  %v9306_v63 = vld [vmem:[#allocation24_spill] sm:$0xff] }
 0x276   :  { %5313 = vmatpush1.bf16.msra.mxu0 %v5062_v40  ;;  %4698 = vmatprep.subr.bf16.mxu1 %v6795_v25  ;;  %v1047_v40 = vunpack.c.h.s8.bf16 %v9306_v63  ;;  %v9307_v25 = vld [vmem:[#allocation27_spill] sm:$0xff]  ;;  %v1075_v63 = vunpack.c.h.s8.bf16 %v8729_v30  ;;  %v4942_v30 = vld [vmem:[#allocation7 + $0xa0] sm:$0xff] }
 0x277   :  { %5314 = vmatprep.subr.bf16.mxu0 %v5067_v6  ;;  %v1051_v32 = vunpack.c.h.s8.bf16 %v9307_v25  ;;  %v5074_v6 = vunpack.c.l.s8.bf16 %v4934_v59  ;;  %v6834_v25 = vcombine.low %v1063_v61, %v1067_v29  ;;  %v9309_v59 = vld [vmem:[#allocation29_spill] sm:$0xff] }
 0x278   :  { %4688 = vmatmul.mubr.bf16.vlgmr.msra.gmra.mrb[8].mxu1 %v9304_v54  ;;  %v4938_v54 = vld [vmem:[#allocation7 + $0x80] sm:$0xff] }
 0x279   :  { %4699 = vmatpush1.bf16.msra.mxu1 %v6794_v13  ;;  %4730 = vmatprep.mubr.bf16.mxu1 %v9305_v7  ;;  %v6819_v13 = vcombine.high %v1047_v40, %v1051_v32  ;;  %v5082_v7 = vunpack.c.l.s8.bf16 %v4938_v54 }
 0x27a   :  { %5315 = vmatpush1.bf16.msra.mxu0 %v5066_v2  ;;  %4700 = vmatprep.subr.bf16.mxu1 %v6803_v11  ;;  %v4939_v2 = vld [vmem:[#allocation7 + $0x88] sm:$0xff]  ;;  %v6818_v11 = vcombine.low %v1047_v40, %v1051_v32  ;;  %v1079_v32 = vunpack.c.h.s8.bf16 %v8737_v39 }
 0x27b   :  { %5316 = vmatprep.subr.bf16.mxu0 %v5071_v31  ;;  %v6827_v31 = vcombine.high %v1055_v38, %v1059_v5  ;;  %v5087_v46 = vunpack.c.h.s8.bf16 %v4939_v2  ;;  %v4943_v40 = vld [vmem:[#allocation7 + $0xa8] sm:$0xff]  ;;  %v4800_v38 = vrot.slane %v9309_v59, %v8888_v51 }
 0x27c   :  { %v5091_v5 = vunpack.c.l.s8.bf16 %v4943_v40  ;;  %v9310_v39 = vld [vmem:[#allocation26_spill] sm:$0xff] }
 0x27d   :  { %4701 = vmatpush1.bf16.msra.mxu1 %v6802_v9  ;;  %v5083_v9 = vunpack.c.l.s8.bf16 %v4939_v2  ;;  %v4853_v2 = vrot.slane %v9310_v39, %v8883_v49 }
 0x27e   :  { %5317 = vmatpush1.bf16.msra.mxu0 %v5070_v60  ;;  %4702 = vmatprep.subr.bf16.mxu1 %v6811_v48  ;;  %v6835_v60 = vcombine.high %v1063_v61, %v1067_v29  ;;  %v1071_v48 = vunpack.c.h.s8.bf16 %v8727_v28  ;;  %v5086_v28 = vunpack.c.h.s8.bf16 %v4938_v54  ;;  %v5090_v61 = vunpack.c.l.s8.bf16 %v4942_v30 }
 0x27f   :  { %5318 = vmatprep.subr.bf16.mxu0 %v5075_v0  ;;  %v1083_v0 = vunpack.c.h.s8.bf16 %v8739_v41 }
 0x280   :  { %v6842_v54 = vcombine.low %v1071_v48, %v1075_v63 }
 0x281   :  { %4703 = vmatpush1.bf16.msra.mxu1 %v6810_v36  ;;  %v4796_v36 = vrot.slane %v9309_v59, %v8883_v49  ;;  %v6851_v29 = vcombine.high %v1079_v32, %v1083_v0 }
 0x282   :  { %5319 = vmatpush1.bf16.msra.mxu0 %v5074_v6  ;;  %4704 = vmatprep.subr.bf16.mxu1 %v6819_v13  ;;  %v6843_v6 = vcombine.high %v1071_v48, %v1075_v63  ;;  %v4947_v48 = vld [vmem:[#allocation7 + $0xc8] sm:$0xff] }
 0x283   :  { %5320 = vmatprep.subr.bf16.mxu0 %v5079_v35 }
 0x285   :  { %4705 = vmatpush1.bf16.msra.mxu1 %v6818_v11  ;;  %v4857_v11 = vrot.slane %v9310_v39, %v8888_v51 }
 0x286   :  { %5321 = vmatpush1.bf16.msra.mxu0 %v5078_v14  ;;  %4706 = vmatprep.subr.bf16.mxu1 %v6827_v31 }
 0x287   :  { %5322 = vmatprep.subr.bf16.mxu0 %v5083_v9 }
 0x289   :  { %4707 = vmatpush1.bf16.msra.mxu1 %v6826_v37 }
 0x28a   :  { %5323 = vmatpush1.bf16.msra.mxu0 %v5082_v7  ;;  %4708 = vmatprep.subr.bf16.mxu1 %v6835_v60  ;;  %v1091_v60 = vunpack.c.h.s8.bf16 %v8749_v45  ;;  %v1095_v45 = vunpack.c.h.s8.bf16 %v8763_v52  ;;  %v1107_v52 = vunpack.c.h.s8.bf16 %v8773_v47 }
 0x28b   :  { %v4302_v13 = vpop.f32.mrb[4].mxu1  ;;  %5324 = vmatprep.subr.bf16.mxu0 %v5087_v46 }
 0x28c   :  { %v7059_v35 = vadd.f32 %v8751_v44, %v4302_v13  ;;  %v4304_v41 = vpop.f32.mrb[5].mxu1  ;;  %v1087_v44 = vunpack.c.h.s8.bf16 %v8747_v17  ;;  %v4946_v17 = vld [vmem:[#allocation7 + $0xc0] sm:$0xff] }
 0x28d   :  { %v7060_v14 = vadd.f32 %v8753_v22, %v4304_v41  ;;  %v4306_v31 = vpop.f32.mrb[6].mxu1  ;;  %4709 = vmatpush1.bf16.msra.mxu1 %v6834_v25  ;;  %v5095_v22 = vunpack.c.h.s8.bf16 %v4943_v40  ;;  %v1099_v41 = vunpack.c.h.s8.bf16 %v8765_v24  ;;  %v5099_v40 = vunpack.c.l.s8.bf16 %v4947_v48 }
 0x28e   :  { %v4827_v9 = vmul.f32 %v7059_v35, %v4796_v36  ;;  %v7061_v37 = vadd.f32 %v8757_v8, %v4306_v31  ;;  %5325 = vmatpush1.bf16.msra.mxu0 %v5086_v28  ;;  %v4308_v7 = vpop.f32.mrb[7].mxu1  ;;  %4710 = vmatprep.subr.bf16.mxu1 %v6843_v6  ;;  %v6850_v35 = vcombine.low %v1079_v32, %v1083_v0  ;;  %v5094_v8 = vunpack.c.h.s8.bf16 %v4942_v30 }
 0x28f   :  { %v4828_v46 = vmul.f32 %v7060_v14, %v4800_v38  ;;  %v7062_v59 = vadd.f32 %v8761_v55, %v4308_v7  ;;  %5326 = vmatprep.subr.bf16.mxu0 %v5091_v5  ;;  %v6859_v6 = vcombine.high %v1087_v44, %v1091_v60  ;;  %v5098_v32 = vunpack.c.l.s8.bf16 %v4946_v17 }
 0x290   :  { %v4884_v13 = vadd.f32 %v4853_v2, %v4827_v9  ;;  %v4835_v25 = vmul.f32 %v7061_v37, %v4796_v36  ;;  %v6867_v30 = vcombine.high %v1095_v45, %v1099_v41  ;;  %v5103_v24 = vunpack.c.h.s8.bf16 %v4947_v48 }
 0x291   :  { %v4885_v63 = vadd.f32 %v4857_v11, %v4828_v46  ;;  %v4836_v39 = vmul.f32 %v7062_v59, %v4800_v38  ;;  %4711 = vmatpush1.bf16.msra.mxu1 %v6842_v54  ;;  %v6858_v38 = vcombine.low %v1087_v44, %v1091_v60  ;;  %v4951_v54 = vld [vmem:[#allocation7 + $0xe8] sm:$0xff]  ;;  %v1111_v37 = vunpack.c.h.s8.bf16 %v8780_v15 }
 0x292   :  { %v4892_v28 = vadd.f32 %v4853_v2, %v4835_v25  ;;  %5327 = vmatpush1.bf16.msra.mxu0 %v5090_v61  ;;  %4712 = vmatprep.subr.bf16.mxu1 %v6851_v29  ;;  %v4900_v5 = vmax.f32 %v4884_v13, 0.0  ;;  %v1103_v2 = vunpack.c.h.s8.bf16 %v8771_v12  ;;  %v6866_v61 = vcombine.low %v1095_v45, %v1099_v41  ;;  %v4950_v12 = vld [vmem:[#allocation7 + $0xe0] sm:$0xff]  ;;  %v4955_v25 = vld [vmem:[#allocation7 + $0x108] sm:$0xff] }
 0x293   :  { %v4893_v55 = vadd.f32 %v4857_v11, %v4836_v39  ;;  %5328 = vmatprep.subr.bf16.mxu0 %v5095_v22  ;;  %v4901_v14 = vmax.f32 %v4885_v63, 0.0  ;;  %v5102_v29 = vunpack.c.h.s8.bf16 %v4946_v17  ;;  %v1115_v7 = vunpack.c.h.s8.bf16 %v8782_v57  ;;  %v4954_v39 = vld [vmem:[#allocation7 + $0x100] sm:$0xff]  ;;  %v4959_v41 = vld [vmem:[#allocation7 + $0x128] sm:$0xff] }
 0x294   :  { %v4908_v36 = vmax.f32 %v4892_v28, 0.0  ;;  %v6875_v9 = vcombine.high %v1103_v2, %v1107_v52  ;;  %v5107_v44 = vunpack.c.l.s8.bf16 %v4951_v54  ;;  %v6874_v47 = vcombine.low %v1103_v2, %v1107_v52  ;;  %v4963_v2 = vld [vmem:[#allocation7 + $0x148] sm:$0xff] }
 0x295   :  { %v4909_v31 = vmax.f32 %v4893_v55, 0.0  ;;  %4713 = vmatpush1.bf16.msra.mxu1 %v6850_v35  ;;  %v5106_v60 = vunpack.c.l.s8.bf16 %v4950_v12  ;;  %v6883_v46 = vcombine.high %v1111_v37, %v1115_v7  ;;  %v1119_v59 = vunpack.c.h.s8.bf16 %v8789_v42 }
 0x296   :  { %v8908_v0 = vpack.c.bf16 %v4908_v36, %v4900_v5  ;;  %5329 = vmatpush1.bf16.msra.mxu0 %v5094_v8  ;;  %4714 = vmatprep.subr.bf16.mxu1 %v6859_v6  ;;  %v1123_v22 = vunpack.c.h.s8.bf16 %v8791_v19  ;;  %v5111_v13 = vunpack.c.h.s8.bf16 %v4951_v54  ;;  %v6882_v15 = vcombine.low %v1111_v37, %v1115_v7 }
 0x297   :  { %5330 = vmatprep.subr.bf16.mxu0 %v5099_v40  ;;  %v8912_v11 = vpack.c.bf16 %v4909_v31, %v4901_v14  ;;  %v5110_v57 = vunpack.c.h.s8.bf16 %v4950_v12  ;;  %v5115_v63 = vunpack.c.l.s8.bf16 %v4955_v25  ;;  %v1127_v35 = vunpack.c.h.s8.bf16 %v8797_v18 }
 0x298   :  { %v6891_v48 = vcombine.high %v1119_v59, %v1123_v22  ;;  %v1131_v8 = vunpack.c.h.s8.bf16 %v8799_v10  ;;  %v6890_v42 = vcombine.low %v1119_v59, %v1123_v22  ;;  %v5114_v19 = vunpack.c.l.s8.bf16 %v4954_v39 }
 0x299   :  { %4715 = vmatpush1.bf16.msra.mxu1 %v6858_v38  ;;  %v1135_v28 = vunpack.c.h.s8.bf16 %v8805_v21  ;;  %v1139_v6 = vunpack.c.h.s8.bf16 %v8807_v43  ;;  %v5119_v45 = vunpack.c.h.s8.bf16 %v4955_v25  ;;  %v5118_v18 = vunpack.c.h.s8.bf16 %v4954_v39  ;;  %v4958_v43 = vld [vmem:[#allocation7 + $0x120] sm:$0xff] }
 0x29a   :  { %5331 = vmatpush1.bf16.msra.mxu0 %v5098_v32  ;;  %4716 = vmatprep.subr.bf16.mxu1 %v6867_v30  ;;  %v6899_v17 = vcombine.high %v1127_v35, %v1131_v8  ;;  %v6898_v55 = vcombine.low %v1127_v35, %v1131_v8  ;;  %v1143_v40 = vunpack.c.h.s8.bf16 %v8813_v50  ;;  %v1147_v5 = vunpack.c.h.s8.bf16 %v8815_v53 }
 0x29b   :  { %5332 = vmatprep.subr.bf16.mxu0 %v5103_v24  ;;  %v6907_v10 = vcombine.high %v1135_v28, %v1139_v6  ;;  %v5123_v21 = vunpack.c.l.s8.bf16 %v4959_v41  ;;  %v6906_v36 = vcombine.low %v1135_v28, %v1139_v6  ;;  %v5122_v14 = vunpack.c.l.s8.bf16 %v4958_v43  ;;  %v4970_v28 = vld [vmem:[#allocation7 + $0x180] sm:$0xff] }
 0x29c   :  { %v6915_v31 = vcombine.high %v1143_v40, %v1147_v5  ;;  %v1151_v38 = vunpack.c.h.s8.bf16 %v8821_v56  ;;  %v1155_v32 = vunpack.c.h.s8.bf16 %v8823_v3  ;;  %v5127_v30 = vunpack.c.h.s8.bf16 %v4959_v41 }
 0x29d   :  { %4717 = vmatpush1.bf16.msra.mxu1 %v6866_v61  ;;  %v6914_v50 = vcombine.low %v1143_v40, %v1147_v5  ;;  %v1159_v53 = vunpack.c.h.s8.bf16 %v8829_v16  ;;  %v1163_v52 = vunpack.c.h.s8.bf16 %v8831_v4  ;;  %v5126_v24 = vunpack.c.h.s8.bf16 %v4958_v43  ;;  %v4962_v61 = vld [vmem:[#allocation7 + $0x140] sm:$0xff]  ;;  %v4928_v5 = vld [vmem:[#allocation7 + $0x30] sm:$0xff] }
 0x29e   :  { %5333 = vmatpush1.bf16.msra.mxu0 %v5102_v29  ;;  %4718 = vmatprep.subr.bf16.mxu1 %v6875_v9  ;;  %v6923_v54 = vcombine.high %v1151_v38, %v1155_v32  ;;  %v5131_v29 = vunpack.c.l.s8.bf16 %v4963_v2  ;;  %v6922_v56 = vcombine.low %v1151_v38, %v1155_v32  ;;  %v5130_v9 = vunpack.c.l.s8.bf16 %v4962_v61  ;;  %v9311_v16 = vld [vmem:[#allocation30_spill] sm:$0xff]  ;;  %v4933_v38 = vld [vmem:[#allocation7 + $0x58] sm:$0xff] }
 0x29f   :  { %5334 = vmatprep.subr.bf16.mxu0 %v5107_v44  ;;  %v6931_v3 = vcombine.high %v1159_v53, %v1163_v52  ;;  %v1167_v37 = vunpack.c.h.s8.bf16 %v8837_v23  ;;  %v1171_v7 = vunpack.c.h.s8.bf16 %v8839_v34  ;;  %v1175_v44 = vunpack.c.h.s8.bf16 %v9311_v16  ;;  %v9312_v4 = vld [vmem:[#allocation34_spill] sm:$0xff]  ;;  %v4936_v16 = vld [vmem:[#allocation7 + $0x70] sm:$0xff] }
 0x2a0   :  { %v1179_v12 = vunpack.c.h.s8.bf16 %v9312_v4  ;;  %v5134_v59 = vunpack.c.h.s8.bf16 %v4962_v61  ;;  %v4974_v43 = vld [vmem:[#allocation7 + $0x1a0] sm:$0xff]  ;;  %v4979_v32 = vld [vmem:[#allocation7 + $0x1c8] sm:$0xff]  ;;  %v5073_v61 = vunpack.c.h.s8.bf16 %v4933_v38 }
 0x2a1   :  { %4719 = vmatpush1.bf16.msra.mxu1 %v6874_v47  ;;  %v5135_v47 = vunpack.c.h.s8.bf16 %v4963_v2  ;;  %v6939_v22 = vcombine.high %v1167_v37, %v1171_v7  ;;  %v6938_v25 = vcombine.low %v1167_v37, %v1171_v7  ;;  %v5069_v2 = vunpack.c.l.s8.bf16 %v4933_v38  ;;  %v4982_v4 = vld [vmem:[#allocation7 + $0x1e0] sm:$0xff] }
 0x2a2   :  { %5335 = vmatpush1.bf16.msra.mxu0 %v5106_v60  ;;  %4720 = vmatprep.subr.bf16.mxu1 %v6883_v46  ;;  %v4967_v60 = vld [vmem:[#allocation7 + $0x168] sm:$0xff]  ;;  %v6930_v46 = vcombine.low %v1159_v53, %v1163_v52  ;;  %v6947_v23 = vcombine.high %v1175_v44, %v1179_v12  ;;  %v5163_v53 = vunpack.c.l.s8.bf16 %v4979_v32  ;;  %v4978_v52 = vld [vmem:[#allocation7 + $0x1c0] sm:$0xff] }
 0x2a3   :  { %5336 = vmatprep.subr.bf16.mxu0 %v5111_v13  ;;  %v5139_v34 = vunpack.c.l.s8.bf16 %v4967_v60  ;;  %v4966_v13 = vld [vmem:[#allocation7 + $0x160] sm:$0xff]  ;;  %v5166_v37 = vunpack.c.h.s8.bf16 %v4978_v52 }
 0x2a4   :  { %v5142_v35 = vunpack.c.h.s8.bf16 %v4966_v13 }
 0x2a5   :  { %4721 = vmatpush1.bf16.msra.mxu1 %v6882_v15  ;;  %v6946_v15 = vcombine.low %v1175_v44, %v1179_v12  ;;  %v5076_v12 = vunpack.c.l.s8.bf16 %v4936_v16 }
 0x2a6   :  { %5337 = vmatpush1.bf16.msra.mxu0 %v5110_v57  ;;  %4722 = vmatprep.subr.bf16.mxu1 %v6891_v48  ;;  %v5138_v57 = vunpack.c.l.s8.bf16 %v4966_v13  ;;  %v5143_v48 = vunpack.c.h.s8.bf16 %v4967_v60 }
 0x2a7   :  { %5349 = vmatprep.subr.bf16.mxu0 %v5115_v63  ;;  %v4925_v63 = vld [vmem:[#allocation7 + $0x18] sm:$0xff]  ;;  %v3919_v39 = vand.u32 %v6946_v15, %v9291_v62 }
 0x2a8   :  { %v5053_v8 = vunpack.c.l.s8.bf16 %v4925_v63 }
 0x2a9   :  { %5339 = vmatmul.mubr.bf16.vlgmr.msra.gmra.mrb[12].mxu0 %v8733_v27  ;;  %4723 = vmatpush1.bf16.msra.mxu1 %v6890_v42  ;;  %v4924_v42 = vld [vmem:[#allocation7 + $0x10] sm:$0xff] }
 0x2aa   :  { %5350 = vmatpush1.bf16.msra.mxu0 %v5114_v19  ;;  %5381 = vmatprep.mubr.bf16.mxu0 %v8912_v11  ;;  %v5052_v6 = vunpack.c.l.s8.bf16 %v4924_v42 }
 0x2ab   :  { %4724 = vmatprep.subr.bf16.mxu1 %v6899_v17  ;;  %5351 = vmatprep.subr.bf16.mxu0 %v5119_v45  ;;  %v5146_v17 = vunpack.c.l.s8.bf16 %v4970_v28  ;;  %v5057_v45 = vunpack.c.h.s8.bf16 %v4925_v63 }
 0x2ad   :  { %4725 = vmatpush1.bf16.msra.mxu1 %v6898_v55  ;;  %v4929_v55 = vld [vmem:[#allocation7 + $0x38] sm:$0xff] }
 0x2ae   :  { %5352 = vmatpush1.bf16.msra.mxu0 %v5118_v18  ;;  %4726 = vmatprep.subr.bf16.mxu1 %v6907_v10  ;;  %v5056_v18 = vunpack.c.h.s8.bf16 %v4924_v42  ;;  %v5150_v10 = vunpack.c.h.s8.bf16 %v4970_v28  ;;  %v5061_v40 = vunpack.c.l.s8.bf16 %v4929_v55 }
 0x2af   :  { %5353 = vmatprep.subr.bf16.mxu0 %v5123_v21 }
 0x2b1   :  { %4727 = vmatpush1.bf16.msra.mxu1 %v6906_v36  ;;  %v5060_v36 = vunpack.c.l.s8.bf16 %v4928_v5 }
 0x2b2   :  { %5354 = vmatpush1.bf16.msra.mxu0 %v5122_v14  ;;  %4728 = vmatprep.subr.bf16.mxu1 %v6915_v31  ;;  %v5154_v14 = vunpack.c.l.s8.bf16 %v4974_v43  ;;  %v5065_v31 = vunpack.c.h.s8.bf16 %v4929_v55 }
 0x2b3   :  { %5355 = vmatprep.subr.bf16.mxu0 %v5127_v30  ;;  %v5158_v30 = vunpack.c.h.s8.bf16 %v4974_v43 }
 0x2b5   :  { %4729 = vmatpush1.bf16.msra.mxu1 %v6914_v50  ;;  %v4932_v50 = vld [vmem:[#allocation7 + $0x50] sm:$0xff] }
 0x2b6   :  { %5356 = vmatpush1.bf16.msra.mxu0 %v5126_v24  ;;  %4741 = vmatprep.subr.bf16.mxu1 %v6923_v54  ;;  %v5068_v24 = vunpack.c.l.s8.bf16 %v4932_v50  ;;  %v5162_v54 = vunpack.c.l.s8.bf16 %v4978_v52 }
 0x2b7   :  { %5357 = vmatprep.subr.bf16.mxu0 %v5131_v29  ;;  %v5167_v29 = vunpack.c.h.s8.bf16 %v4979_v32  ;;  %v4953_v32 = vld [vmem:[#allocation7 + $0xf8] sm:$0xff] }
 0x2b8   :  { %4731 = vmatmul.mubr.bf16.vlgmr.msra.gmra.mrb[8].mxu1 %v9285_v58  ;;  %v3922_v58 = vand.u32 %v6947_v23, %v9291_v62  ;;  %v4975_v62 = vld [vmem:[#allocation7 + $0x1a8] sm:$0xff]  ;;  %v5080_v23 = vunpack.c.h.s8.bf16 %v4936_v16 }
 0x2b9   :  { %4742 = vmatpush1.bf16.msra.mxu1 %v6922_v56  ;;  %4773 = vmatprep.mubr.bf16.mxu1 %v9288_v1  ;;  %v4971_v1 = vld [vmem:[#allocation7 + $0x188] sm:$0xff]  ;;  %v5155_v21 = vunpack.c.l.s8.bf16 %v4975_v62  ;;  %v4937_v56 = vld [vmem:[#allocation7 + $0x78] sm:$0xff] }
 0x2ba   :  { %5358 = vmatpush1.bf16.msra.mxu0 %v5130_v9  ;;  %4743 = vmatprep.subr.bf16.mxu1 %v6931_v3  ;;  %v5147_v19 = vunpack.c.l.s8.bf16 %v4971_v1  ;;  %v5151_v41 = vunpack.c.h.s8.bf16 %v4971_v1  ;;  %v4983_v9 = vld [vmem:[#allocation7 + $0x1e8] sm:$0xff]  ;;  %v5072_v3 = vunpack.c.h.s8.bf16 %v4932_v50  ;;  %v5077_v7 = vunpack.c.l.s8.bf16 %v4937_v56  ;;  %v4945_v1 = vld [vmem:[#allocation7 + $0xb8] sm:$0xff] }
 0x2bb   :  { %5359 = vmatprep.subr.bf16.mxu0 %v5135_v47  ;;  %v5171_v44 = vunpack.c.l.s8.bf16 %v4983_v9  ;;  %v5170_v47 = vunpack.c.l.s8.bf16 %v4982_v4  ;;  %v5081_v60 = vunpack.c.h.s8.bf16 %v4937_v56  ;;  %v5093_v42 = vunpack.c.l.s8.bf16 %v4945_v1 }
 0x2bc   :  { %v5109_v50 = vunpack.c.l.s8.bf16 %v4953_v32 }
 0x2bd   :  { %4744 = vmatpush1.bf16.msra.mxu1 %v6930_v46  ;;  %v5175_v46 = vunpack.c.h.s8.bf16 %v4983_v9  ;;  %v4957_v9 = vld [vmem:[#allocation7 + $0x118] sm:$0xff] }
 0x2be   :  { %5360 = vmatpush1.bf16.msra.mxu0 %v5134_v59  ;;  %4745 = vmatprep.subr.bf16.mxu1 %v6939_v22  ;;  %v4941_v59 = vld [vmem:[#allocation7 + $0x98] sm:$0xff]  ;;  %v4987_v22 = vld [vmem:[#allocation7 + $0x208] sm:$0xff]  ;;  %v5117_v16 = vunpack.c.l.s8.bf16 %v4957_v9 }
 0x2bf   :  { %5361 = vmatprep.subr.bf16.mxu0 %v5139_v34  ;;  %v5174_v34 = vunpack.c.h.s8.bf16 %v4982_v4  ;;  %v5085_v13 = vunpack.c.l.s8.bf16 %v4941_v59  ;;  %v5179_v15 = vunpack.c.l.s8.bf16 %v4987_v22 }
 0x2c1   :  { %4746 = vmatpush1.bf16.msra.mxu1 %v6938_v25  ;;  %v4940_v25 = vld [vmem:[#allocation7 + $0x90] sm:$0xff] }
 0x2c2   :  { %5362 = vmatpush1.bf16.msra.mxu0 %v5138_v57  ;;  %4747 = vmatprep.subr.bf16.mxu1 %v3922_v58  ;;  %v4986_v57 = vld [vmem:[#allocation7 + $0x200] sm:$0xff]  ;;  %v5084_v58 = vunpack.c.l.s8.bf16 %v4940_v25 }
 0x2c3   :  { %5363 = vmatprep.subr.bf16.mxu0 %v5143_v48  ;;  %v5089_v48 = vunpack.c.h.s8.bf16 %v4941_v59  ;;  %v5178_v63 = vunpack.c.l.s8.bf16 %v4986_v57  ;;  %v5182_v28 = vunpack.c.h.s8.bf16 %v4986_v57 }
 0x2c5   :  { %4748 = vmatpush1.bf16.msra.mxu1 %v3919_v39  ;;  %v5183_v39 = vunpack.c.h.s8.bf16 %v4987_v22  ;;  %v4961_v22 = vld [vmem:[#allocation7 + $0x138] sm:$0xff] }
 0x2c6   :  { %5364 = vmatpush1.bf16.msra.mxu0 %v5142_v35  ;;  %5478 = vmatprep.subr.bf16.mxu1 %v5053_v8  ;;  %v4991_v35 = vld [vmem:[#allocation7 + $0x228] sm:$0xff]  ;;  %v5088_v8 = vunpack.c.h.s8.bf16 %v4940_v25  ;;  %v5125_v25 = vunpack.c.l.s8.bf16 %v4961_v22 }
 0x2c7   :  { %5365 = vmatprep.subr.bf16.mxu0 %v5147_v19  ;;  %v4944_v19 = vld [vmem:[#allocation7 + $0xb0] sm:$0xff] }
 0x2c8   :  { %6951 = vmatmul.mubr.msk.bf16.vlgmr.msra.gmra.mrb[8].mxu1 %vm3892_vm2, %v9295_v26  ;;  %v5159_v26 = vunpack.c.h.s8.bf16 %v4975_v62  ;;  %v4949_v62 = vld [vmem:[#allocation7 + $0xd8] sm:$0xff] }
 0x2c9   :  { %5479 = vmatpush1.bf16.msra.mxu1 %v5052_v6  ;;  %5510 = vmatprep.mubr.bf16.mxu1 %v8741_v33  ;;  %v5064_v33 = vunpack.c.h.s8.bf16 %v4928_v5  ;;  %v5187_v6 = vunpack.c.l.s8.bf16 %v4991_v35  ;;  %v5101_v5 = vunpack.c.l.s8.bf16 %v4949_v62 }
 0x2ca   :  { %5366 = vmatpush1.bf16.msra.mxu0 %v5146_v17  ;;  %5480 = vmatprep.subr.bf16.mxu1 %v5057_v45  ;;  %v4990_v17 = vld [vmem:[#allocation7 + $0x220] sm:$0xff]  ;;  %v5092_v45 = vunpack.c.l.s8.bf16 %v4944_v19 }
 0x2cb   :  { %5367 = vmatprep.subr.bf16.mxu0 %v5151_v41  ;;  %v5097_v41 = vunpack.c.h.s8.bf16 %v4945_v1  ;;  %v5186_v55 = vunpack.c.l.s8.bf16 %v4990_v17  ;;  %v5190_v43 = vunpack.c.h.s8.bf16 %v4990_v17  ;;  %v5129_v1 = vunpack.c.h.s8.bf16 %v4961_v22  ;;  %v5010_v17 = vld [vmem:[#allocation7 + $0x2c0] sm:$0xff]  ;;  %v4985_v22 = vld [vmem:[#allocation7 + $0x1f8] sm:$0xff] }
 0x2cd   :  { %5481 = vmatpush1.bf16.msra.mxu1 %v5056_v18  ;;  %v5191_v18 = vunpack.c.h.s8.bf16 %v4991_v35 }
 0x2ce   :  { %5368 = vmatpush1.bf16.msra.mxu0 %v5150_v10  ;;  %5482 = vmatprep.subr.bf16.mxu1 %v5061_v40  ;;  %v4995_v10 = vld [vmem:[#allocation7 + $0x248] sm:$0xff]  ;;  %v5096_v40 = vunpack.c.h.s8.bf16 %v4944_v19  ;;  %v4964_v19 = vld [vmem:[#allocation7 + $0x150] sm:$0xff] }
 0x2cf   :  { %5369 = vmatprep.subr.bf16.mxu0 %v5155_v21  ;;  %v4948_v21 = vld [vmem:[#allocation7 + $0xd0] sm:$0xff] }
 0x2d1   :  { %5483 = vmatpush1.bf16.msra.mxu1 %v5060_v36  ;;  %v5195_v36 = vunpack.c.l.s8.bf16 %v4995_v10 }
 0x2d2   :  { %5370 = vmatpush1.bf16.msra.mxu0 %v5154_v14  ;;  %5484 = vmatprep.subr.bf16.mxu1 %v5065_v31  ;;  %v4994_v14 = vld [vmem:[#allocation7 + $0x240] sm:$0xff]  ;;  %v5100_v31 = vunpack.c.l.s8.bf16 %v4948_v21 }
 0x2d3   :  { %5371 = vmatprep.subr.bf16.mxu0 %v5159_v26  ;;  %v5105_v26 = vunpack.c.h.s8.bf16 %v4949_v62  ;;  %v5194_v38 = vunpack.c.l.s8.bf16 %v4994_v14  ;;  %v5198_v52 = vunpack.c.h.s8.bf16 %v4994_v14  ;;  %v4969_v62 = vld [vmem:[#allocation7 + $0x178] sm:$0xff]  ;;  %v5014_v14 = vld [vmem:[#allocation7 + $0x2e0] sm:$0xff] }
 0x2d5   :  { %5485 = vmatpush1.bf16.msra.mxu1 %v5064_v33  ;;  %v5199_v33 = vunpack.c.h.s8.bf16 %v4995_v10  ;;  %v5015_v10 = vld [vmem:[#allocation7 + $0x2e8] sm:$0xff] }
 0x2d6   :  { %5372 = vmatpush1.bf16.msra.mxu0 %v5158_v30  ;;  %5486 = vmatprep.subr.bf16.mxu1 %v5069_v2  ;;  %v4999_v30 = vld [vmem:[#allocation7 + $0x268] sm:$0xff]  ;;  %v5104_v2 = vunpack.c.h.s8.bf16 %v4948_v21  ;;  %v4968_v21 = vld [vmem:[#allocation7 + $0x170] sm:$0xff] }
 0x2d7   :  { %5373 = vmatprep.subr.bf16.mxu0 %v5163_v53  ;;  %v4952_v53 = vld [vmem:[#allocation7 + $0xf0] sm:$0xff] }
 0x2d9   :  { %5487 = vmatpush1.bf16.msra.mxu1 %v5068_v24  ;;  %v5203_v24 = vunpack.c.l.s8.bf16 %v4999_v30 }
 0x2da   :  { %5374 = vmatpush1.bf16.msra.mxu0 %v5162_v54  ;;  %5488 = vmatprep.subr.bf16.mxu1 %v5073_v61  ;;  %v4998_v54 = vld [vmem:[#allocation7 + $0x260] sm:$0xff]  ;;  %v5108_v61 = vunpack.c.l.s8.bf16 %v4952_v53 }
 0x2db   :  { %5375 = vmatprep.subr.bf16.mxu0 %v5167_v29  ;;  %v5113_v29 = vunpack.c.h.s8.bf16 %v4953_v32  ;;  %v5202_v56 = vunpack.c.l.s8.bf16 %v4998_v54  ;;  %v5206_v4 = vunpack.c.h.s8.bf16 %v4998_v54  ;;  %v4973_v32 = vld [vmem:[#allocation7 + $0x198] sm:$0xff] }
 0x2dd   :  { %5489 = vmatpush1.bf16.msra.mxu1 %v5072_v3  ;;  %v5207_v3 = vunpack.c.h.s8.bf16 %v4999_v30  ;;  %v8944_v30 = vld [vmem:[#allocation7 + $0x308] sm:$0xff] }
 0x2de   :  { %5376 = vmatpush1.bf16.msra.mxu0 %v5166_v37  ;;  %5490 = vmatprep.subr.bf16.mxu1 %v5077_v7  ;;  %v5003_v37 = vld [vmem:[#allocation7 + $0x288] sm:$0xff]  ;;  %v5112_v7 = vunpack.c.h.s8.bf16 %v4952_v53  ;;  %v4972_v53 = vld [vmem:[#allocation7 + $0x190] sm:$0xff] }
 0x2df   :  { %5377 = vmatprep.subr.bf16.mxu0 %v5171_v44  ;;  %v4956_v44 = vld [vmem:[#allocation7 + $0x110] sm:$0xff]  ;;  %v5148_v54 = vunpack.c.l.s8.bf16 %v4972_v53 }
 0x2e1   :  { %5491 = vmatpush1.bf16.msra.mxu1 %v5076_v12  ;;  %v5211_v12 = vunpack.c.l.s8.bf16 %v5003_v37 }
 0x2e2   :  { %5378 = vmatpush1.bf16.msra.mxu0 %v5170_v47  ;;  %5492 = vmatprep.subr.bf16.mxu1 %v5081_v60  ;;  %v5002_v47 = vld [vmem:[#allocation7 + $0x280] sm:$0xff]  ;;  %v5116_v60 = vunpack.c.l.s8.bf16 %v4956_v44 }
 0x2e3   :  { %5379 = vmatprep.subr.bf16.mxu0 %v5175_v46  ;;  %v5121_v46 = vunpack.c.h.s8.bf16 %v4957_v9  ;;  %v5210_v59 = vunpack.c.l.s8.bf16 %v5002_v47  ;;  %v5214_v57 = vunpack.c.h.s8.bf16 %v5002_v47 }
 0x2e5   :  { %5493 = vmatpush1.bf16.msra.mxu1 %v5080_v23  ;;  %v5215_v23 = vunpack.c.h.s8.bf16 %v5003_v37 }
 0x2e6   :  { %5380 = vmatpush1.bf16.msra.mxu0 %v5174_v34  ;;  %5494 = vmatprep.subr.bf16.mxu1 %v5085_v13  ;;  %v5007_v34 = vld [vmem:[#allocation7 + $0x2a8] sm:$0xff]  ;;  %v5120_v13 = vunpack.c.h.s8.bf16 %v4956_v44 }
 0x2e7   :  { %5392 = vmatprep.subr.bf16.mxu0 %v5179_v15  ;;  %v4960_v15 = vld [vmem:[#allocation7 + $0x130] sm:$0xff]  ;;  %v5223_v35 = vunpack.c.h.s8.bf16 %v5007_v34 }
 0x2e9   :  { %5382 = vmatmul.mubr.bf16.vlgmr.msra.gmra.mrb[12].mxu0 %v8908_v0  ;;  %5495 = vmatpush1.bf16.msra.mxu1 %v5084_v58  ;;  %v5219_v58 = vunpack.c.l.s8.bf16 %v5007_v34 }
 0x2ea   :  { %5496 = vmatprep.subr.bf16.mxu1 %v5089_v48  ;;  %5393 = vmatpush1.bf16.msra.mxu0 %v5178_v63  ;;  %v5006_v48 = vld [vmem:[#allocation7 + $0x2a0] sm:$0xff]  ;;  %v5124_v63 = vunpack.c.l.s8.bf16 %v4960_v15 }
 0x2eb   :  { %5394 = vmatprep.subr.bf16.mxu0 %v5183_v39  ;;  %v5218_v39 = vunpack.c.l.s8.bf16 %v5006_v48 }
 0x2ed   :  { %5497 = vmatpush1.bf16.msra.mxu1 %v5088_v8  ;;  %v5011_v8 = vld [vmem:[#allocation7 + $0x2c8] sm:$0xff] }
 0x2ee   :  { %5498 = vmatprep.subr.bf16.mxu1 %v5093_v42  ;;  %5395 = vmatpush1.bf16.msra.mxu0 %v5182_v28  ;;  %v5222_v28 = vunpack.c.h.s8.bf16 %v5006_v48 }
 0x2ef   :  { %5396 = vmatprep.subr.bf16.mxu0 %v5187_v6  ;;  %v5227_v6 = vunpack.c.l.s8.bf16 %v5011_v8 }
 0x2f1   :  { %5499 = vmatpush1.bf16.msra.mxu1 %v5092_v45  ;;  %v5132_v45 = vunpack.c.l.s8.bf16 %v4964_v19 }
 0x2f2   :  { %5500 = vmatprep.subr.bf16.mxu1 %v5097_v41  ;;  %5397 = vmatpush1.bf16.msra.mxu0 %v5186_v55  ;;  %v5226_v55 = vunpack.c.l.s8.bf16 %v5010_v17 }
 0x2f3   :  { %5398 = vmatprep.subr.bf16.mxu0 %v5191_v18  ;;  %v5231_v18 = vunpack.c.h.s8.bf16 %v5011_v8 }
 0x2f5   :  { %5501 = vmatpush1.bf16.msra.mxu1 %v5096_v40  ;;  %v5136_v40 = vunpack.c.h.s8.bf16 %v4964_v19 }
 0x2f6   :  { %5502 = vmatprep.subr.bf16.mxu1 %v5101_v5  ;;  %5399 = vmatpush1.bf16.msra.mxu0 %v5190_v43  ;;  %v5141_v5 = vunpack.c.l.s8.bf16 %v4969_v62  ;;  %v5230_v43 = vunpack.c.h.s8.bf16 %v5010_v17  ;;  %v4989_v17 = vld [vmem:[#allocation7 + $0x218] sm:$0xff] }
 0x2f7   :  { %5400 = vmatprep.subr.bf16.mxu0 %v5195_v36  ;;  %v5235_v36 = vunpack.c.l.s8.bf16 %v5015_v10 }
 0x2f9   :  { %5503 = vmatpush1.bf16.msra.mxu1 %v5100_v31  ;;  %v5140_v31 = vunpack.c.l.s8.bf16 %v4968_v21 }
 0x2fa   :  { %5504 = vmatprep.subr.bf16.mxu1 %v5105_v26  ;;  %5401 = vmatpush1.bf16.msra.mxu0 %v5194_v38  ;;  %v5145_v26 = vunpack.c.h.s8.bf16 %v4969_v62  ;;  %v5234_v38 = vunpack.c.l.s8.bf16 %v5014_v14 }
 0x2fb   :  { %5402 = vmatprep.subr.bf16.mxu0 %v5199_v33  ;;  %v5239_v33 = vunpack.c.h.s8.bf16 %v5015_v10  ;;  %v5181_v10 = vunpack.c.l.s8.bf16 %v4989_v17 }
 0x2fd   :  { %5505 = vmatpush1.bf16.msra.mxu1 %v5104_v2  ;;  %v5144_v2 = vunpack.c.h.s8.bf16 %v4968_v21 }
 0x2fe   :  { %5506 = vmatprep.subr.bf16.mxu1 %v5109_v50  ;;  %5403 = vmatpush1.bf16.msra.mxu0 %v5198_v52  ;;  %v5149_v50 = vunpack.c.l.s8.bf16 %v4973_v32  ;;  %v5238_v52 = vunpack.c.h.s8.bf16 %v5014_v14  ;;  %v5018_v14 = vld [vmem:[#allocation7 + $0x300] sm:$0xff] }
 0x2ff   :  { %5404 = vmatprep.subr.bf16.mxu0 %v5203_v24  ;;  %v5243_v24 = vunpack.c.l.s8.bf16 %v8944_v30 }
 0x301   :  { %5507 = vmatpush1.bf16.msra.mxu1 %v5108_v61  ;;  %v5153_v61 = vunpack.c.h.s8.bf16 %v4973_v32  ;;  %v5185_v32 = vunpack.c.h.s8.bf16 %v4989_v17  ;;  %v5004_v17 = vld [vmem:[#allocation7 + $0x290] sm:$0xff] }
 0x302   :  { %5508 = vmatprep.subr.bf16.mxu1 %v5113_v29  ;;  %5405 = vmatpush1.bf16.msra.mxu0 %v5202_v56  ;;  %v4977_v29 = vld [vmem:[#allocation7 + $0x1b8] sm:$0xff]  ;;  %v5152_v56 = vunpack.c.h.s8.bf16 %v4972_v53 }
 0x303   :  { %5406 = vmatprep.subr.bf16.mxu0 %v5207_v3  ;;  %v5157_v9 = vunpack.c.l.s8.bf16 %v4977_v29  ;;  %v4976_v3 = vld [vmem:[#allocation7 + $0x1b0] sm:$0xff] }
 0x304   :  { %v5156_v37 = vunpack.c.l.s8.bf16 %v4976_v3  ;;  %v5160_v44 = vunpack.c.h.s8.bf16 %v4976_v3  ;;  %v4997_v3 = vld [vmem:[#allocation7 + $0x258] sm:$0xff] }
 0x305   :  { %5509 = vmatpush1.bf16.msra.mxu1 %v5112_v7  ;;  %v5161_v7 = vunpack.c.h.s8.bf16 %v4977_v29 }
 0x306   :  { %5521 = vmatprep.subr.bf16.mxu1 %v5117_v16  ;;  %5407 = vmatpush1.bf16.msra.mxu0 %v5206_v4  ;;  %v4981_v16 = vld [vmem:[#allocation7 + $0x1d8] sm:$0xff] }
 0x307   :  { %5408 = vmatprep.subr.bf16.mxu0 %v5211_v12  ;;  %v5165_v4 = vunpack.c.l.s8.bf16 %v4981_v16  ;;  %v4980_v12 = vld [vmem:[#allocation7 + $0x1d0] sm:$0xff] }
 0x308   :  { %5511 = vmatmul.mubr.bf16.vlgmr.msra.gmra.mrb[12].mxu1 %v8733_v27  ;;  %v4965_v27 = vld [vmem:[#allocation7 + $0x158] sm:$0xff]  ;;  %v5164_v47 = vunpack.c.l.s8.bf16 %v4980_v12 }
 0x309   :  { %5522 = vmatpush1.bf16.msra.mxu1 %v5116_v60  ;;  %5553 = vmatprep.mubr.bf16.mxu1 %v8912_v11  ;;  %v5128_v11 = vunpack.c.h.s8.bf16 %v4960_v15  ;;  %v5133_v42 = vunpack.c.l.s8.bf16 %v4965_v27  ;;  %v5137_v41 = vunpack.c.h.s8.bf16 %v4965_v27  ;;  %v4803_v60 = vsub.s32 4, %v9308_v20 }
 0x30a   :  { %5523 = vmatprep.subr.bf16.mxu1 %v5121_v46  ;;  %5409 = vmatpush1.bf16.msra.mxu0 %v5210_v59  ;;  %v4807_v46 = vsub.s32 5, %v9308_v20  ;;  %v5169_v59 = vunpack.c.h.s8.bf16 %v4981_v16  ;;  %v5173_v15 = vunpack.c.l.s8.bf16 %v4985_v22  ;;  %v5027_v16 = vld [vmem:[#allocation7 + $0x348] sm:$0xff] }
 0x30b   :  { %5410 = vmatprep.subr.bf16.mxu0 %v5215_v23  ;;  %v8949_v23 = vld [vmem:[#allocation11 + $0xf] sm:$0xff] }
 0x30c   :  { %v4804_v34 = vrot.slane %v8949_v23, %v4803_v60 }
 0x30d   :  { %5524 = vmatpush1.bf16.msra.mxu1 %v5120_v13  ;;  %v5168_v13 = vunpack.c.h.s8.bf16 %v4980_v12 }
 0x30e   :  { %5525 = vmatprep.subr.bf16.mxu1 %v5125_v25  ;;  %5411 = vmatpush1.bf16.msra.mxu0 %v5214_v57  ;;  %v4808_v25 = vrot.slane %v8949_v23, %v4807_v46  ;;  %v4984_v57 = vld [vmem:[#allocation7 + $0x1f0] sm:$0xff] }
 0x30f   :  { %5412 = vmatprep.subr.bf16.mxu0 %v5219_v58  ;;  %v8953_v58 = vld [vmem:[#allocation11] sm:$0xff]  ;;  %v5176_v62 = vunpack.c.h.s8.bf16 %v4984_v57 }
 0x310   :  { %v4861_v48 = vrot.slane %v8953_v58, %v4803_v60  ;;  %v5026_v60 = vld [vmem:[#allocation7 + $0x340] sm:$0xff] }
 0x311   :  { %5526 = vmatpush1.bf16.msra.mxu1 %v5124_v63 }
 0x312   :  { %5527 = vmatprep.subr.bf16.mxu1 %v5129_v1  ;;  %5413 = vmatpush1.bf16.msra.mxu0 %v5218_v39  ;;  %v4865_v1 = vrot.slane %v8953_v58, %v4807_v46 }
 0x313   :  { %5414 = vmatprep.subr.bf16.mxu0 %v5223_v35  ;;  %v5172_v35 = vunpack.c.l.s8.bf16 %v4984_v57 }
 0x315   :  { %5528 = vmatpush1.bf16.msra.mxu1 %v5128_v11 }
 0x316   :  { %5529 = vmatprep.subr.bf16.mxu1 %v5133_v42  ;;  %5415 = vmatpush1.bf16.msra.mxu0 %v5222_v28  ;;  %v5177_v42 = vunpack.c.h.s8.bf16 %v4985_v22  ;;  %v5001_v22 = vld [vmem:[#allocation7 + $0x278] sm:$0xff] }
 0x317   :  { %5416 = vmatprep.subr.bf16.mxu0 %v5227_v6  ;;  %v5205_v57 = vunpack.c.l.s8.bf16 %v5001_v22 }
 0x319   :  { %5530 = vmatpush1.bf16.msra.mxu1 %v5132_v45 }
 0x31a   :  { %5531 = vmatprep.subr.bf16.mxu1 %v5137_v41  ;;  %5417 = vmatpush1.bf16.msra.mxu0 %v5226_v55 }
 0x31b   :  { %5418 = vmatprep.subr.bf16.mxu0 %v5231_v18 }
 0x31d   :  { %5532 = vmatpush1.bf16.msra.mxu1 %v5136_v40  ;;  %v4988_v40 = vld [vmem:[#allocation7 + $0x210] sm:$0xff] }
 0x31e   :  { %5533 = vmatprep.subr.bf16.mxu1 %v5141_v5  ;;  %5419 = vmatpush1.bf16.msra.mxu0 %v5230_v43  ;;  %v5184_v53 = vunpack.c.h.s8.bf16 %v4988_v40 }
 0x31f   :  { %5420 = vmatprep.subr.bf16.mxu0 %v5235_v36 }
 0x321   :  { %5534 = vmatpush1.bf16.msra.mxu1 %v5140_v31 }
 0x322   :  { %5535 = vmatprep.subr.bf16.mxu1 %v5145_v26  ;;  %5421 = vmatpush1.bf16.msra.mxu0 %v5234_v38  ;;  %v5180_v26 = vunpack.c.l.s8.bf16 %v4988_v40 }
 0x323   :  { %5422 = vmatprep.subr.bf16.mxu0 %v5239_v33  ;;  %v4993_v33 = vld [vmem:[#allocation7 + $0x238] sm:$0xff] }
 0x325   :  { %5536 = vmatpush1.bf16.msra.mxu1 %v5144_v2  ;;  %v5242_v2 = vunpack.c.l.s8.bf16 %v5018_v14 }
 0x326   :  { %5537 = vmatprep.subr.bf16.mxu1 %v5149_v50  ;;  %5423 = vmatpush1.bf16.msra.mxu0 %v5238_v52  ;;  %v5247_v50 = vunpack.c.h.s8.bf16 %v8944_v30  ;;  %v5023_v52 = vld [vmem:[#allocation7 + $0x328] sm:$0xff] }
 0x327   :  { %5435 = vmatprep.subr.bf16.mxu0 %v5243_v24  ;;  %v5189_v24 = vunpack.c.l.s8.bf16 %v4993_v33  ;;  %v5251_v29 = vunpack.c.l.s8.bf16 %v5023_v52 }
 0x329   :  { %5538 = vmatpush1.bf16.msra.mxu1 %v5148_v54  ;;  %v4992_v54 = vld [vmem:[#allocation7 + $0x230] sm:$0xff] }
 0x32a   :  { %5539 = vmatprep.subr.bf16.mxu1 %v5153_v61  ;;  %v5246_v61 = vunpack.c.h.s8.bf16 %v5018_v14  ;;  %v5008_v14 = vld [vmem:[#allocation7 + $0x2b0] sm:$0xff] }
 0x32d   :  { %5540 = vmatpush1.bf16.msra.mxu1 %v5152_v56  ;;  %v5022_v56 = vld [vmem:[#allocation7 + $0x320] sm:$0xff] }
 0x32e   :  { %5541 = vmatprep.subr.bf16.mxu1 %v5157_v9  ;;  %v5188_v9 = vunpack.c.l.s8.bf16 %v4992_v54  ;;  %v5250_v30 = vunpack.c.l.s8.bf16 %v5022_v56  ;;  %v5254_v12 = vunpack.c.h.s8.bf16 %v5022_v56 }
 0x331   :  { %5542 = vmatpush1.bf16.msra.mxu1 %v5156_v37  ;;  %v5255_v37 = vunpack.c.h.s8.bf16 %v5023_v52 }
 0x332   :  { %5543 = vmatprep.subr.bf16.mxu1 %v5161_v7  ;;  %v5192_v7 = vunpack.c.h.s8.bf16 %v4992_v54  ;;  %v5043_v54 = vld [vmem:[#allocation7 + $0x3c8] sm:$0xff] }
 0x335   :  { %5544 = vmatpush1.bf16.msra.mxu1 %v5160_v44  ;;  %v5197_v44 = vunpack.c.l.s8.bf16 %v4997_v3 }
 0x336   :  { %5545 = vmatprep.subr.bf16.mxu1 %v5165_v4  ;;  %v4996_v4 = vld [vmem:[#allocation7 + $0x250] sm:$0xff] }
 0x337   :  { %v5196_v46 = vunpack.c.l.s8.bf16 %v4996_v4 }
 0x339   :  { %5546 = vmatpush1.bf16.msra.mxu1 %v5164_v47  ;;  %v5259_v47 = vunpack.c.l.s8.bf16 %v5027_v16 }
 0x33a   :  { %5547 = vmatprep.subr.bf16.mxu1 %v5169_v59  ;;  %v5201_v59 = vunpack.c.h.s8.bf16 %v4997_v3 }
 0x33c   :  { %v4560_v63 = vpop.f32.mrb[8].mxu0 }
 0x33d   :  { %v4829_v39 = vmul.f32 %v4804_v34, %v4560_v63  ;;  %v4562_v27 = vpop.f32.mrb[9].mxu0  ;;  %5548 = vmatpush1.bf16.msra.mxu1 %v5168_v13  ;;  %v5263_v13 = vunpack.c.h.s8.bf16 %v5027_v16  ;;  %v5262_v63 = vunpack.c.h.s8.bf16 %v5026_v60  ;;  %v5295_v16 = vunpack.c.h.s8.bf16 %v5043_v54 }
 0x33e   :  { %v4830_v8 = vmul.f32 %v4808_v25, %v4562_v27  ;;  %v4564_v11 = vpop.f32.mrb[10].mxu0  ;;  %5549 = vmatprep.subr.bf16.mxu1 %v5173_v15  ;;  %v5031_v15 = vld [vmem:[#allocation7 + $0x368] sm:$0xff] }
 0x33f   :  { %v4886_v19 = vadd.f32 %v4861_v48, %v4829_v39  ;;  %v4837_v28 = vmul.f32 %v4804_v34, %v4564_v11  ;;  %v4566_v6 = vpop.f32.mrb[11].mxu0  ;;  %v5258_v34 = vunpack.c.l.s8.bf16 %v5026_v60  ;;  %v5030_v39 = vld [vmem:[#allocation7 + $0x360] sm:$0xff] }
 0x340   :  { %v4887_v45 = vadd.f32 %v4865_v1, %v4830_v8  ;;  %v4838_v41 = vmul.f32 %v4808_v25, %v4566_v6  ;;  %v5200_v25 = vunpack.c.h.s8.bf16 %v4996_v4  ;;  %v5005_v8 = vld [vmem:[#allocation7 + $0x298] sm:$0xff]  ;;  %v5266_v11 = vunpack.c.l.s8.bf16 %v5030_v39  ;;  %v5047_v4 = vld [vmem:[#allocation7 + $0x3e8] sm:$0xff] }
 0x341   :  { %v4894_v55 = vadd.f32 %v4861_v48, %v4837_v28  ;;  %5550 = vmatpush1.bf16.msra.mxu1 %v5172_v35  ;;  %v4902_v5 = vmax.f32 %v4886_v19, 0.0  ;;  %v5000_v48 = vld [vmem:[#allocation7 + $0x270] sm:$0xff]  ;;  %v5209_v35 = vunpack.c.h.s8.bf16 %v5001_v22  ;;  %v5035_v28 = vld [vmem:[#allocation7 + $0x388] sm:$0xff]  ;;  %v5213_v6 = vunpack.c.l.s8.bf16 %v5005_v8 }
 0x342   :  { %v4895_v18 = vadd.f32 %v4865_v1, %v4838_v41  ;;  %5551 = vmatprep.subr.bf16.mxu1 %v5177_v42  ;;  %v4903_v43 = vmax.f32 %v4887_v45, 0.0  ;;  %v5267_v1 = vunpack.c.l.s8.bf16 %v5031_v15  ;;  %v5204_v27 = vunpack.c.l.s8.bf16 %v5000_v48 }
 0x343   :  { %v4910_v21 = vmax.f32 %v4894_v55, 0.0  ;;  %v5271_v42 = vunpack.c.h.s8.bf16 %v5031_v15  ;;  %v5208_v19 = vunpack.c.h.s8.bf16 %v5000_v48  ;;  %v5270_v45 = vunpack.c.h.s8.bf16 %v5030_v39  ;;  %v5034_v55 = vld [vmem:[#allocation7 + $0x380] sm:$0xff] }
 0x344   :  { %v4911_v36 = vmax.f32 %v4895_v18, 0.0  ;;  %v5275_v41 = vunpack.c.l.s8.bf16 %v5035_v28  ;;  %v5217_v18 = vunpack.c.h.s8.bf16 %v5005_v8  ;;  %v5274_v40 = vunpack.c.l.s8.bf16 %v5034_v55  ;;  %v7202_v39 = vld [vmem:[#allocation8 + $0x4] ss:$8 sps:$4 sm:$0xff]   ;;  %v5025_v8 = vld [vmem:[#allocation7 + $0x338] sm:$0xff] }
 0x345   :  { %v8957_v31 = vpack.c.bf16 %v4910_v21, %v4902_v5  ;;  %5552 = vmatpush1.bf16.msra.mxu1 %v5176_v62  ;;  %v5212_v62 = vunpack.c.l.s8.bf16 %v5004_v17  ;;  %v5279_v5 = vunpack.c.h.s8.bf16 %v5035_v28  ;;  %v5216_v21 = vunpack.c.h.s8.bf16 %v5004_v17  ;;  %v5029_v17 = vld [vmem:[#allocation7 + $0x358] sm:$0xff] }
 0x346   :  { %v4919_v38 = vpack.c.bf16 %v4911_v36, %v4903_v43  ;;  %5564 = vmatprep.subr.bf16.mxu1 %v5181_v10  ;;  %v5009_v10 = vld [vmem:[#allocation7 + $0x2b8] sm:$0xff]  ;;  %v5039_v43 = vld [vmem:[#allocation7 + $0x3a8] sm:$0xff]  ;;  %v5303_v15 = vunpack.c.h.s8.bf16 %v5047_v4 }
 0x347   :  { %v5221_v36 = vunpack.c.l.s8.bf16 %v5009_v10  ;;  %v5287_v52 = vunpack.c.h.s8.bf16 %v5039_v43 }
 0x348   :  { %5424 = vmatprep.mubr.bf16.mxu0 %v4919_v38  ;;  %5554 = vmatmul.mubr.bf16.vlgmr.msra.gmra.mrb[12].mxu1 %v8908_v0  ;;  %v5193_v0 = vunpack.c.h.s8.bf16 %v4993_v33  ;;  %v5220_v33 = vunpack.c.l.s8.bf16 %v5008_v14 }
 0x349   :  { %5425 = vmatmul.mubr.bf16.vlgmr.msra.gmra.mrb[12].mxu0 %v8957_v31  ;;  %5565 = vmatpush1.bf16.msra.mxu1 %v5180_v26  ;;  %v5278_v26 = vunpack.c.h.s8.bf16 %v5034_v55  ;;  %v5028_v55 = vld [vmem:[#allocation7 + $0x350] sm:$0xff] }
 0x34a   :  { %5596 = vmatprep.mubr.bf16.mxu1 %v4919_v38  ;;  %5566 = vmatprep.subr.bf16.mxu1 %v5185_v32  ;;  %v5283_v38 = vunpack.c.l.s8.bf16 %v5039_v43  ;;  %v5038_v32 = vld [vmem:[#allocation7 + $0x3a0] sm:$0xff]  ;;  %v5264_v43 = vunpack.c.h.s8.bf16 %v5028_v55 }
 0x34b   :  { %5436 = vmatpush1.bf16.msra.mxu0 %v5242_v2  ;;  %v5225_v2 = vunpack.c.h.s8.bf16 %v5009_v10  ;;  %v5286_v56 = vunpack.c.h.s8.bf16 %v5038_v32  ;;  %v5265_v10 = vunpack.c.h.s8.bf16 %v5029_v17 }
 0x34c   :  { %5437 = vmatprep.subr.bf16.mxu0 %v5247_v50  ;;  %v5013_v50 = vld [vmem:[#allocation7 + $0x2d8] sm:$0xff] }
 0x34d   :  { %5567 = vmatpush1.bf16.msra.mxu1 %v5184_v53  ;;  %v5282_v53 = vunpack.c.l.s8.bf16 %v5038_v32 }
 0x34e   :  { %5568 = vmatprep.subr.bf16.mxu1 %v5189_v24  ;;  %v5224_v24 = vunpack.c.h.s8.bf16 %v5008_v14 }
 0x34f   :  { %5438 = vmatpush1.bf16.msra.mxu0 %v5246_v61  ;;  %v5229_v61 = vunpack.c.l.s8.bf16 %v5013_v50 }
 0x350   :  { %5439 = vmatprep.subr.bf16.mxu0 %v5251_v29  ;;  %v5012_v29 = vld [vmem:[#allocation7 + $0x2d0] sm:$0xff] }
 0x351   :  { %5569 = vmatpush1.bf16.msra.mxu1 %v5188_v9  ;;  %v5291_v9 = vunpack.c.l.s8.bf16 %v5043_v54  ;;  %v5228_v3 = vunpack.c.l.s8.bf16 %v5012_v29 }
 0x352   :  { %5570 = vmatprep.subr.bf16.mxu1 %v5193_v0  ;;  %v5042_v0 = vld [vmem:[#allocation7 + $0x3c0] sm:$0xff] }
 0x353   :  { %5440 = vmatpush1.bf16.msra.mxu0 %v5250_v30  ;;  %v5233_v30 = vunpack.c.h.s8.bf16 %v5013_v50  ;;  %v5294_v60 = vunpack.c.h.s8.bf16 %v5042_v0 }
 0x354   :  { %5441 = vmatprep.subr.bf16.mxu0 %v5255_v37  ;;  %v5017_v37 = vld [vmem:[#allocation7 + $0x2f8] sm:$0xff] }
 0x355   :  { %5571 = vmatpush1.bf16.msra.mxu1 %v5192_v7  ;;  %v5290_v7 = vunpack.c.l.s8.bf16 %v5042_v0 }
 0x356   :  { %5572 = vmatprep.subr.bf16.mxu1 %v5197_v44  ;;  %v5232_v44 = vunpack.c.h.s8.bf16 %v5012_v29 }
 0x357   :  { %5442 = vmatpush1.bf16.msra.mxu0 %v5254_v12  ;;  %v5237_v12 = vunpack.c.l.s8.bf16 %v5017_v37 }
 0x358   :  { %5443 = vmatprep.subr.bf16.mxu0 %v5259_v47  ;;  %v5016_v47 = vld [vmem:[#allocation7 + $0x2f0] sm:$0xff] }
 0x359   :  { %5573 = vmatpush1.bf16.msra.mxu1 %v5196_v46  ;;  %v5299_v46 = vunpack.c.l.s8.bf16 %v5047_v4  ;;  %v5236_v22 = vunpack.c.l.s8.bf16 %v5016_v47 }
 0x35a   :  { %5574 = vmatprep.subr.bf16.mxu1 %v5201_v59  ;;  %v5046_v59 = vld [vmem:[#allocation7 + $0x3e0] sm:$0xff] }
 0x35b   :  { %5444 = vmatpush1.bf16.msra.mxu0 %v5258_v34  ;;  %v5241_v34 = vunpack.c.h.s8.bf16 %v5017_v37 }
 0x35c   :  { %5445 = vmatprep.subr.bf16.mxu0 %v5263_v13  ;;  %v5021_v13 = vld [vmem:[#allocation7 + $0x318] sm:$0xff] }
 0x35d   :  { %5575 = vmatpush1.bf16.msra.mxu1 %v5200_v25  ;;  %v5298_v25 = vunpack.c.l.s8.bf16 %v5046_v59  ;;  %v5245_v48 = vunpack.c.l.s8.bf16 %v5021_v13 }
 0x35e   :  { %5576 = vmatprep.subr.bf16.mxu1 %v5205_v57  ;;  %v5240_v57 = vunpack.c.h.s8.bf16 %v5016_v47 }
 0x35f   :  { %5446 = vmatpush1.bf16.msra.mxu0 %v5262_v63  ;;  %v5020_v63 = vld [vmem:[#allocation7 + $0x310] sm:$0xff] }
 0x360   :  { %5447 = vmatprep.subr.bf16.mxu0 %v5267_v1  ;;  %v5302_v1 = vunpack.c.h.s8.bf16 %v5046_v59  ;;  %v7205_v59 = vld [vmem:[#allocation8 + $0x14] ss:$8 sps:$4 sm:$0xff]  }
 0x361   :  { %5577 = vmatpush1.bf16.msra.mxu1 %v5204_v27  ;;  %v5244_v27 = vunpack.c.l.s8.bf16 %v5020_v63 }
 0x362   :  { %5578 = vmatprep.subr.bf16.mxu1 %v5209_v35  ;;  %v5249_v35 = vunpack.c.h.s8.bf16 %v5021_v13  ;;  %v7203_v13 = vld [vmem:[#allocation8 + $0x10] ss:$8 sps:$4 sm:$0xff]  }
 0x363   :  { %5448 = vmatpush1.bf16.msra.mxu0 %v5266_v11  ;;  %v5248_v11 = vunpack.c.h.s8.bf16 %v5020_v63  ;;  %v7206_v63 = vld [vmem:[#allocation8 + $0x20] ss:$8 sps:$4 sm:$0xff]  }
 0x364   :  { %5449 = vmatprep.subr.bf16.mxu0 %v5271_v42  ;;  %v5253_v42 = vunpack.c.l.s8.bf16 %v5025_v8 }
 0x365   :  { %5579 = vmatpush1.bf16.msra.mxu1 %v5208_v19  ;;  %v5024_v19 = vld [vmem:[#allocation7 + $0x330] sm:$0xff] }
 0x366   :  { %5580 = vmatprep.subr.bf16.mxu1 %v5213_v6  ;;  %v5252_v28 = vunpack.c.l.s8.bf16 %v5024_v19  ;;  %v5257_v6 = vunpack.c.h.s8.bf16 %v5025_v8  ;;  %v7209_v8 = vld [vmem:[#allocation8 + $0x30] ss:$8 sps:$4 sm:$0xff]  }
 0x367   :  { %5450 = vmatpush1.bf16.msra.mxu0 %v5270_v45  ;;  %v5256_v45 = vunpack.c.h.s8.bf16 %v5024_v19  ;;  %v7214_v19 = vld [vmem:[#allocation8 + $0x44] ss:$8 sps:$4 sm:$0xff]  }
 0x368   :  { %5451 = vmatprep.subr.bf16.mxu0 %v5275_v41  ;;  %v5261_v41 = vunpack.c.l.s8.bf16 %v5029_v17 }
 0x369   :  { %5581 = vmatpush1.bf16.msra.mxu1 %v5212_v62  ;;  %v4811_v62 = vsub.s32 6, %v9308_v20 }
 0x36a   :  { %5582 = vmatprep.subr.bf16.mxu1 %v5217_v18  ;;  %v4815_v18 = vsub.s32 7, %v9308_v20 }
 0x36b   :  { %5452 = vmatpush1.bf16.msra.mxu0 %v5274_v40  ;;  %v5033_v40 = vld [vmem:[#allocation7 + $0x378] sm:$0xff] }
 0x36c   :  { %5453 = vmatprep.subr.bf16.mxu0 %v5279_v5  ;;  %v4812_v5 = vrot.slane %v8949_v23, %v4811_v62  ;;  %v5269_v14 = vunpack.c.l.s8.bf16 %v5033_v40  ;;  %v4873_v32 = vrot.slane %v8953_v58, %v4815_v18 }
 0x36d   :  { %5583 = vmatpush1.bf16.msra.mxu1 %v5216_v21  ;;  %v4816_v21 = vrot.slane %v8949_v23, %v4815_v18  ;;  %v5273_v23 = vunpack.c.h.s8.bf16 %v5033_v40  ;;  %v5048_v18 = vld [vmem:[#allocation7 + $0x3f0] sm:$0xff] }
 0x36e   :  { %5584 = vmatprep.subr.bf16.mxu1 %v5221_v36  ;;  %v4869_v36 = vrot.slane %v8953_v58, %v4811_v62  ;;  %v7215_v62 = vld [vmem:[#allocation8 + $0x50] ss:$8 sps:$4 sm:$0xff]   ;;  %v5300_v40 = vunpack.c.l.s8.bf16 %v5048_v18 }
 0x36f   :  { %5454 = vmatpush1.bf16.msra.mxu0 %v5278_v26  ;;  %v5032_v26 = vld [vmem:[#allocation7 + $0x370] sm:$0xff] }
 0x370   :  { %5455 = vmatprep.subr.bf16.mxu0 %v5283_v38 }
 0x371   :  { %5585 = vmatpush1.bf16.msra.mxu1 %v5220_v33 }
 0x372   :  { %5586 = vmatprep.subr.bf16.mxu1 %v5225_v2 }
 0x373   :  { %5456 = vmatpush1.bf16.msra.mxu0 %v5282_v53  ;;  %v5268_v53 = vunpack.c.l.s8.bf16 %v5032_v26 }
 0x374   :  { %5457 = vmatprep.subr.bf16.mxu0 %v5287_v52 }
 0x375   :  { %5587 = vmatpush1.bf16.msra.mxu1 %v5224_v24 }
 0x376   :  { %5588 = vmatprep.subr.bf16.mxu1 %v5229_v61 }
 0x377   :  { %5458 = vmatpush1.bf16.msra.mxu0 %v5286_v56  ;;  %v5037_v56 = vld [vmem:[#allocation7 + $0x398] sm:$0xff] }
 0x378   :  { %5459 = vmatprep.subr.bf16.mxu0 %v5291_v9  ;;  %v5277_v37 = vunpack.c.l.s8.bf16 %v5037_v56 }
 0x379   :  { %5589 = vmatpush1.bf16.msra.mxu1 %v5228_v3  ;;  %v5272_v3 = vunpack.c.h.s8.bf16 %v5032_v26  ;;  %v7226_v26 = vld [vmem:[#allocation8 + $0x84] ss:$8 sps:$4 sm:$0xff]  }
 0x37a   :  { %5590 = vmatprep.subr.bf16.mxu1 %v5233_v30 }
 0x37b   :  { %5460 = vmatpush1.bf16.msra.mxu0 %v5290_v7  ;;  %v5036_v7 = vld [vmem:[#allocation7 + $0x390] sm:$0xff] }
 0x37c   :  { %5461 = vmatprep.subr.bf16.mxu0 %v5295_v16  ;;  %v5276_v47 = vunpack.c.l.s8.bf16 %v5036_v7 }
 0x37d   :  { %5591 = vmatpush1.bf16.msra.mxu1 %v5232_v44 }
 0x37e   :  { %5592 = vmatprep.subr.bf16.mxu1 %v5237_v12 }
 0x37f   :  { %5462 = vmatpush1.bf16.msra.mxu0 %v5294_v60  ;;  %v7200_v60 = vld [vmem:[#allocation8] ss:$8 sps:$4 sm:$0xff]  }
 0x380   :  { %5463 = vmatprep.subr.bf16.mxu0 %v5299_v46  ;;  %v5281_v46 = vunpack.c.h.s8.bf16 %v5037_v56  ;;  %v7247_v56 = vld [vmem:[#allocation8 + $0xf4] ss:$8 sps:$4 sm:$0xff]  }
 0x381   :  { %5593 = vmatpush1.bf16.msra.mxu1 %v5236_v22  ;;  %v5041_v22 = vld [vmem:[#allocation7 + $0x3b8] sm:$0xff] }
 0x382   :  { %5594 = vmatprep.subr.bf16.mxu1 %v5241_v34  ;;  %v5280_v34 = vunpack.c.h.s8.bf16 %v5036_v7  ;;  %v7300_v7 = vld [vmem:[#allocation10 + $0x50] sm:$0xff]  }
 0x383   :  { %5464 = vmatpush1.bf16.msra.mxu0 %v5298_v25  ;;  %v5285_v25 = vunpack.c.l.s8.bf16 %v5041_v22 }
 0x384   :  { %5465 = vmatprep.subr.bf16.mxu0 %v5303_v15  ;;  %v5040_v15 = vld [vmem:[#allocation7 + $0x3b0] sm:$0xff] }
 0x385   :  { %5595 = vmatpush1.bf16.msra.mxu1 %v5240_v57  ;;  %v7208_v57 = vld [vmem:[#allocation8 + $0x24] ss:$8 sps:$4 sm:$0xff]  }
 0x386   :  { %5607 = vmatprep.subr.bf16.mxu1 %v5245_v48  ;;  %v5284_v48 = vunpack.c.l.s8.bf16 %v5040_v15 }
 0x387   :  { %5466 = vmatpush1.bf16.msra.mxu0 %v5302_v1  ;;  %v5289_v1 = vunpack.c.h.s8.bf16 %v5041_v22  ;;  %v9313_v22 = vld [vmem:[#allocation28_spill] sm:$0xff] }
 0x388   :  { %5597 = vmatmul.mubr.bf16.vlgmr.msra.gmra.mrb[12].mxu1 %v8957_v31  ;;  %6115 = vmatprep.subr.bf16.mxu0 %v7202_v39  ;;  %v5260_v31 = vunpack.c.l.s8.bf16 %v5028_v55  ;;  %v7211_v39 = vld [vmem:[#allocation8 + $0x34] ss:$8 sps:$4 sm:$0xff]  }
 0x389   :  { %5608 = vmatpush1.bf16.msra.mxu1 %v5244_v27  ;;  %v5045_v27 = vld [vmem:[#allocation7 + $0x3d8] sm:$0xff] }
 0x38a   :  { %5609 = vmatprep.subr.bf16.mxu1 %v5249_v35  ;;  %v5288_v35 = vunpack.c.h.s8.bf16 %v5040_v15  ;;  %v5297_v17 = vunpack.c.h.s8.bf16 %v5045_v27 }
 0x38d   :  { %5610 = vmatpush1.bf16.msra.mxu1 %v5248_v11  ;;  %v5293_v11 = vunpack.c.l.s8.bf16 %v5045_v27 }
 0x38e   :  { %5611 = vmatprep.subr.bf16.mxu1 %v5253_v42  ;;  %v5044_v42 = vld [vmem:[#allocation7 + $0x3d0] sm:$0xff] }
 0x38f   :  { %v5296_v55 = vunpack.c.h.s8.bf16 %v5044_v42 }
 0x391   :  { %5612 = vmatpush1.bf16.msra.mxu1 %v5252_v28  ;;  %v5292_v28 = vunpack.c.l.s8.bf16 %v5044_v42 }
 0x392   :  { %5613 = vmatprep.subr.bf16.mxu1 %v5257_v6  ;;  %v7212_v6 = vld [vmem:[#allocation8 + $0x40] ss:$8 sps:$4 sm:$0xff]  }
 0x395   :  { %5614 = vmatpush1.bf16.msra.mxu1 %v5256_v45  ;;  %v7217_v45 = vld [vmem:[#allocation8 + $0x54] ss:$8 sps:$4 sm:$0xff]  }
 0x396   :  { %5615 = vmatprep.subr.bf16.mxu1 %v5261_v41  ;;  %v5049_v41 = vld [vmem:[#allocation7 + $0x3f8] sm:$0xff] }
 0x399   :  { %5616 = vmatpush1.bf16.msra.mxu1 %v5260_v31  ;;  %v5301_v31 = vunpack.c.l.s8.bf16 %v5049_v41 }
 0x39a   :  { %5617 = vmatprep.subr.bf16.mxu1 %v5265_v10  ;;  %v7220_v10 = vld [vmem:[#allocation8 + $0x64] ss:$8 sps:$4 sm:$0xff]  }
 0x39b   :  { %v4775_v38 = vpop.f32.mrb[8].mxu1 }
 0x39c   :  { %v4831_v33 = vmul.f32 %v4812_v5, %v4775_v38  ;;  %v4777_v2 = vpop.f32.mrb[9].mxu1  ;;  %v7224_v38 = vld [vmem:[#allocation8 + $0x80] ss:$8 sps:$4 sm:$0xff]  }
 0x39d   :  { %v4832_v20 = vmul.f32 %v4816_v21, %v4777_v2  ;;  %v4779_v50 = vpop.f32.mrb[10].mxu1  ;;  %5618 = vmatpush1.bf16.msra.mxu1 %v5264_v43  ;;  %v7223_v43 = vld [vmem:[#allocation8 + $0x74] ss:$8 sps:$4 sm:$0xff]   ;;  %v7232_v2 = vld [vmem:[#allocation8 + $0xa4] ss:$8 sps:$4 sm:$0xff]  }
 0x39e   :  { %v4888_v52 = vadd.f32 %v4869_v36, %v4831_v33  ;;  %v4839_v24 = vmul.f32 %v4812_v5, %v4779_v50  ;;  %v4781_v54 = vpop.f32.mrb[11].mxu1  ;;  %5619 = vmatprep.subr.bf16.mxu1 %v5269_v14  ;;  %v7218_v5 = vld [vmem:[#allocation8 + $0x60] ss:$8 sps:$4 sm:$0xff]   ;;  %v7221_v14 = vld [vmem:[#allocation8 + $0x70] ss:$8 sps:$4 sm:$0xff]  }
 0x39f   :  { %v4889_v61 = vadd.f32 %v4873_v32, %v4832_v20  ;;  %v4840_v29 = vmul.f32 %v4816_v21, %v4781_v54  ;;  %v5305_v21 = vunpack.c.h.s8.bf16 %v5049_v41  ;;  %v7227_v33 = vld [vmem:[#allocation8 + $0x90] ss:$8 sps:$4 sm:$0xff]   ;;  %v7230_v20 = vld [vmem:[#allocation8 + $0xa0] ss:$8 sps:$4 sm:$0xff]   ;;  %v7235_v50 = vld [vmem:[#allocation8 + $0xb4] ss:$8 sps:$4 sm:$0xff]  }
 0x3a0   :  { %v4896_v9 = vadd.f32 %v4869_v36, %v4839_v24  ;;  %v4904_v30 = vmax.f32 %v4888_v52, 0.0  ;;  %v5304_v36 = vunpack.c.h.s8.bf16 %v5048_v18  ;;  %v7238_v52 = vld [vmem:[#allocation8 + $0xc4] ss:$8 sps:$4 sm:$0xff]   ;;  %v7236_v24 = vld [vmem:[#allocation8 + $0xc0] ss:$8 sps:$4 sm:$0xff]  }
 0x3a1   :  { %v4897_v0 = vadd.f32 %v4873_v32, %v4840_v29  ;;  %5620 = vmatpush1.bf16.msra.mxu1 %v5268_v53  ;;  %v4905_v16 = vmax.f32 %v4889_v61, 0.0  ;;  %v7229_v32 = vld [vmem:[#allocation8 + $0x94] ss:$8 sps:$4 sm:$0xff]   ;;  %v7233_v53 = vld [vmem:[#allocation8 + $0xb0] ss:$8 sps:$4 sm:$0xff]  }
 0x3a2   :  { %v4912_v58 = vmax.f32 %v4896_v9, 0.0  ;;  %5621 = vmatprep.subr.bf16.mxu1 %v5273_v23  ;;  %v7241_v54 = vld [vmem:[#allocation8 + $0xd4] ss:$8 sps:$4 sm:$0xff]   ;;  %v7239_v23 = vld [vmem:[#allocation8 + $0xd0] ss:$8 sps:$4 sm:$0xff]  }
 0x3a3   :  { %v4913_v44 = vmax.f32 %v4897_v0, 0.0  ;;  %v7244_v61 = vld [vmem:[#allocation8 + $0xe4] ss:$8 sps:$4 sm:$0xff]   ;;  %v7242_v29 = vld [vmem:[#allocation8 + $0xe0] ss:$8 sps:$4 sm:$0xff]  }
 0x3a4   :  { %v8969_v4 = vpack.c.bf16 %v4912_v58, %v4904_v30  ;;  %v7245_v9 = vld [vmem:[#allocation8 + $0xf0] ss:$8 sps:$4 sm:$0xff]   ;;  %v7250_v0 = vld [vmem:[#allocation8 + $0x104] ss:$8 sps:$4 sm:$0xff]   ;;  %v7248_v18 = vld [vmem:[#allocation8 + $0x100] ss:$8 sps:$4 sm:$0xff]  }
 0x3a5   :  { %5622 = vmatpush1.bf16.msra.mxu1 %v5272_v3  ;;  %v4921_v12 = vpack.c.bf16 %v4913_v44, %v4905_v16  ;;  %v7296_v3 = vld [vmem:[#allocation10 + $0x40] sm:$0xff]   ;;  %v7298_v58 = vld [vmem:[#allocation10 + $0x48] sm:$0xff]   ;;  %v7301_v16 = vld [vmem:[#allocation10 + $0x10] sm:$0xff]  }
 0x3a6   :  { %5623 = vmatprep.subr.bf16.mxu1 %v5277_v37  ;;  %v7297_v30 = vld [vmem:[#allocation10] sm:$0xff]   ;;  %v7299_v37 = vld [vmem:[#allocation10 + $0x8] sm:$0xff]   ;;  %v7302_v44 = vld [vmem:[#allocation10 + $0x58] sm:$0xff]  }
 0x3a7   :  { %5467 = vmatprep.mubr.bf16.mxu0 %v4921_v12  ;;  %5639 = vmatprep.mubr.bf16.mxu1 %v4921_v12  ;;  %v7304_v12 = vld [vmem:[#allocation10 + $0x60] sm:$0xff]  }
 0x3a8   :  { %5468 = vmatmul.mubr.bf16.vlgmr.msra.gmra.mrb[12].mxu0 %v8969_v4 }
 0x3a9   :  { %5624 = vmatpush1.bf16.msra.mxu1 %v5276_v47  ;;  %6116 = vmatpush1.bf16.msra.mxu0 %v7200_v60  ;;  %v7305_v47 = vld [vmem:[#allocation10 + $0x20] sm:$0xff]   ;;  %v7306_v60 = vld [vmem:[#allocation10 + $0x68] sm:$0xff]  }
 0x3aa   :  { %5625 = vmatprep.subr.bf16.mxu1 %v5281_v46  ;;  %6117 = vmatprep.subr.bf16.mxu0 %v7205_v59  ;;  %v363_v46 = vld [vmem:[#allocation11 + $0x17] sm:$0xf]  ;;  %v359_v59 = vld [vmem:[#allocation11 + $0x8] sm:$0xf] }
 0x3ab   :  { %v5683_v15 = vrot.slane %v359_v59, %v9313_v22 }
 0x3ad   :  { %5626 = vmatpush1.bf16.msra.mxu1 %v5280_v34  ;;  %6118 = vmatpush1.bf16.msra.mxu0 %v7203_v13  ;;  %v5654_v34 = vrot.slane %v363_v46, %v9313_v22  ;;  %v9314_v13 = vld [vmem:[#allocation31_spill] sm:$0xff] }
 0x3ae   :  { %5627 = vmatprep.subr.bf16.mxu1 %v5285_v25  ;;  %6119 = vmatprep.subr.bf16.mxu0 %v7208_v57  ;;  %v5658_v25 = vrot.slane %v363_v46, %v9314_v13 }
 0x3b1   :  { %5628 = vmatpush1.bf16.msra.mxu1 %v5284_v48  ;;  %6120 = vmatpush1.bf16.msra.mxu0 %v7206_v63  ;;  %v5687_v48 = vrot.slane %v359_v59, %v9314_v13 }
 0x3b2   :  { %5629 = vmatprep.subr.bf16.mxu1 %v5289_v1  ;;  %6121 = vmatprep.subr.bf16.mxu0 %v7211_v39 }
 0x3b5   :  { %5630 = vmatpush1.bf16.msra.mxu1 %v5288_v35  ;;  %6122 = vmatpush1.bf16.msra.mxu0 %v7209_v8 }
 0x3b6   :  { %5631 = vmatprep.subr.bf16.mxu1 %v5293_v11  ;;  %6123 = vmatprep.subr.bf16.mxu0 %v7214_v19 }
 0x3b9   :  { %5632 = vmatpush1.bf16.msra.mxu1 %v5292_v28  ;;  %6124 = vmatpush1.bf16.msra.mxu0 %v7212_v6 }
 0x3ba   :  { %5633 = vmatprep.subr.bf16.mxu1 %v5297_v17  ;;  %6125 = vmatprep.subr.bf16.mxu0 %v7217_v45 }
 0x3bd   :  { %5634 = vmatpush1.bf16.msra.mxu1 %v5296_v55  ;;  %6126 = vmatpush1.bf16.msra.mxu0 %v7215_v62 }
 0x3be   :  { %5635 = vmatprep.subr.bf16.mxu1 %v5301_v31  ;;  %6127 = vmatprep.subr.bf16.mxu0 %v7220_v10  ;;  %v7253_v10 = vld [vmem:[#allocation8 + $0x114] ss:$8 sps:$4 sm:$0xff]  }
 0x3c1   :  { %5636 = vmatpush1.bf16.msra.mxu1 %v5300_v40  ;;  %6128 = vmatpush1.bf16.msra.mxu0 %v7218_v5  ;;  %v7251_v40 = vld [vmem:[#allocation8 + $0x110] ss:$8 sps:$4 sm:$0xff]   ;;  %v7256_v5 = vld [vmem:[#allocation8 + $0x124] ss:$8 sps:$4 sm:$0xff]  }
 0x3c2   :  { %5637 = vmatprep.subr.bf16.mxu1 %v5305_v21  ;;  %6129 = vmatprep.subr.bf16.mxu0 %v7223_v43  ;;  %v7254_v21 = vld [vmem:[#allocation8 + $0x120] ss:$8 sps:$4 sm:$0xff]   ;;  %v7259_v43 = vld [vmem:[#allocation8 + $0x134] ss:$8 sps:$4 sm:$0xff]  }
 0x3c5   :  { %5638 = vmatpush1.bf16.msra.mxu1 %v5304_v36  ;;  %6130 = vmatpush1.bf16.msra.mxu0 %v7221_v14  ;;  %v7257_v36 = vld [vmem:[#allocation8 + $0x130] ss:$8 sps:$4 sm:$0xff]   ;;  %v7262_v14 = vld [vmem:[#allocation8 + $0x144] ss:$8 sps:$4 sm:$0xff]  }
 0x3c6   :  { %6131 = vmatprep.subr.bf16.mxu0 %v7226_v26  ;;  %7033 = vmatprep.subr.bf16.mxu1 %v7296_v3  ;;  %v7260_v26 = vld [vmem:[#allocation8 + $0x140] ss:$8 sps:$4 sm:$0xff]   ;;  %v7271_v3 = vld [vmem:[#allocation8 + $0x174] ss:$8 sps:$4 sm:$0xff]  }
 0x3c8   :  { %5640 = vmatmul.mubr.bf16.vlgmr.msra.gmra.mrb[12].mxu1 %v8969_v4  ;;  %v7303_v4 = vld [vmem:[#allocation10 + $0x18] sm:$0xff]  }
 0x3c9   :  { %6132 = vmatpush1.bf16.msra.mxu0 %v7224_v38  ;;  %7034 = vmatpush3.bf16.msra.mxu1 %v7297_v30  ;;  %v7265_v38 = vld [vmem:[#allocation8 + $0x154] ss:$8 sps:$4 sm:$0xff]  }
 0x3ca   :  { %6133 = vmatprep.subr.bf16.mxu0 %v7229_v32  ;;  %7035 = vmatprep.subr.bf16.mxu1 %v7298_v58  ;;  %v5662_v32 = vrot.slane %v363_v46, %v8883_v49 }
 0x3cd   :  { %6134 = vmatpush1.bf16.msra.mxu0 %v7227_v33  ;;  %7036 = vmatpush3.bf16.msra.mxu1 %v7299_v37  ;;  %v7263_v33 = vld [vmem:[#allocation8 + $0x150] ss:$8 sps:$4 sm:$0xff]  }
 0x3ce   :  { %6135 = vmatprep.subr.bf16.mxu0 %v7232_v2  ;;  %7037 = vmatprep.subr.bf16.mxu1 %v7300_v7  ;;  %v5666_v2 = vrot.slane %v363_v46, %v8888_v51  ;;  %v7269_v7 = vld [vmem:[#allocation8 + $0x170] ss:$8 sps:$4 sm:$0xff]  }
 0x3d1   :  { %6136 = vmatpush1.bf16.msra.mxu0 %v7230_v20  ;;  %7038 = vmatpush3.bf16.msra.mxu1 %v7301_v16  ;;  %v5691_v20 = vrot.slane %v359_v59, %v8883_v49 }
 0x3d2   :  { %6137 = vmatprep.subr.bf16.mxu0 %v7235_v50  ;;  %7039 = vmatprep.subr.bf16.mxu1 %v7302_v44  ;;  %v7268_v50 = vld [vmem:[#allocation8 + $0x164] ss:$8 sps:$4 sm:$0xff]  }
 0x3d5   :  { %6138 = vmatpush1.bf16.msra.mxu0 %v7233_v53  ;;  %7040 = vmatpush3.bf16.msra.mxu1 %v7303_v4 }
 0x3d6   :  { %6139 = vmatprep.subr.bf16.mxu0 %v7238_v52  ;;  %7041 = vmatprep.subr.bf16.mxu1 %v7304_v12  ;;  %v5695_v52 = vrot.slane %v359_v59, %v8888_v51  ;;  %v7274_v51 = vld [vmem:[#allocation8 + $0x184] ss:$8 sps:$4 sm:$0xff]   ;;  %v7277_v59 = vld [vmem:[#allocation8 + $0x194] ss:$8 sps:$4 sm:$0xff]  }
 0x3d9   :  { %6140 = vmatpush1.bf16.msra.mxu0 %v7236_v24  ;;  %7042 = vmatpush3.bf16.msra.mxu1 %v7305_v47 }
 0x3da   :  { %6141 = vmatprep.subr.bf16.mxu0 %v7241_v54  ;;  %7043 = vmatprep.subr.bf16.mxu1 %v7306_v60  ;;  %v7272_v60 = vld [vmem:[#allocation8 + $0x180] ss:$8 sps:$4 sm:$0xff]  }
 0x3dd   :  { %6142 = vmatpush1.bf16.msra.mxu0 %v7239_v23 }
 0x3de   :  { %6143 = vmatprep.subr.bf16.mxu0 %v7244_v61 }
 0x3e1   :  { %6144 = vmatpush1.bf16.msra.mxu0 %v7242_v29  ;;  %v7266_v29 = vld [vmem:[#allocation8 + $0x160] ss:$8 sps:$4 sm:$0xff]  }
 0x3e2   :  { %6145 = vmatprep.subr.bf16.mxu0 %v7247_v56 }
 0x3e5   :  { %6146 = vmatpush1.bf16.msra.mxu0 %v7245_v9 }
 0x3e6   :  { %6158 = vmatprep.subr.bf16.mxu0 %v7250_v0 }
 0x47b   :  { %v5469_v57 = vpop.f32.mrb[12].mxu0 }
 0x47c   :  { %v5671_v63 = vmul.f32 %v5654_v34, %v5469_v57  ;;  %v5471_v1 = vpop.f32.mrb[13].mxu0  ;;  %v7283_v57 = vld [vmem:[#allocation8 + $0x1b4] ss:$8 sps:$4 sm:$0xff]  }
 0x47d   :  { %v5672_v39 = vmul.f32 %v5658_v25, %v5471_v1  ;;  %v5473_v27 = vpop.f32.mrb[14].mxu0  ;;  %v7284_v1 = vld [vmem:[#allocation8 + $0x1c0] ss:$8 sps:$4 sm:$0xff]  }
 0x47e   :  { %v5700_v35 = vadd.f32 %v5683_v15, %v5671_v63  ;;  %v5675_v8 = vmul.f32 %v5654_v34, %v5473_v27  ;;  %v5475_v11 = vpop.f32.mrb[15].mxu0  ;;  %v7275_v34 = vld [vmem:[#allocation8 + $0x190] ss:$8 sps:$4 sm:$0xff]   ;;  %v7286_v63 = vld [vmem:[#allocation8 + $0x1c4] ss:$8 sps:$4 sm:$0xff]  }
 0x47f   :  { %v5701_v42 = vadd.f32 %v5687_v48, %v5672_v39  ;;  %v5676_v19 = vmul.f32 %v5658_v25, %v5475_v11  ;;  %v7280_v25 = vld [vmem:[#allocation8 + $0x1a4] ss:$8 sps:$4 sm:$0xff]   ;;  %v7289_v39 = vld [vmem:[#allocation8 + $0x1d4] ss:$8 sps:$4 sm:$0xff]   ;;  %v7287_v27 = vld [vmem:[#allocation8 + $0x1d0] ss:$8 sps:$4 sm:$0xff]  }
 0x480   :  { %v5704_v28 = vadd.f32 %v5683_v15, %v5675_v8  ;;  %v5708_v17 = vmax.f32 %v5700_v35, 0.0  ;;  %v7278_v15 = vld [vmem:[#allocation8 + $0x1a0] ss:$8 sps:$4 sm:$0xff]   ;;  %v7292_v35 = vld [vmem:[#allocation8 + $0x1e4] ss:$8 sps:$4 sm:$0xff]  }
 0x481   :  { %v5705_v6 = vadd.f32 %v5687_v48, %v5676_v19  ;;  %v5709_v41 = vmax.f32 %v5701_v42, 0.0  ;;  %v7281_v48 = vld [vmem:[#allocation8 + $0x1b0] ss:$8 sps:$4 sm:$0xff]   ;;  %v7290_v8 = vld [vmem:[#allocation8 + $0x1e0] ss:$8 sps:$4 sm:$0xff]  }
 0x482   :  { %v5712_v45 = vmax.f32 %v5704_v28, 0.0  ;;  %v7295_v11 = vld [vmem:[#allocation8 + $0x1f4] ss:$8 sps:$4 sm:$0xff]   ;;  %v7293_v42 = vld [vmem:[#allocation8 + $0x1f0] ss:$8 sps:$4 sm:$0xff]   ;;  %v7307_v19 = vld [vmem:[#allocation10 + $0x28] sm:$0xff]  }
 0x483   :  { %v5713_v55 = vmax.f32 %v5705_v6, 0.0  ;;  %7044 = vmatpush3.bf16.msra.mxu1 %v7307_v19  ;;  %v7308_v28 = vld [vmem:[#allocation10 + $0x70] sm:$0xff]  }
 0x484   :  { %v5716_v62 = vpack.c.bf16 %v5712_v45, %v5708_v17  ;;  %v7309_v6 = vld [vmem:[#allocation10 + $0x30] sm:$0xff]   ;;  %7045 = vmatprep.subr.bf16.mxu1 %v7308_v28  ;;  %v7310_v17 = vld [vmem:[#allocation10 + $0x78] sm:$0xff]  }
 0x485   :  { %v5717_v31 = vpack.c.bf16 %v5713_v55, %v5709_v41  ;;  %v7311_v45 = vld [vmem:[#allocation10 + $0x38] sm:$0xff]   ;;  %v360_v41 = vld [vmem:[#allocation11 + $0xc] sm:$0x3] }
 0x486   :  { %v5788_v55 = vrot.slane %v360_v41, %v9313_v22  ;;  %v7016_v22 = vld [vmem:[#allocation11 + $0xe] ss:$0 sm:$0xff] }
 0x487   :  { %6147 = vmatprep.mubr.bf16.mxu0 %v5717_v31  ;;  %7046 = vmatpush3.bf16.msra.mxu1 %v7309_v6 }
 0x488   :  { %6148 = vmatmul.mubr.bf16.vlgmr.msra.gmra.mrb[16].mxu0 %v5716_v62  ;;  %7047 = vmatprep.subr.bf16.mxu1 %v7310_v17  ;;  %v5792_v62 = vrot.slane %v360_v41, %v9314_v13 }
 0x489   :  { %6159 = vmatpush1.bf16.msra.mxu0 %v7248_v18 }
 0x48a   :  { %6160 = vmatprep.subr.bf16.mxu0 %v7253_v10 }
 0x48b   :  { %7048 = vmatpush3.bf16.msra.mxu1 %v7311_v45 }
 0x48d   :  { %6161 = vmatpush1.bf16.msra.mxu0 %v7251_v40 }
 0x48e   :  { %6162 = vmatprep.subr.bf16.mxu0 %v7256_v5 }
 0x491   :  { %6163 = vmatpush1.bf16.msra.mxu0 %v7254_v21 }
 0x492   :  { %6164 = vmatprep.subr.bf16.mxu0 %v7259_v43 }
 0x495   :  { %6165 = vmatpush1.bf16.msra.mxu0 %v7257_v36 }
 0x496   :  { %6166 = vmatprep.subr.bf16.mxu0 %v7262_v14 }
 0x499   :  { %6167 = vmatpush1.bf16.msra.mxu0 %v7260_v26 }
 0x49a   :  { %6168 = vmatprep.subr.bf16.mxu0 %v7265_v38 }
 0x49b   :  { %v5641_v53 = vpop.f32.mrb[12].mxu1 }
 0x49c   :  { %v5673_v24 = vmul.f32 %v5662_v32, %v5641_v53  ;;  %v5643_v54 = vpop.f32.mrb[13].mxu1 }
 0x49d   :  { %v5674_v23 = vmul.f32 %v5666_v2, %v5643_v54  ;;  %6169 = vmatpush1.bf16.msra.mxu0 %v7263_v33  ;;  %v5645_v61 = vpop.f32.mrb[14].mxu1 }
 0x49e   :  { %v5702_v56 = vadd.f32 %v5691_v20, %v5673_v24  ;;  %v5677_v9 = vmul.f32 %v5662_v32, %v5645_v61  ;;  %v5647_v0 = vpop.f32.mrb[15].mxu1  ;;  %6170 = vmatprep.subr.bf16.mxu0 %v7268_v50 }
 0x49f   :  { %v5703_v30 = vadd.f32 %v5695_v52, %v5674_v23  ;;  %v5678_v58 = vmul.f32 %v5666_v2, %v5647_v0 }
 0x4a0   :  { %v5706_v37 = vadd.f32 %v5691_v20, %v5677_v9  ;;  %v5710_v16 = vmax.f32 %v5702_v56, 0.0 }
 0x4a1   :  { %v5707_v49 = vadd.f32 %v5695_v52, %v5678_v58  ;;  %6171 = vmatpush1.bf16.msra.mxu0 %v7266_v29  ;;  %v5711_v4 = vmax.f32 %v5703_v30, 0.0 }
 0x4a2   :  { %v5714_v44 = vmax.f32 %v5706_v37, 0.0  ;;  %6172 = vmatprep.subr.bf16.mxu0 %v7271_v3 }
 0x4a3   :  { %v5715_v12 = vmax.f32 %v5707_v49, 0.0 }
 0x4a4   :  { %v5718_v47 = vpack.c.bf16 %v5714_v44, %v5710_v16 }
 0x4a5   :  { %6173 = vmatpush1.bf16.msra.mxu0 %v7269_v7  ;;  %v5719_v46 = vpack.c.bf16 %v5715_v12, %v5711_v4 }
 0x4a6   :  { %6174 = vmatprep.subr.bf16.mxu0 %v7274_v51 }
 0x4a7   :  { %6190 = vmatprep.mubr.bf16.mxu0 %v5719_v46 }
 0x4a9   :  { %6175 = vmatpush1.bf16.msra.mxu0 %v7272_v60 }
 0x4aa   :  { %6176 = vmatprep.subr.bf16.mxu0 %v7277_v59 }
 0x4ad   :  { %6177 = vmatpush1.bf16.msra.mxu0 %v7275_v34 }
 0x4ae   :  { %6178 = vmatprep.subr.bf16.mxu0 %v7280_v25 }
 0x4b1   :  { %6179 = vmatpush1.bf16.msra.mxu0 %v7278_v15 }
 0x4b2   :  { %6180 = vmatprep.subr.bf16.mxu0 %v7283_v57 }
 0x4b5   :  { %6181 = vmatpush1.bf16.msra.mxu0 %v7281_v48 }
 0x4b6   :  { %6182 = vmatprep.subr.bf16.mxu0 %v7286_v63 }
 0x4b9   :  { %6183 = vmatpush1.bf16.msra.mxu0 %v7284_v1 }
 0x4ba   :  { %6184 = vmatprep.subr.bf16.mxu0 %v7289_v39 }
 0x4bd   :  { %6185 = vmatpush1.bf16.msra.mxu0 %v7287_v27 }
 0x4be   :  { %6186 = vmatprep.subr.bf16.mxu0 %v7292_v35 }
 0x4c1   :  { %6187 = vmatpush1.bf16.msra.mxu0 %v7290_v8 }
 0x4c2   :  { %6188 = vmatprep.subr.bf16.mxu0 %v7295_v11 }
 0x4c5   :  { %6189 = vmatpush1.bf16.msra.mxu0 %v7293_v42 }
 0x4c8   :  { %6191 = vmatmul.mubr.bf16.vlgmr.msra.gmra.mrb[16].mxu0 %v5718_v47 }
 0x59b   :  { %v6192_v31 = vpop.f32.mrb[16].mxu0 }
 0x59c   :  { %v7063_v18 = vadd.f32 %v6192_v31, %v5788_v55  ;;  %v6194_v10 = vpop.f32.mrb[17].mxu0 }
 0x59d   :  { %v7064_v40 = vadd.f32 %v6194_v10, %v5792_v62  ;;  %v6196_v5 = vpop.f32.mrb[18].mxu0 }
 0x59e   :  { %v7065_v21 = vadd.f32 %v6196_v5, %v5788_v55  ;;  %v6198_v43 = vpop.f32.mrb[19].mxu0  ;;  %v6201_v14 = vmax.f32 %v7063_v18, 0.0 }
 0x59f   :  { %v7066_v36 = vadd.f32 %v6198_v43, %v5792_v62  ;;  %v6202_v38 = vmax.f32 %v7064_v40, 0.0 }
 0x5a0   :  { %v6203_v26 = vmax.f32 %v7065_v21, 0.0 }
 0x5a1   :  { %v6204_v32 = vmax.f32 %v7066_v36, 0.0 }
 0x5a2   :  { %v6205_v33 = vpack.c.bf16 %v6203_v26, %v6201_v14 }
 0x5a3   :  { %v6206_v2 = vpack.c.bf16 %v6204_v32, %v6202_v38 }
 0x5a5   :  { %6373 = vmatprep.mubr.bf16.mxu1 %v6206_v2 }
 0x5a6   :  { %6374 = vmatmul.mubr.bf16.vlgmr.msra.gmra.mrb[16].mxu1 %v6205_v33 }
 0x679   :  { %v7049_v20 = vpop.f32.mrb[16].mxu1 }
 0x67a   :  { %v7050_v50 = vpop.f32.mrb[17].mxu1 }
 0x67b   :  { %v7051_v13 = vadd.f32 %v7050_v50, %v7049_v20  ;;  %v7052_v53 = vpop.f32.mrb[18].mxu1 }
 0x67c   :  { %v7053_v52 = vpop.f32.mrb[19].mxu1 }
 0x67d   :  { %v6376_v24 = vadd.f32 %v7051_v13, %v7016_v22  ;;  %v7054_v54 = vadd.f32 %v7053_v52, %v7052_v53 }
 0x67f   :  { %6382 = vst [vmem:[#allocation13] sm:$0xff] %v6376_v24  ;;  %v6379_v23 = vadd.f32 %v7054_v54, %v7016_v22 }
 0x681   :  { %6383 = vst [vmem:[#allocation13 + $0x8] sm:$0xff] %v6379_v23 }
 0x682   :  { %6388 = vsyncadd [#allocation4], 224  ;;  %s7534_s5 = smov [#allocation13]  }
 0x683   :  { %s6389_s25 = sshll.u32 %s7534_s5, 4  ;;  %s6390_s25 = int_to_ptr.vmem [resolvable:$true] %s6389_s25 }
 0x684   :  { %s7483_s26 = scalar_lea.vmem %s6390_s25, 32  ;;  %s7487_s27 = scalar_lea.vmem %s6390_s25, 256 }
 0x685   :  { %p7484_p6 = scmp.ne.s32.totalorder %s6390_s25, %s7483_s26  ;;  %p7488_p7 = scmp.lt.s32.totalorder %s6390_s25, %s6390_s25 }
 0x686   :  { %p7489_p8 = scmp.lt.s32.totalorder %s7487_s27, %s7483_s26 }
 0x688   :  { %p7490_p9 = por %p7489_p8, %p7488_p7 }
 0x68a   :  { %p7491_p10 = pnand %p7490_p9, %p7484_p6 }
 0x68c   :  { %7494 = shalt.err (!%p7491_p10)
}
 0x68d   :  { %s7495_s30 = scalar_lea.hbm %s9003_s6, 32 }
 0x68e   :  { %p7496_p11 = scmp.ne.s32.totalorder %s9003_s6, %s7495_s30  ;;  %p7499_p12 = scmp.lt.u32.totalorder %s7495_s30, %s9003_s6 }
 0x690   :  { %p7501_p13 = pnand %p7499_p12, %p7496_p11 }
 0x692   :  { %7504 = shalt.err (!%p7501_p13)
}
 0x693   :  { %s7535_s10 = smov 2  }
 0x694   :  { %6395 = dma.vmem_to_hbm [thread:$0]  %s6390_s25, 32, %s9003_s6, [#allocation4], %s7526_s23, %s7526_s23, %s7535_s10  }
 0x695   :  { %7513 = dma.done.wait [#allocation4], 256  }
 0x696   :  { %7514 = vsyncadd [#allocation4], 4294967040 }
 0x697   :  { %6399 = vsyncpa [#allocation3], 1 }
 0x698   :  { %6400 = vsyncpa [#allocation6], 1 }
 0x699   :  { %6401 = vsyncpa [#allocation9], 1 }
 0x69a   :  { %6402 = vsyncpa [#allocation12], 1 }
 0x69b   :  { %6403 = vsyncpa [#allocation4], 1 }

</bundles_post_ra>
